<compile_context>
chip_gen: v7x
topology: tpu7x:2x2x1
jax: 0.10.0
libtpu: 0.0.40
codegen_flags: <defaults>
</compile_context>

<pallas_src>
import jax
import jax.numpy as jnp
from jax.experimental import pallas as pl
from jax.experimental.pallas import tpu as pltpu

EMBED_DIM = 32
NUM_HEADS = 4
HEAD_DIM = EMBED_DIM // NUM_HEADS
MLP_RATIO = 4.0
DIM_FF = int(EMBED_DIM * MLP_RATIO)
DEPTH = 2
LN_EPS = 1e-5


# ----------------------------- in-kernel helpers -----------------------------

def _layernorm(x, gamma, beta):
    mu = jnp.mean(x, axis=-1, keepdims=True)
    xc = x - mu
    var = jnp.mean(xc * xc, axis=-1, keepdims=True)
    return xc * jax.lax.rsqrt(var + LN_EPS) * gamma + beta


def _attn_core(q2, k2, v2, B, Sq, Sk, wo_h, bo):
    """Multi-head attention given already-projected q/k/v (2-D, (B*S, E)).

    The head concat is folded into the output projection: each head's context is
    accumulated via its (D, E) slab of out_w.T.
    """
    E, H, D = EMBED_DIM, NUM_HEADS, HEAD_DIM
    q3 = q2.reshape(B, Sq, E)
    k3 = k2.reshape(B, Sk, E)
    v3 = v2.reshape(B, Sk, E)
    scale = 1.0 / (D ** 0.5)
    acc = jnp.zeros((B * Sq, E), jnp.float32)
    for h in range(H):  # static unroll over heads
        sl = slice(h * D, (h + 1) * D)
        qh, kh, vh = q3[:, :, sl], k3[:, :, sl], v3[:, :, sl]
        s = jnp.einsum('bqd,bkd->bqk', qh, kh,
                       preferred_element_type=jnp.float32) * scale
        m = jnp.max(s, axis=-1, keepdims=True)
        p = jnp.exp(s - m)
        p = p * pl.reciprocal(jnp.sum(p, axis=-1, keepdims=True), approx=True)
        oh = jnp.einsum('bqk,bkd->bqd', p, vh,
                        preferred_element_type=jnp.float32)
        acc = acc + jnp.dot(oh.reshape(B * Sq, D), wo_h[h],
                            preferred_element_type=jnp.float32)
    return acc + bo


# --------------------------------- kernel ------------------------------------

_PARAM_ORDER = [
    "sa_wqkv", "sa_bqkv", "sa_wo_h", "sa_bo",
    "ca_wq", "ca_bq", "ca_wkv", "ca_bkv", "ca_wo_h", "ca_bo",
    "ln1_w", "ln1_b", "ln2_w", "ln2_b", "ln3_w", "ln3_b",
    "lin1_wt", "lin1_b", "lin2_wt", "lin2_b",
]


def decoder_kernel(x_ref, mem_ref, *refs):
    out_ref = refs[-1]
    pr = dict(zip(_PARAM_ORDER, refs[:-1]))

    B, S, E = x_ref.shape
    Sm = mem_ref.shape[1]
    depth = pr["ln1_w"].shape[0]

    x2 = x_ref[...].reshape(B * S, E)
    mem2 = mem_ref[...].reshape(B * Sm, E)

    for l in range(depth):  # static unroll over layers (all weights resident in VMEM)
        def g(name, _l=l):
            return pr[name][_l]

        # --- self-attention block (post-norm), fused QKV projection ---
        qkv = jnp.dot(x2, g("sa_wqkv"),
                      preferred_element_type=jnp.float32) + g("sa_bqkv")
        q = qkv[:, 0:E]
        k = qkv[:, E:2 * E]
        v = qkv[:, 2 * E:3 * E]
        sa = _attn_core(q, k, v, B, S, S, g("sa_wo_h"), g("sa_bo"))
        x2 = _layernorm(x2 + sa, g("ln1_w"), g("ln1_b"))

        # --- cross-attention block, fused KV projection of memory ---
        q = jnp.dot(x2, g("ca_wq"), preferred_element_type=jnp.float32) + g("ca_bq")
        kv = jnp.dot(mem2, g("ca_wkv"),
                     preferred_element_type=jnp.float32) + g("ca_bkv")
        k = kv[:, 0:E]
        v = kv[:, E:2 * E]
        ca = _attn_core(q, k, v, B, S, Sm, g("ca_wo_h"), g("ca_bo"))
        x2 = _layernorm(x2 + ca, g("ln2_w"), g("ln2_b"))

        # --- feed-forward block (ReLU) ---
        h = jnp.maximum(
            jnp.dot(x2, g("lin1_wt"), preferred_element_type=jnp.float32) + g("lin1_b"),
            0.0)
        ff = jnp.dot(h, g("lin2_wt"), preferred_element_type=jnp.float32) + g("lin2_b")
        x2 = _layernorm(x2 + ff, g("ln3_w"), g("ln3_b"))

    out_ref[...] = x2.reshape(B, S, E)


# ------------------------- host-side param preprocessing ----------------------

def _prepare_layer(p):
    """Pre-transpose / pre-split PyTorch-layout weights so the kernel does no
    weight transposes and no lane-slicing of weight/bias vregs."""
    E, H, D = EMBED_DIM, NUM_HEADS, HEAD_DIM
    return {
        "sa_wqkv": p["sa_in_w"].T,                                   # (E, 3E)
        "sa_bqkv": p["sa_in_b"],                                     # (1, 3E)
        "sa_wo_h": p["sa_out_w"].T.reshape(H, D, E),                 # (H, D, E)
        "sa_bo": p["sa_out_b"],
        "ca_wq": p["ca_in_w"][0:E].T,                                # (E, E)
        "ca_bq": p["ca_in_b"][:, 0:E],
        "ca_wkv": p["ca_in_w"][E:3 * E].T,                           # (E, 2E)
        "ca_bkv": p["ca_in_b"][:, E:3 * E],                          # (1, 2E)
        "ca_wo_h": p["ca_out_w"].T.reshape(H, D, E),
        "ca_bo": p["ca_out_b"],
        "ln1_w": p["ln1_w"], "ln1_b": p["ln1_b"],
        "ln2_w": p["ln2_w"], "ln2_b": p["ln2_b"],
        "ln3_w": p["ln3_w"], "ln3_b": p["ln3_b"],
        "lin1_wt": p["lin1_w"].T,                                    # (E, F)
        "lin1_b": p["lin1_b"],
        "lin2_wt": p["lin2_w"].T,                                    # (F, E)
        "lin2_b": p["lin2_b"],
    }


def prepare_params(layer_params):
    per_layer = [_prepare_layer(p) for p in layer_params]
    return {name: jnp.stack([lp[name] for lp in per_layer]) for name in _PARAM_ORDER}


# --------------------------------- wrapper ------------------------------------

def transformer_decoder(x, memory, layer_params):
    B, S, E = x.shape
    stacked = prepare_params(layer_params)
    args = [x, memory] + [stacked[n] for n in _PARAM_ORDER]

    def full_spec(shape):
        nd = len(shape)
        return pl.BlockSpec(shape, lambda i, _nd=nd: (0,) * _nd)

    return pl.pallas_call(
        decoder_kernel,
        out_shape=jax.ShapeDtypeStruct((B, S, E), jnp.float32),
        grid=(1,),
        in_specs=[full_spec(a.shape) for a in args],
        out_specs=full_spec((B, S, E)),
        compiler_params=pltpu.CompilerParams(dimension_semantics=("arbitrary",)),
    )(*args)


# ------------------------------ pure-JAX reference ---------------------------

def _layernorm_ref(x, g, b):
    mu = x.mean(-1, keepdims=True)
    xc = x - mu
    var = (xc * xc).mean(-1, keepdims=True)
    return xc * jax.lax.rsqrt(var + LN_EPS) * g[0] + b[0]


def _mha_ref(q_in, kv_in, in_w, in_b, out_w, out_b):
    E, H, D = EMBED_DIM, NUM_HEADS, HEAD_DIM
    q = q_in @ in_w[:E].T + in_b[0, :E]
    k = kv_in @ in_w[E:2 * E].T + in_b[0, E:2 * E]
    v = kv_in @ in_w[2 * E:].T + in_b[0, 2 * E:]
    B, S, _ = q.shape
    Sk = k.shape[1]
    qh = q.reshape(B, S, H, D).transpose(0, 2, 1, 3)
    kh = k.reshape(B, Sk, H, D).transpose(0, 2, 1, 3)
    vh = v.reshape(B, Sk, H, D).transpose(0, 2, 1, 3)
    s = jnp.einsum('bhqd,bhkd->bhqk', qh, kh) / (D ** 0.5)
    p = jax.nn.softmax(s, axis=-1)
    o = jnp.einsum('bhqk,bhkd->bhqd', p, vh).transpose(0, 2, 1, 3).reshape(B, S, E)
    return o @ out_w.T + out_b[0]


def _decoder_layer_ref(x, memory, p):
    sa = _mha_ref(x, x, p["sa_in_w"], p["sa_in_b"], p["sa_out_w"], p["sa_out_b"])
    x = _layernorm_ref(x + sa, p["ln1_w"], p["ln1_b"])
    ca = _mha_ref(x, memory, p["ca_in_w"], p["ca_in_b"], p["ca_out_w"], p["ca_out_b"])
    x = _layernorm_ref(x + ca, p["ln2_w"], p["ln2_b"])
    h = jnp.maximum(x @ p["lin1_w"].T + p["lin1_b"][0], 0.0)
    ff = h @ p["lin2_w"].T + p["lin2_b"][0]
    return _layernorm_ref(x + ff, p["ln3_w"], p["ln3_b"])


def transformer_decoder_ref(x, memory, layer_params):
    for p in layer_params:
        x = _decoder_layer_ref(x, memory, p)
    return x


# ------------------------------ parameter init --------------------------------

def init_layer_params(key, E, F):
    ks = jax.random.split(key, 12)
    w = lambda k, shape: jax.random.normal(k, shape, jnp.float32) * 0.02
    return {
        "sa_in_w": w(ks[0], (3 * E, E)), "sa_in_b": w(ks[1], (1, 3 * E)),
        "sa_out_w": w(ks[2], (E, E)),    "sa_out_b": w(ks[3], (1, E)),
        "ca_in_w": w(ks[4], (3 * E, E)), "ca_in_b": w(ks[5], (1, 3 * E)),
        "ca_out_w": w(ks[6], (E, E)),    "ca_out_b": w(ks[7], (1, E)),
        "lin1_w": w(ks[8], (F, E)),      "lin1_b": w(ks[9], (1, F)),
        "lin2_w": w(ks[10], (E, F)),     "lin2_b": w(ks[11], (1, E)),
        "ln1_w": jnp.ones((1, E), jnp.float32), "ln1_b": jnp.zeros((1, E), jnp.float32),
        "ln2_w": jnp.ones((1, E), jnp.float32), "ln2_b": jnp.zeros((1, E), jnp.float32),
        "ln3_w": jnp.ones((1, E), jnp.float32), "ln3_b": jnp.zeros((1, E), jnp.float32),
    }


if __name__ == "__main__":
    key = jax.random.PRNGKey(0)
    B, S_TGT, S_MEM = 2, 8, 8
    k_x, k_m, k_p = jax.random.split(key, 3)
    x = jax.random.normal(k_x, (B, S_TGT, EMBED_DIM), jnp.float32)
    memory = jax.random.normal(k_m, (B, S_MEM, EMBED_DIM), jnp.float32)
    layer_keys = jax.random.split(k_p, DEPTH)
    params = [init_layer_params(k, EMBED_DIM, DIM_FF) for k in layer_keys]

    out = transformer_decoder(x, memory, params)
    out = jax.block_until_ready(out)

    ref = transformer_decoder_ref(x, memory, params)
    assert out.shape == (B, S_TGT, EMBED_DIM)
    # Tolerance loosened slightly vs. 1e-4 because the kernel uses the EUP
    # approximate reciprocal for the softmax normalization.
    assert jnp.allclose(out, ref, atol=5e-3, rtol=5e-3), float(jnp.max(jnp.abs(out - ref)))
    # TODO(synk): dropout is treated as identity (eval-mode); stochastic training-mode
    # dropout has no deterministic Pallas equivalent to compare against.
    print("KERNEL_OK")
</pallas_src>

<mosaic_0001>
module attributes {stable_mosaic.version = 11 : i64} {
  func.func @decoder_kernel(%arg0: i32, %arg1: memref<2x8x32xf32, #tpu.memory_space<vmem>>, %arg2: memref<2x8x32xf32, #tpu.memory_space<vmem>>, %arg3: memref<2x32x96xf32, #tpu.memory_space<vmem>>, %arg4: memref<2x1x96xf32, #tpu.memory_space<vmem>>, %arg5: memref<2x4x8x32xf32, #tpu.memory_space<vmem>>, %arg6: memref<2x1x32xf32, #tpu.memory_space<vmem>>, %arg7: memref<2x32x32xf32, #tpu.memory_space<vmem>>, %arg8: memref<2x1x32xf32, #tpu.memory_space<vmem>>, %arg9: memref<2x32x64xf32, #tpu.memory_space<vmem>>, %arg10: memref<2x1x64xf32, #tpu.memory_space<vmem>>, %arg11: memref<2x4x8x32xf32, #tpu.memory_space<vmem>>, %arg12: memref<2x1x32xf32, #tpu.memory_space<vmem>>, %arg13: memref<2x1x32xf32, #tpu.memory_space<vmem>>, %arg14: memref<2x1x32xf32, #tpu.memory_space<vmem>>, %arg15: memref<2x1x32xf32, #tpu.memory_space<vmem>>, %arg16: memref<2x1x32xf32, #tpu.memory_space<vmem>>, %arg17: memref<2x1x32xf32, #tpu.memory_space<vmem>>, %arg18: memref<2x1x32xf32, #tpu.memory_space<vmem>>, %arg19: memref<2x32x128xf32, #tpu.memory_space<vmem>>, %arg20: memref<2x1x128xf32, #tpu.memory_space<vmem>>, %arg21: memref<2x128x32xf32, #tpu.memory_space<vmem>>, %arg22: memref<2x1x32xf32, #tpu.memory_space<vmem>>, %arg23: memref<2x8x32xf32, #tpu.memory_space<vmem>>) attributes {dimension_semantics = [#tpu.dimension_semantics<arbitrary>], iteration_bounds = array<i64: 1>, scalar_prefetch = 0 : i64, scratch_operands = 0 : i64, tpu.core_type = #tpu.core_type<tc>, window_params = [{pipeline_mode = #tpu.pipeline_mode<synchronous>, transform_indices = @transform_0, window_bounds = array<i64: 2, 8, 32>}, {pipeline_mode = #tpu.pipeline_mode<synchronous>, transform_indices = @transform_1, window_bounds = array<i64: 2, 8, 32>}, {pipeline_mode = #tpu.pipeline_mode<synchronous>, transform_indices = @transform_2, window_bounds = array<i64: 2, 32, 96>}, {pipeline_mode = #tpu.pipeline_mode<synchronous>, transform_indices = @transform_3, window_bounds = array<i64: 2, 1, 96>}, {pipeline_mode = #tpu.pipeline_mode<synchronous>, transform_indices = @transform_4, window_bounds = array<i64: 2, 4, 8, 32>}, {pipeline_mode = #tpu.pipeline_mode<synchronous>, transform_indices = @transform_5, window_bounds = array<i64: 2, 1, 32>}, {pipeline_mode = #tpu.pipeline_mode<synchronous>, transform_indices = @transform_6, window_bounds = array<i64: 2, 32, 32>}, {pipeline_mode = #tpu.pipeline_mode<synchronous>, transform_indices = @transform_7, window_bounds = array<i64: 2, 1, 32>}, {pipeline_mode = #tpu.pipeline_mode<synchronous>, transform_indices = @transform_8, window_bounds = array<i64: 2, 32, 64>}, {pipeline_mode = #tpu.pipeline_mode<synchronous>, transform_indices = @transform_9, window_bounds = array<i64: 2, 1, 64>}, {pipeline_mode = #tpu.pipeline_mode<synchronous>, transform_indices = @transform_10, window_bounds = array<i64: 2, 4, 8, 32>}, {pipeline_mode = #tpu.pipeline_mode<synchronous>, transform_indices = @transform_11, window_bounds = array<i64: 2, 1, 32>}, {pipeline_mode = #tpu.pipeline_mode<synchronous>, transform_indices = @transform_12, window_bounds = array<i64: 2, 1, 32>}, {pipeline_mode = #tpu.pipeline_mode<synchronous>, transform_indices = @transform_13, window_bounds = array<i64: 2, 1, 32>}, {pipeline_mode = #tpu.pipeline_mode<synchronous>, transform_indices = @transform_14, window_bounds = array<i64: 2, 1, 32>}, {pipeline_mode = #tpu.pipeline_mode<synchronous>, transform_indices = @transform_15, window_bounds = array<i64: 2, 1, 32>}, {pipeline_mode = #tpu.pipeline_mode<synchronous>, transform_indices = @transform_16, window_bounds = array<i64: 2, 1, 32>}, {pipeline_mode = #tpu.pipeline_mode<synchronous>, transform_indices = @transform_17, window_bounds = array<i64: 2, 1, 32>}, {pipeline_mode = #tpu.pipeline_mode<synchronous>, transform_indices = @transform_18, window_bounds = array<i64: 2, 32, 128>}, {pipeline_mode = #tpu.pipeline_mode<synchronous>, transform_indices = @transform_19, window_bounds = array<i64: 2, 1, 128>}, {pipeline_mode = #tpu.pipeline_mode<synchronous>, transform_indices = @transform_20, window_bounds = array<i64: 2, 128, 32>}, {pipeline_mode = #tpu.pipeline_mode<synchronous>, transform_indices = @transform_21, window_bounds = array<i64: 2, 1, 32>}, {pipeline_mode = #tpu.pipeline_mode<synchronous>, transform_indices = @transform_22, window_bounds = array<i64: 2, 8, 32>}]} {
    %c0 = arith.constant 0 : index
    %c0_0 = arith.constant 0 : index
    %c0_1 = arith.constant 0 : index
    %0 = vector.load %arg1[%c0, %c0_0, %c0_1] : memref<2x8x32xf32, #tpu.memory_space<vmem>>, vector<2x8x32xf32>
    %1 = vector.shape_cast %0 : vector<2x8x32xf32> to vector<16x32xf32>
    %c0_2 = arith.constant 0 : index
    %c0_3 = arith.constant 0 : index
    %c0_4 = arith.constant 0 : index
    %2 = vector.load %arg2[%c0_2, %c0_3, %c0_4] : memref<2x8x32xf32, #tpu.memory_space<vmem>>, vector<2x8x32xf32>
    %3 = vector.shape_cast %2 : vector<2x8x32xf32> to vector<16x32xf32>
    %c0_5 = arith.constant 0 : index
    %c0_6 = arith.constant 0 : index
    %c0_7 = arith.constant 0 : index
    %4 = vector.load %arg3[%c0_5, %c0_6, %c0_7] : memref<2x32x96xf32, #tpu.memory_space<vmem>>, vector<1x32x96xf32>
    %5 = vector.shape_cast %4 : vector<1x32x96xf32> to vector<32x96xf32>
    %cst = arith.constant dense<0.000000e+00> : vector<16x96xf32>
    %6 = tpu.matmul %1, %5, %cst {dimension_numbers = #tpu.dot_dimension_numbers<[1], [0], [0], [1], [0, 0, 1, 1], [], []>} : vector<16x32xf32>, vector<32x96xf32>, vector<16x96xf32> -> vector<16x96xf32>
    %c0_8 = arith.constant 0 : index
    %c0_9 = arith.constant 0 : index
    %c0_10 = arith.constant 0 : index
    %7 = vector.load %arg4[%c0_8, %c0_9, %c0_10] : memref<2x1x96xf32, #tpu.memory_space<vmem>>, vector<1x1x96xf32>
    %8 = vector.shape_cast %7 : vector<1x1x96xf32> to vector<1x96xf32>
    %9 = vector.broadcast %8 : vector<1x96xf32> to vector<16x96xf32>
    %10 = arith.addf %6, %9 : vector<16x96xf32>
    %11 = vector.extract_strided_slice %10 {offsets = [0, 0], sizes = [16, 32], strides = [1, 1]} : vector<16x96xf32> to vector<16x32xf32>
    %12 = vector.extract_strided_slice %10 {offsets = [0, 32], sizes = [16, 32], strides = [1, 1]} : vector<16x96xf32> to vector<16x32xf32>
    %13 = vector.extract_strided_slice %10 {offsets = [0, 64], sizes = [16, 32], strides = [1, 1]} : vector<16x96xf32> to vector<16x32xf32>
    %c0_11 = arith.constant 0 : index
    %c0_12 = arith.constant 0 : index
    %c0_13 = arith.constant 0 : index
    %c0_14 = arith.constant 0 : index
    %14 = vector.load %arg5[%c0_11, %c0_12, %c0_13, %c0_14] : memref<2x4x8x32xf32, #tpu.memory_space<vmem>>, vector<1x4x8x32xf32>
    %15 = vector.shape_cast %14 : vector<1x4x8x32xf32> to vector<4x8x32xf32>
    %c0_15 = arith.constant 0 : index
    %c0_16 = arith.constant 0 : index
    %c0_17 = arith.constant 0 : index
    %16 = vector.load %arg6[%c0_15, %c0_16, %c0_17] : memref<2x1x32xf32, #tpu.memory_space<vmem>>, vector<1x1x32xf32>
    %17 = vector.shape_cast %16 : vector<1x1x32xf32> to vector<1x32xf32>
    %18 = vector.shape_cast %11 : vector<16x32xf32> to vector<2x8x32xf32>
    %19 = vector.shape_cast %12 : vector<16x32xf32> to vector<2x8x32xf32>
    %20 = vector.shape_cast %13 : vector<16x32xf32> to vector<2x8x32xf32>
    %cst_18 = arith.constant 0.000000e+00 : f32
    %21 = vector.broadcast %cst_18 : f32 to vector<16x32xf32>
    %22 = vector.extract_strided_slice %18 {offsets = [0, 0, 0], sizes = [2, 8, 8], strides = [1, 1, 1]} : vector<2x8x32xf32> to vector<2x8x8xf32>
    %23 = vector.extract_strided_slice %19 {offsets = [0, 0, 0], sizes = [2, 8, 8], strides = [1, 1, 1]} : vector<2x8x32xf32> to vector<2x8x8xf32>
    %24 = vector.extract_strided_slice %20 {offsets = [0, 0, 0], sizes = [2, 8, 8], strides = [1, 1, 1]} : vector<2x8x32xf32> to vector<2x8x8xf32>
    "tpu.trace_start"() <{level = 10 : i32, message = "bqd,bkd->bqk"}> : () -> ()
    %cst_19 = arith.constant dense<0.000000e+00> : vector<2x8x8xf32>
    %25 = tpu.matmul %22, %23, %cst_19 {dimension_numbers = #tpu.dot_dimension_numbers<[2], [2], [1], [1], [0, 0, 0, 1, 1, 1], [0], [0]>} : vector<2x8x8xf32>, vector<2x8x8xf32>, vector<2x8x8xf32> -> vector<2x8x8xf32>
    "tpu.trace_stop"() : () -> ()
    %cst_20 = arith.constant 0.353553385 : f32
    %26 = vector.broadcast %cst_20 : f32 to vector<2x8x8xf32>
    %27 = arith.mulf %25, %26 : vector<2x8x8xf32>
    %cst_21 = arith.constant dense<0xFF800000> : vector<2x8xf32>
    %28 = vector.multi_reduction <maximumf>, %27, %cst_21 [2] : vector<2x8x8xf32> to vector<2x8xf32>
    %29 = vector.shape_cast %28 : vector<2x8xf32> to vector<2x8x1xf32>
    %30 = vector.broadcast %29 : vector<2x8x1xf32> to vector<2x8x8xf32>
    %31 = arith.subf %27, %30 : vector<2x8x8xf32>
    %32 = math.exp %31 : vector<2x8x8xf32>
    %cst_22 = arith.constant dense<0.000000e+00> : vector<2x8xf32>
    %33 = vector.multi_reduction <add>, %32, %cst_22 [2] : vector<2x8x8xf32> to vector<2x8xf32>
    %34 = vector.shape_cast %33 : vector<2x8xf32> to vector<2x8x1xf32>
    %35 = tpu.reciprocal %34 {approx = true} : vector<2x8x1xf32> -> vector<2x8x1xf32>
    %36 = vector.broadcast %35 : vector<2x8x1xf32> to vector<2x8x8xf32>
    %37 = arith.mulf %32, %36 : vector<2x8x8xf32>
    "tpu.trace_start"() <{level = 10 : i32, message = "bqk,bkd->bqd"}> : () -> ()
    %cst_23 = arith.constant dense<0.000000e+00> : vector<2x8x8xf32>
    %38 = tpu.matmul %37, %24, %cst_23 {dimension_numbers = #tpu.dot_dimension_numbers<[2], [1], [1], [2], [0, 0, 0, 1, 1, 2], [0], [0]>} : vector<2x8x8xf32>, vector<2x8x8xf32>, vector<2x8x8xf32> -> vector<2x8x8xf32>
    "tpu.trace_stop"() : () -> ()
    %39 = vector.shape_cast %38 : vector<2x8x8xf32> to vector<16x8xf32>
    %40 = vector.extract_strided_slice %15 {offsets = [0, 0, 0], sizes = [1, 8, 32], strides = [1, 1, 1]} : vector<4x8x32xf32> to vector<1x8x32xf32>
    %41 = vector.shape_cast %40 : vector<1x8x32xf32> to vector<8x32xf32>
    %cst_24 = arith.constant dense<0.000000e+00> : vector<16x32xf32>
    %42 = tpu.matmul %39, %41, %cst_24 {dimension_numbers = #tpu.dot_dimension_numbers<[1], [0], [0], [1], [0, 0, 1, 1], [], []>} : vector<16x8xf32>, vector<8x32xf32>, vector<16x32xf32> -> vector<16x32xf32>
    %43 = arith.addf %21, %42 : vector<16x32xf32>
    %44 = vector.extract_strided_slice %18 {offsets = [0, 0, 8], sizes = [2, 8, 8], strides = [1, 1, 1]} : vector<2x8x32xf32> to vector<2x8x8xf32>
    %45 = vector.extract_strided_slice %19 {offsets = [0, 0, 8], sizes = [2, 8, 8], strides = [1, 1, 1]} : vector<2x8x32xf32> to vector<2x8x8xf32>
    %46 = vector.extract_strided_slice %20 {offsets = [0, 0, 8], sizes = [2, 8, 8], strides = [1, 1, 1]} : vector<2x8x32xf32> to vector<2x8x8xf32>
    "tpu.trace_start"() <{level = 10 : i32, message = "bqd,bkd->bqk"}> : () -> ()
    %cst_25 = arith.constant dense<0.000000e+00> : vector<2x8x8xf32>
    %47 = tpu.matmul %44, %45, %cst_25 {dimension_numbers = #tpu.dot_dimension_numbers<[2], [2], [1], [1], [0, 0, 0, 1, 1, 1], [0], [0]>} : vector<2x8x8xf32>, vector<2x8x8xf32>, vector<2x8x8xf32> -> vector<2x8x8xf32>
    "tpu.trace_stop"() : () -> ()
    %cst_26 = arith.constant 0.353553385 : f32
    %48 = vector.broadcast %cst_26 : f32 to vector<2x8x8xf32>
    %49 = arith.mulf %47, %48 : vector<2x8x8xf32>
    %cst_27 = arith.constant dense<0xFF800000> : vector<2x8xf32>
    %50 = vector.multi_reduction <maximumf>, %49, %cst_27 [2] : vector<2x8x8xf32> to vector<2x8xf32>
    %51 = vector.shape_cast %50 : vector<2x8xf32> to vector<2x8x1xf32>
    %52 = vector.broadcast %51 : vector<2x8x1xf32> to vector<2x8x8xf32>
    %53 = arith.subf %49, %52 : vector<2x8x8xf32>
    %54 = math.exp %53 : vector<2x8x8xf32>
    %cst_28 = arith.constant dense<0.000000e+00> : vector<2x8xf32>
    %55 = vector.multi_reduction <add>, %54, %cst_28 [2] : vector<2x8x8xf32> to vector<2x8xf32>
    %56 = vector.shape_cast %55 : vector<2x8xf32> to vector<2x8x1xf32>
    %57 = tpu.reciprocal %56 {approx = true} : vector<2x8x1xf32> -> vector<2x8x1xf32>
    %58 = vector.broadcast %57 : vector<2x8x1xf32> to vector<2x8x8xf32>
    %59 = arith.mulf %54, %58 : vector<2x8x8xf32>
    "tpu.trace_start"() <{level = 10 : i32, message = "bqk,bkd->bqd"}> : () -> ()
    %cst_29 = arith.constant dense<0.000000e+00> : vector<2x8x8xf32>
    %60 = tpu.matmul %59, %46, %cst_29 {dimension_numbers = #tpu.dot_dimension_numbers<[2], [1], [1], [2], [0, 0, 0, 1, 1, 2], [0], [0]>} : vector<2x8x8xf32>, vector<2x8x8xf32>, vector<2x8x8xf32> -> vector<2x8x8xf32>
    "tpu.trace_stop"() : () -> ()
    %61 = vector.shape_cast %60 : vector<2x8x8xf32> to vector<16x8xf32>
    %62 = vector.extract_strided_slice %15 {offsets = [1, 0, 0], sizes = [1, 8, 32], strides = [1, 1, 1]} : vector<4x8x32xf32> to vector<1x8x32xf32>
    %63 = vector.shape_cast %62 : vector<1x8x32xf32> to vector<8x32xf32>
    %cst_30 = arith.constant dense<0.000000e+00> : vector<16x32xf32>
    %64 = tpu.matmul %61, %63, %cst_30 {dimension_numbers = #tpu.dot_dimension_numbers<[1], [0], [0], [1], [0, 0, 1, 1], [], []>} : vector<16x8xf32>, vector<8x32xf32>, vector<16x32xf32> -> vector<16x32xf32>
    %65 = arith.addf %43, %64 : vector<16x32xf32>
    %66 = vector.extract_strided_slice %18 {offsets = [0, 0, 16], sizes = [2, 8, 8], strides = [1, 1, 1]} : vector<2x8x32xf32> to vector<2x8x8xf32>
    %67 = vector.extract_strided_slice %19 {offsets = [0, 0, 16], sizes = [2, 8, 8], strides = [1, 1, 1]} : vector<2x8x32xf32> to vector<2x8x8xf32>
    %68 = vector.extract_strided_slice %20 {offsets = [0, 0, 16], sizes = [2, 8, 8], strides = [1, 1, 1]} : vector<2x8x32xf32> to vector<2x8x8xf32>
    "tpu.trace_start"() <{level = 10 : i32, message = "bqd,bkd->bqk"}> : () -> ()
    %cst_31 = arith.constant dense<0.000000e+00> : vector<2x8x8xf32>
    %69 = tpu.matmul %66, %67, %cst_31 {dimension_numbers = #tpu.dot_dimension_numbers<[2], [2], [1], [1], [0, 0, 0, 1, 1, 1], [0], [0]>} : vector<2x8x8xf32>, vector<2x8x8xf32>, vector<2x8x8xf32> -> vector<2x8x8xf32>
    "tpu.trace_stop"() : () -> ()
    %cst_32 = arith.constant 0.353553385 : f32
    %70 = vector.broadcast %cst_32 : f32 to vector<2x8x8xf32>
    %71 = arith.mulf %69, %70 : vector<2x8x8xf32>
    %cst_33 = arith.constant dense<0xFF800000> : vector<2x8xf32>
    %72 = vector.multi_reduction <maximumf>, %71, %cst_33 [2] : vector<2x8x8xf32> to vector<2x8xf32>
    %73 = vector.shape_cast %72 : vector<2x8xf32> to vector<2x8x1xf32>
    %74 = vector.broadcast %73 : vector<2x8x1xf32> to vector<2x8x8xf32>
    %75 = arith.subf %71, %74 : vector<2x8x8xf32>
    %76 = math.exp %75 : vector<2x8x8xf32>
    %cst_34 = arith.constant dense<0.000000e+00> : vector<2x8xf32>
    %77 = vector.multi_reduction <add>, %76, %cst_34 [2] : vector<2x8x8xf32> to vector<2x8xf32>
    %78 = vector.shape_cast %77 : vector<2x8xf32> to vector<2x8x1xf32>
    %79 = tpu.reciprocal %78 {approx = true} : vector<2x8x1xf32> -> vector<2x8x1xf32>
    %80 = vector.broadcast %79 : vector<2x8x1xf32> to vector<2x8x8xf32>
    %81 = arith.mulf %76, %80 : vector<2x8x8xf32>
    "tpu.trace_start"() <{level = 10 : i32, message = "bqk,bkd->bqd"}> : () -> ()
    %cst_35 = arith.constant dense<0.000000e+00> : vector<2x8x8xf32>
    %82 = tpu.matmul %81, %68, %cst_35 {dimension_numbers = #tpu.dot_dimension_numbers<[2], [1], [1], [2], [0, 0, 0, 1, 1, 2], [0], [0]>} : vector<2x8x8xf32>, vector<2x8x8xf32>, vector<2x8x8xf32> -> vector<2x8x8xf32>
    "tpu.trace_stop"() : () -> ()
    %83 = vector.shape_cast %82 : vector<2x8x8xf32> to vector<16x8xf32>
    %84 = vector.extract_strided_slice %15 {offsets = [2, 0, 0], sizes = [1, 8, 32], strides = [1, 1, 1]} : vector<4x8x32xf32> to vector<1x8x32xf32>
    %85 = vector.shape_cast %84 : vector<1x8x32xf32> to vector<8x32xf32>
    %cst_36 = arith.constant dense<0.000000e+00> : vector<16x32xf32>
    %86 = tpu.matmul %83, %85, %cst_36 {dimension_numbers = #tpu.dot_dimension_numbers<[1], [0], [0], [1], [0, 0, 1, 1], [], []>} : vector<16x8xf32>, vector<8x32xf32>, vector<16x32xf32> -> vector<16x32xf32>
    %87 = arith.addf %65, %86 : vector<16x32xf32>
    %88 = vector.extract_strided_slice %18 {offsets = [0, 0, 24], sizes = [2, 8, 8], strides = [1, 1, 1]} : vector<2x8x32xf32> to vector<2x8x8xf32>
    %89 = vector.extract_strided_slice %19 {offsets = [0, 0, 24], sizes = [2, 8, 8], strides = [1, 1, 1]} : vector<2x8x32xf32> to vector<2x8x8xf32>
    %90 = vector.extract_strided_slice %20 {offsets = [0, 0, 24], sizes = [2, 8, 8], strides = [1, 1, 1]} : vector<2x8x32xf32> to vector<2x8x8xf32>
    "tpu.trace_start"() <{level = 10 : i32, message = "bqd,bkd->bqk"}> : () -> ()
    %cst_37 = arith.constant dense<0.000000e+00> : vector<2x8x8xf32>
    %91 = tpu.matmul %88, %89, %cst_37 {dimension_numbers = #tpu.dot_dimension_numbers<[2], [2], [1], [1], [0, 0, 0, 1, 1, 1], [0], [0]>} : vector<2x8x8xf32>, vector<2x8x8xf32>, vector<2x8x8xf32> -> vector<2x8x8xf32>
    "tpu.trace_stop"() : () -> ()
    %cst_38 = arith.constant 0.353553385 : f32
    %92 = vector.broadcast %cst_38 : f32 to vector<2x8x8xf32>
    %93 = arith.mulf %91, %92 : vector<2x8x8xf32>
    %cst_39 = arith.constant dense<0xFF800000> : vector<2x8xf32>
    %94 = vector.multi_reduction <maximumf>, %93, %cst_39 [2] : vector<2x8x8xf32> to vector<2x8xf32>
    %95 = vector.shape_cast %94 : vector<2x8xf32> to vector<2x8x1xf32>
    %96 = vector.broadcast %95 : vector<2x8x1xf32> to vector<2x8x8xf32>
    %97 = arith.subf %93, %96 : vector<2x8x8xf32>
    %98 = math.exp %97 : vector<2x8x8xf32>
    %cst_40 = arith.constant dense<0.000000e+00> : vector<2x8xf32>
    %99 = vector.multi_reduction <add>, %98, %cst_40 [2] : vector<2x8x8xf32> to vector<2x8xf32>
    %100 = vector.shape_cast %99 : vector<2x8xf32> to vector<2x8x1xf32>
    %101 = tpu.reciprocal %100 {approx = true} : vector<2x8x1xf32> -> vector<2x8x1xf32>
    %102 = vector.broadcast %101 : vector<2x8x1xf32> to vector<2x8x8xf32>
    %103 = arith.mulf %98, %102 : vector<2x8x8xf32>
    "tpu.trace_start"() <{level = 10 : i32, message = "bqk,bkd->bqd"}> : () -> ()
    %cst_41 = arith.constant dense<0.000000e+00> : vector<2x8x8xf32>
    %104 = tpu.matmul %103, %90, %cst_41 {dimension_numbers = #tpu.dot_dimension_numbers<[2], [1], [1], [2], [0, 0, 0, 1, 1, 2], [0], [0]>} : vector<2x8x8xf32>, vector<2x8x8xf32>, vector<2x8x8xf32> -> vector<2x8x8xf32>
    "tpu.trace_stop"() : () -> ()
    %105 = vector.shape_cast %104 : vector<2x8x8xf32> to vector<16x8xf32>
    %106 = vector.extract_strided_slice %15 {offsets = [3, 0, 0], sizes = [1, 8, 32], strides = [1, 1, 1]} : vector<4x8x32xf32> to vector<1x8x32xf32>
    %107 = vector.shape_cast %106 : vector<1x8x32xf32> to vector<8x32xf32>
    %cst_42 = arith.constant dense<0.000000e+00> : vector<16x32xf32>
    %108 = tpu.matmul %105, %107, %cst_42 {dimension_numbers = #tpu.dot_dimension_numbers<[1], [0], [0], [1], [0, 0, 1, 1], [], []>} : vector<16x8xf32>, vector<8x32xf32>, vector<16x32xf32> -> vector<16x32xf32>
    %109 = arith.addf %87, %108 : vector<16x32xf32>
    %110 = vector.broadcast %17 : vector<1x32xf32> to vector<16x32xf32>
    %111 = arith.addf %109, %110 : vector<16x32xf32>
    %112 = arith.addf %1, %111 : vector<16x32xf32>
    %c0_43 = arith.constant 0 : index
    %c0_44 = arith.constant 0 : index
    %c0_45 = arith.constant 0 : index
    %113 = vector.load %arg13[%c0_43, %c0_44, %c0_45] : memref<2x1x32xf32, #tpu.memory_space<vmem>>, vector<1x1x32xf32>
    %114 = vector.shape_cast %113 : vector<1x1x32xf32> to vector<1x32xf32>
    %c0_46 = arith.constant 0 : index
    %c0_47 = arith.constant 0 : index
    %c0_48 = arith.constant 0 : index
    %115 = vector.load %arg14[%c0_46, %c0_47, %c0_48] : memref<2x1x32xf32, #tpu.memory_space<vmem>>, vector<1x1x32xf32>
    %116 = vector.shape_cast %115 : vector<1x1x32xf32> to vector<1x32xf32>
    %cst_49 = arith.constant dense<0.000000e+00> : vector<16xf32>
    %117 = vector.multi_reduction <add>, %112, %cst_49 [1] : vector<16x32xf32> to vector<16xf32>
    %118 = vector.shape_cast %117 : vector<16xf32> to vector<16x1xf32>
    %cst_50 = arith.constant 3.200000e+01 : f32
    %119 = vector.broadcast %cst_50 : f32 to vector<16x1xf32>
    %120 = arith.divf %118, %119 : vector<16x1xf32>
    %121 = vector.broadcast %120 : vector<16x1xf32> to vector<16x32xf32>
    %122 = arith.subf %112, %121 : vector<16x32xf32>
    %123 = arith.mulf %122, %122 : vector<16x32xf32>
    %cst_51 = arith.constant dense<0.000000e+00> : vector<16xf32>
    %124 = vector.multi_reduction <add>, %123, %cst_51 [1] : vector<16x32xf32> to vector<16xf32>
    %125 = vector.shape_cast %124 : vector<16xf32> to vector<16x1xf32>
    %cst_52 = arith.constant 3.200000e+01 : f32
    %126 = vector.broadcast %cst_52 : f32 to vector<16x1xf32>
    %127 = arith.divf %125, %126 : vector<16x1xf32>
    %cst_53 = arith.constant 9.99999974E-6 : f32
    %128 = vector.broadcast %cst_53 : f32 to vector<16x1xf32>
    %129 = arith.addf %127, %128 : vector<16x1xf32>
    %130 = math.rsqrt %129 : vector<16x1xf32>
    %131 = vector.broadcast %130 : vector<16x1xf32> to vector<16x32xf32>
    %132 = arith.mulf %122, %131 : vector<16x32xf32>
    %133 = vector.broadcast %114 : vector<1x32xf32> to vector<16x32xf32>
    %134 = arith.mulf %132, %133 : vector<16x32xf32>
    %135 = vector.broadcast %116 : vector<1x32xf32> to vector<16x32xf32>
    %136 = arith.addf %134, %135 : vector<16x32xf32>
    %c0_54 = arith.constant 0 : index
    %c0_55 = arith.constant 0 : index
    %c0_56 = arith.constant 0 : index
    %137 = vector.load %arg7[%c0_54, %c0_55, %c0_56] : memref<2x32x32xf32, #tpu.memory_space<vmem>>, vector<1x32x32xf32>
    %138 = vector.shape_cast %137 : vector<1x32x32xf32> to vector<32x32xf32>
    %cst_57 = arith.constant dense<0.000000e+00> : vector<16x32xf32>
    %139 = tpu.matmul %136, %138, %cst_57 {dimension_numbers = #tpu.dot_dimension_numbers<[1], [0], [0], [1], [0, 0, 1, 1], [], []>} : vector<16x32xf32>, vector<32x32xf32>, vector<16x32xf32> -> vector<16x32xf32>
    %c0_58 = arith.constant 0 : index
    %c0_59 = arith.constant 0 : index
    %c0_60 = arith.constant 0 : index
    %140 = vector.load %arg8[%c0_58, %c0_59, %c0_60] : memref<2x1x32xf32, #tpu.memory_space<vmem>>, vector<1x1x32xf32>
    %141 = vector.shape_cast %140 : vector<1x1x32xf32> to vector<1x32xf32>
    %142 = vector.broadcast %141 : vector<1x32xf32> to vector<16x32xf32>
    %143 = arith.addf %139, %142 : vector<16x32xf32>
    %c0_61 = arith.constant 0 : index
    %c0_62 = arith.constant 0 : index
    %c0_63 = arith.constant 0 : index
    %144 = vector.load %arg9[%c0_61, %c0_62, %c0_63] : memref<2x32x64xf32, #tpu.memory_space<vmem>>, vector<1x32x64xf32>
    %145 = vector.shape_cast %144 : vector<1x32x64xf32> to vector<32x64xf32>
    %cst_64 = arith.constant dense<0.000000e+00> : vector<16x64xf32>
    %146 = tpu.matmul %3, %145, %cst_64 {dimension_numbers = #tpu.dot_dimension_numbers<[1], [0], [0], [1], [0, 0, 1, 1], [], []>} : vector<16x32xf32>, vector<32x64xf32>, vector<16x64xf32> -> vector<16x64xf32>
    %c0_65 = arith.constant 0 : index
    %c0_66 = arith.constant 0 : index
    %c0_67 = arith.constant 0 : index
    %147 = vector.load %arg10[%c0_65, %c0_66, %c0_67] : memref<2x1x64xf32, #tpu.memory_space<vmem>>, vector<1x1x64xf32>
    %148 = vector.shape_cast %147 : vector<1x1x64xf32> to vector<1x64xf32>
    %149 = vector.broadcast %148 : vector<1x64xf32> to vector<16x64xf32>
    %150 = arith.addf %146, %149 : vector<16x64xf32>
    %151 = vector.extract_strided_slice %150 {offsets = [0, 0], sizes = [16, 32], strides = [1, 1]} : vector<16x64xf32> to vector<16x32xf32>
    %152 = vector.extract_strided_slice %150 {offsets = [0, 32], sizes = [16, 32], strides = [1, 1]} : vector<16x64xf32> to vector<16x32xf32>
    %c0_68 = arith.constant 0 : index
    %c0_69 = arith.constant 0 : index
    %c0_70 = arith.constant 0 : index
    %c0_71 = arith.constant 0 : index
    %153 = vector.load %arg11[%c0_68, %c0_69, %c0_70, %c0_71] : memref<2x4x8x32xf32, #tpu.memory_space<vmem>>, vector<1x4x8x32xf32>
    %154 = vector.shape_cast %153 : vector<1x4x8x32xf32> to vector<4x8x32xf32>
    %c0_72 = arith.constant 0 : index
    %c0_73 = arith.constant 0 : index
    %c0_74 = arith.constant 0 : index
    %155 = vector.load %arg12[%c0_72, %c0_73, %c0_74] : memref<2x1x32xf32, #tpu.memory_space<vmem>>, vector<1x1x32xf32>
    %156 = vector.shape_cast %155 : vector<1x1x32xf32> to vector<1x32xf32>
    %157 = vector.shape_cast %143 : vector<16x32xf32> to vector<2x8x32xf32>
    %158 = vector.shape_cast %151 : vector<16x32xf32> to vector<2x8x32xf32>
    %159 = vector.shape_cast %152 : vector<16x32xf32> to vector<2x8x32xf32>
    %cst_75 = arith.constant 0.000000e+00 : f32
    %160 = vector.broadcast %cst_75 : f32 to vector<16x32xf32>
    %161 = vector.extract_strided_slice %157 {offsets = [0, 0, 0], sizes = [2, 8, 8], strides = [1, 1, 1]} : vector<2x8x32xf32> to vector<2x8x8xf32>
    %162 = vector.extract_strided_slice %158 {offsets = [0, 0, 0], sizes = [2, 8, 8], strides = [1, 1, 1]} : vector<2x8x32xf32> to vector<2x8x8xf32>
    %163 = vector.extract_strided_slice %159 {offsets = [0, 0, 0], sizes = [2, 8, 8], strides = [1, 1, 1]} : vector<2x8x32xf32> to vector<2x8x8xf32>
    "tpu.trace_start"() <{level = 10 : i32, message = "bqd,bkd->bqk"}> : () -> ()
    %cst_76 = arith.constant dense<0.000000e+00> : vector<2x8x8xf32>
    %164 = tpu.matmul %161, %162, %cst_76 {dimension_numbers = #tpu.dot_dimension_numbers<[2], [2], [1], [1], [0, 0, 0, 1, 1, 1], [0], [0]>} : vector<2x8x8xf32>, vector<2x8x8xf32>, vector<2x8x8xf32> -> vector<2x8x8xf32>
    "tpu.trace_stop"() : () -> ()
    %cst_77 = arith.constant 0.353553385 : f32
    %165 = vector.broadcast %cst_77 : f32 to vector<2x8x8xf32>
    %166 = arith.mulf %164, %165 : vector<2x8x8xf32>
    %cst_78 = arith.constant dense<0xFF800000> : vector<2x8xf32>
    %167 = vector.multi_reduction <maximumf>, %166, %cst_78 [2] : vector<2x8x8xf32> to vector<2x8xf32>
    %168 = vector.shape_cast %167 : vector<2x8xf32> to vector<2x8x1xf32>
    %169 = vector.broadcast %168 : vector<2x8x1xf32> to vector<2x8x8xf32>
    %170 = arith.subf %166, %169 : vector<2x8x8xf32>
    %171 = math.exp %170 : vector<2x8x8xf32>
    %cst_79 = arith.constant dense<0.000000e+00> : vector<2x8xf32>
    %172 = vector.multi_reduction <add>, %171, %cst_79 [2] : vector<2x8x8xf32> to vector<2x8xf32>
    %173 = vector.shape_cast %172 : vector<2x8xf32> to vector<2x8x1xf32>
    %174 = tpu.reciprocal %173 {approx = true} : vector<2x8x1xf32> -> vector<2x8x1xf32>
    %175 = vector.broadcast %174 : vector<2x8x1xf32> to vector<2x8x8xf32>
    %176 = arith.mulf %171, %175 : vector<2x8x8xf32>
    "tpu.trace_start"() <{level = 10 : i32, message = "bqk,bkd->bqd"}> : () -> ()
    %cst_80 = arith.constant dense<0.000000e+00> : vector<2x8x8xf32>
    %177 = tpu.matmul %176, %163, %cst_80 {dimension_numbers = #tpu.dot_dimension_numbers<[2], [1], [1], [2], [0, 0, 0, 1, 1, 2], [0], [0]>} : vector<2x8x8xf32>, vector<2x8x8xf32>, vector<2x8x8xf32> -> vector<2x8x8xf32>
    "tpu.trace_stop"() : () -> ()
    %178 = vector.shape_cast %177 : vector<2x8x8xf32> to vector<16x8xf32>
    %179 = vector.extract_strided_slice %154 {offsets = [0, 0, 0], sizes = [1, 8, 32], strides = [1, 1, 1]} : vector<4x8x32xf32> to vector<1x8x32xf32>
    %180 = vector.shape_cast %179 : vector<1x8x32xf32> to vector<8x32xf32>
    %cst_81 = arith.constant dense<0.000000e+00> : vector<16x32xf32>
    %181 = tpu.matmul %178, %180, %cst_81 {dimension_numbers = #tpu.dot_dimension_numbers<[1], [0], [0], [1], [0, 0, 1, 1], [], []>} : vector<16x8xf32>, vector<8x32xf32>, vector<16x32xf32> -> vector<16x32xf32>
    %182 = arith.addf %160, %181 : vector<16x32xf32>
    %183 = vector.extract_strided_slice %157 {offsets = [0, 0, 8], sizes = [2, 8, 8], strides = [1, 1, 1]} : vector<2x8x32xf32> to vector<2x8x8xf32>
    %184 = vector.extract_strided_slice %158 {offsets = [0, 0, 8], sizes = [2, 8, 8], strides = [1, 1, 1]} : vector<2x8x32xf32> to vector<2x8x8xf32>
    %185 = vector.extract_strided_slice %159 {offsets = [0, 0, 8], sizes = [2, 8, 8], strides = [1, 1, 1]} : vector<2x8x32xf32> to vector<2x8x8xf32>
    "tpu.trace_start"() <{level = 10 : i32, message = "bqd,bkd->bqk"}> : () -> ()
    %cst_82 = arith.constant dense<0.000000e+00> : vector<2x8x8xf32>
    %186 = tpu.matmul %183, %184, %cst_82 {dimension_numbers = #tpu.dot_dimension_numbers<[2], [2], [1], [1], [0, 0, 0, 1, 1, 1], [0], [0]>} : vector<2x8x8xf32>, vector<2x8x8xf32>, vector<2x8x8xf32> -> vector<2x8x8xf32>
    "tpu.trace_stop"() : () -> ()
    %cst_83 = arith.constant 0.353553385 : f32
    %187 = vector.broadcast %cst_83 : f32 to vector<2x8x8xf32>
    %188 = arith.mulf %186, %187 : vector<2x8x8xf32>
    %cst_84 = arith.constant dense<0xFF800000> : vector<2x8xf32>
    %189 = vector.multi_reduction <maximumf>, %188, %cst_84 [2] : vector<2x8x8xf32> to vector<2x8xf32>
    %190 = vector.shape_cast %189 : vector<2x8xf32> to vector<2x8x1xf32>
    %191 = vector.broadcast %190 : vector<2x8x1xf32> to vector<2x8x8xf32>
    %192 = arith.subf %188, %191 : vector<2x8x8xf32>
    %193 = math.exp %192 : vector<2x8x8xf32>
    %cst_85 = arith.constant dense<0.000000e+00> : vector<2x8xf32>
    %194 = vector.multi_reduction <add>, %193, %cst_85 [2] : vector<2x8x8xf32> to vector<2x8xf32>
    %195 = vector.shape_cast %194 : vector<2x8xf32> to vector<2x8x1xf32>
    %196 = tpu.reciprocal %195 {approx = true} : vector<2x8x1xf32> -> vector<2x8x1xf32>
    %197 = vector.broadcast %196 : vector<2x8x1xf32> to vector<2x8x8xf32>
    %198 = arith.mulf %193, %197 : vector<2x8x8xf32>
    "tpu.trace_start"() <{level = 10 : i32, message = "bqk,bkd->bqd"}> : () -> ()
    %cst_86 = arith.constant dense<0.000000e+00> : vector<2x8x8xf32>
    %199 = tpu.matmul %198, %185, %cst_86 {dimension_numbers = #tpu.dot_dimension_numbers<[2], [1], [1], [2], [0, 0, 0, 1, 1, 2], [0], [0]>} : vector<2x8x8xf32>, vector<2x8x8xf32>, vector<2x8x8xf32> -> vector<2x8x8xf32>
    "tpu.trace_stop"() : () -> ()
    %200 = vector.shape_cast %199 : vector<2x8x8xf32> to vector<16x8xf32>
    %201 = vector.extract_strided_slice %154 {offsets = [1, 0, 0], sizes = [1, 8, 32], strides = [1, 1, 1]} : vector<4x8x32xf32> to vector<1x8x32xf32>
    %202 = vector.shape_cast %201 : vector<1x8x32xf32> to vector<8x32xf32>
    %cst_87 = arith.constant dense<0.000000e+00> : vector<16x32xf32>
    %203 = tpu.matmul %200, %202, %cst_87 {dimension_numbers = #tpu.dot_dimension_numbers<[1], [0], [0], [1], [0, 0, 1, 1], [], []>} : vector<16x8xf32>, vector<8x32xf32>, vector<16x32xf32> -> vector<16x32xf32>
    %204 = arith.addf %182, %203 : vector<16x32xf32>
    %205 = vector.extract_strided_slice %157 {offsets = [0, 0, 16], sizes = [2, 8, 8], strides = [1, 1, 1]} : vector<2x8x32xf32> to vector<2x8x8xf32>
    %206 = vector.extract_strided_slice %158 {offsets = [0, 0, 16], sizes = [2, 8, 8], strides = [1, 1, 1]} : vector<2x8x32xf32> to vector<2x8x8xf32>
    %207 = vector.extract_strided_slice %159 {offsets = [0, 0, 16], sizes = [2, 8, 8], strides = [1, 1, 1]} : vector<2x8x32xf32> to vector<2x8x8xf32>
    "tpu.trace_start"() <{level = 10 : i32, message = "bqd,bkd->bqk"}> : () -> ()
    %cst_88 = arith.constant dense<0.000000e+00> : vector<2x8x8xf32>
    %208 = tpu.matmul %205, %206, %cst_88 {dimension_numbers = #tpu.dot_dimension_numbers<[2], [2], [1], [1], [0, 0, 0, 1, 1, 1], [0], [0]>} : vector<2x8x8xf32>, vector<2x8x8xf32>, vector<2x8x8xf32> -> vector<2x8x8xf32>
    "tpu.trace_stop"() : () -> ()
    %cst_89 = arith.constant 0.353553385 : f32
    %209 = vector.broadcast %cst_89 : f32 to vector<2x8x8xf32>
    %210 = arith.mulf %208, %209 : vector<2x8x8xf32>
    %cst_90 = arith.constant dense<0xFF800000> : vector<2x8xf32>
    %211 = vector.multi_reduction <maximumf>, %210, %cst_90 [2] : vector<2x8x8xf32> to vector<2x8xf32>
    %212 = vector.shape_cast %211 : vector<2x8xf32> to vector<2x8x1xf32>
    %213 = vector.broadcast %212 : vector<2x8x1xf32> to vector<2x8x8xf32>
    %214 = arith.subf %210, %213 : vector<2x8x8xf32>
    %215 = math.exp %214 : vector<2x8x8xf32>
    %cst_91 = arith.constant dense<0.000000e+00> : vector<2x8xf32>
    %216 = vector.multi_reduction <add>, %215, %cst_91 [2] : vector<2x8x8xf32> to vector<2x8xf32>
    %217 = vector.shape_cast %216 : vector<2x8xf32> to vector<2x8x1xf32>
    %218 = tpu.reciprocal %217 {approx = true} : vector<2x8x1xf32> -> vector<2x8x1xf32>
    %219 = vector.broadcast %218 : vector<2x8x1xf32> to vector<2x8x8xf32>
    %220 = arith.mulf %215, %219 : vector<2x8x8xf32>
    "tpu.trace_start"() <{level = 10 : i32, message = "bqk,bkd->bqd"}> : () -> ()
    %cst_92 = arith.constant dense<0.000000e+00> : vector<2x8x8xf32>
    %221 = tpu.matmul %220, %207, %cst_92 {dimension_numbers = #tpu.dot_dimension_numbers<[2], [1], [1], [2], [0, 0, 0, 1, 1, 2], [0], [0]>} : vector<2x8x8xf32>, vector<2x8x8xf32>, vector<2x8x8xf32> -> vector<2x8x8xf32>
    "tpu.trace_stop"() : () -> ()
    %222 = vector.shape_cast %221 : vector<2x8x8xf32> to vector<16x8xf32>
    %223 = vector.extract_strided_slice %154 {offsets = [2, 0, 0], sizes = [1, 8, 32], strides = [1, 1, 1]} : vector<4x8x32xf32> to vector<1x8x32xf32>
    %224 = vector.shape_cast %223 : vector<1x8x32xf32> to vector<8x32xf32>
    %cst_93 = arith.constant dense<0.000000e+00> : vector<16x32xf32>
    %225 = tpu.matmul %222, %224, %cst_93 {dimension_numbers = #tpu.dot_dimension_numbers<[1], [0], [0], [1], [0, 0, 1, 1], [], []>} : vector<16x8xf32>, vector<8x32xf32>, vector<16x32xf32> -> vector<16x32xf32>
    %226 = arith.addf %204, %225 : vector<16x32xf32>
    %227 = vector.extract_strided_slice %157 {offsets = [0, 0, 24], sizes = [2, 8, 8], strides = [1, 1, 1]} : vector<2x8x32xf32> to vector<2x8x8xf32>
    %228 = vector.extract_strided_slice %158 {offsets = [0, 0, 24], sizes = [2, 8, 8], strides = [1, 1, 1]} : vector<2x8x32xf32> to vector<2x8x8xf32>
    %229 = vector.extract_strided_slice %159 {offsets = [0, 0, 24], sizes = [2, 8, 8], strides = [1, 1, 1]} : vector<2x8x32xf32> to vector<2x8x8xf32>
    "tpu.trace_start"() <{level = 10 : i32, message = "bqd,bkd->bqk"}> : () -> ()
    %cst_94 = arith.constant dense<0.000000e+00> : vector<2x8x8xf32>
    %230 = tpu.matmul %227, %228, %cst_94 {dimension_numbers = #tpu.dot_dimension_numbers<[2], [2], [1], [1], [0, 0, 0, 1, 1, 1], [0], [0]>} : vector<2x8x8xf32>, vector<2x8x8xf32>, vector<2x8x8xf32> -> vector<2x8x8xf32>
    "tpu.trace_stop"() : () -> ()
    %cst_95 = arith.constant 0.353553385 : f32
    %231 = vector.broadcast %cst_95 : f32 to vector<2x8x8xf32>
    %232 = arith.mulf %230, %231 : vector<2x8x8xf32>
    %cst_96 = arith.constant dense<0xFF800000> : vector<2x8xf32>
    %233 = vector.multi_reduction <maximumf>, %232, %cst_96 [2] : vector<2x8x8xf32> to vector<2x8xf32>
    %234 = vector.shape_cast %233 : vector<2x8xf32> to vector<2x8x1xf32>
    %235 = vector.broadcast %234 : vector<2x8x1xf32> to vector<2x8x8xf32>
    %236 = arith.subf %232, %235 : vector<2x8x8xf32>
    %237 = math.exp %236 : vector<2x8x8xf32>
    %cst_97 = arith.constant dense<0.000000e+00> : vector<2x8xf32>
    %238 = vector.multi_reduction <add>, %237, %cst_97 [2] : vector<2x8x8xf32> to vector<2x8xf32>
    %239 = vector.shape_cast %238 : vector<2x8xf32> to vector<2x8x1xf32>
    %240 = tpu.reciprocal %239 {approx = true} : vector<2x8x1xf32> -> vector<2x8x1xf32>
    %241 = vector.broadcast %240 : vector<2x8x1xf32> to vector<2x8x8xf32>
    %242 = arith.mulf %237, %241 : vector<2x8x8xf32>
    "tpu.trace_start"() <{level = 10 : i32, message = "bqk,bkd->bqd"}> : () -> ()
    %cst_98 = arith.constant dense<0.000000e+00> : vector<2x8x8xf32>
    %243 = tpu.matmul %242, %229, %cst_98 {dimension_numbers = #tpu.dot_dimension_numbers<[2], [1], [1], [2], [0, 0, 0, 1, 1, 2], [0], [0]>} : vector<2x8x8xf32>, vector<2x8x8xf32>, vector<2x8x8xf32> -> vector<2x8x8xf32>
    "tpu.trace_stop"() : () -> ()
    %244 = vector.shape_cast %243 : vector<2x8x8xf32> to vector<16x8xf32>
    %245 = vector.extract_strided_slice %154 {offsets = [3, 0, 0], sizes = [1, 8, 32], strides = [1, 1, 1]} : vector<4x8x32xf32> to vector<1x8x32xf32>
    %246 = vector.shape_cast %245 : vector<1x8x32xf32> to vector<8x32xf32>
    %cst_99 = arith.constant dense<0.000000e+00> : vector<16x32xf32>
    %247 = tpu.matmul %244, %246, %cst_99 {dimension_numbers = #tpu.dot_dimension_numbers<[1], [0], [0], [1], [0, 0, 1, 1], [], []>} : vector<16x8xf32>, vector<8x32xf32>, vector<16x32xf32> -> vector<16x32xf32>
    %248 = arith.addf %226, %247 : vector<16x32xf32>
    %249 = vector.broadcast %156 : vector<1x32xf32> to vector<16x32xf32>
    %250 = arith.addf %248, %249 : vector<16x32xf32>
    %251 = arith.addf %136, %250 : vector<16x32xf32>
    %c0_100 = arith.constant 0 : index
    %c0_101 = arith.constant 0 : index
    %c0_102 = arith.constant 0 : index
    %252 = vector.load %arg15[%c0_100, %c0_101, %c0_102] : memref<2x1x32xf32, #tpu.memory_space<vmem>>, vector<1x1x32xf32>
    %253 = vector.shape_cast %252 : vector<1x1x32xf32> to vector<1x32xf32>
    %c0_103 = arith.constant 0 : index
    %c0_104 = arith.constant 0 : index
    %c0_105 = arith.constant 0 : index
    %254 = vector.load %arg16[%c0_103, %c0_104, %c0_105] : memref<2x1x32xf32, #tpu.memory_space<vmem>>, vector<1x1x32xf32>
    %255 = vector.shape_cast %254 : vector<1x1x32xf32> to vector<1x32xf32>
    %cst_106 = arith.constant dense<0.000000e+00> : vector<16xf32>
    %256 = vector.multi_reduction <add>, %251, %cst_106 [1] : vector<16x32xf32> to vector<16xf32>
    %257 = vector.shape_cast %256 : vector<16xf32> to vector<16x1xf32>
    %cst_107 = arith.constant 3.200000e+01 : f32
    %258 = vector.broadcast %cst_107 : f32 to vector<16x1xf32>
    %259 = arith.divf %257, %258 : vector<16x1xf32>
    %260 = vector.broadcast %259 : vector<16x1xf32> to vector<16x32xf32>
    %261 = arith.subf %251, %260 : vector<16x32xf32>
    %262 = arith.mulf %261, %261 : vector<16x32xf32>
    %cst_108 = arith.constant dense<0.000000e+00> : vector<16xf32>
    %263 = vector.multi_reduction <add>, %262, %cst_108 [1] : vector<16x32xf32> to vector<16xf32>
    %264 = vector.shape_cast %263 : vector<16xf32> to vector<16x1xf32>
    %cst_109 = arith.constant 3.200000e+01 : f32
    %265 = vector.broadcast %cst_109 : f32 to vector<16x1xf32>
    %266 = arith.divf %264, %265 : vector<16x1xf32>
    %cst_110 = arith.constant 9.99999974E-6 : f32
    %267 = vector.broadcast %cst_110 : f32 to vector<16x1xf32>
    %268 = arith.addf %266, %267 : vector<16x1xf32>
    %269 = math.rsqrt %268 : vector<16x1xf32>
    %270 = vector.broadcast %269 : vector<16x1xf32> to vector<16x32xf32>
    %271 = arith.mulf %261, %270 : vector<16x32xf32>
    %272 = vector.broadcast %253 : vector<1x32xf32> to vector<16x32xf32>
    %273 = arith.mulf %271, %272 : vector<16x32xf32>
    %274 = vector.broadcast %255 : vector<1x32xf32> to vector<16x32xf32>
    %275 = arith.addf %273, %274 : vector<16x32xf32>
    %c0_111 = arith.constant 0 : index
    %c0_112 = arith.constant 0 : index
    %c0_113 = arith.constant 0 : index
    %276 = vector.load %arg19[%c0_111, %c0_112, %c0_113] : memref<2x32x128xf32, #tpu.memory_space<vmem>>, vector<1x32x128xf32>
    %277 = vector.shape_cast %276 : vector<1x32x128xf32> to vector<32x128xf32>
    %cst_114 = arith.constant dense<0.000000e+00> : vector<16x128xf32>
    %278 = tpu.matmul %275, %277, %cst_114 {dimension_numbers = #tpu.dot_dimension_numbers<[1], [0], [0], [1], [0, 0, 1, 1], [], []>} : vector<16x32xf32>, vector<32x128xf32>, vector<16x128xf32> -> vector<16x128xf32>
    %c0_115 = arith.constant 0 : index
    %c0_116 = arith.constant 0 : index
    %c0_117 = arith.constant 0 : index
    %279 = vector.load %arg20[%c0_115, %c0_116, %c0_117] : memref<2x1x128xf32, #tpu.memory_space<vmem>>, vector<1x1x128xf32>
    %280 = vector.shape_cast %279 : vector<1x1x128xf32> to vector<1x128xf32>
    %281 = vector.broadcast %280 : vector<1x128xf32> to vector<16x128xf32>
    %282 = arith.addf %278, %281 : vector<16x128xf32>
    %cst_118 = arith.constant 0.000000e+00 : f32
    %283 = vector.broadcast %cst_118 : f32 to vector<16x128xf32>
    %284 = arith.maximumf %282, %283 : vector<16x128xf32>
    %c0_119 = arith.constant 0 : index
    %c0_120 = arith.constant 0 : index
    %c0_121 = arith.constant 0 : index
    %285 = vector.load %arg21[%c0_119, %c0_120, %c0_121] : memref<2x128x32xf32, #tpu.memory_space<vmem>>, vector<1x128x32xf32>
    %286 = vector.shape_cast %285 : vector<1x128x32xf32> to vector<128x32xf32>
    %cst_122 = arith.constant dense<0.000000e+00> : vector<16x32xf32>
    %287 = tpu.matmul %284, %286, %cst_122 {dimension_numbers = #tpu.dot_dimension_numbers<[1], [0], [0], [1], [0, 0, 1, 1], [], []>} : vector<16x128xf32>, vector<128x32xf32>, vector<16x32xf32> -> vector<16x32xf32>
    %c0_123 = arith.constant 0 : index
    %c0_124 = arith.constant 0 : index
    %c0_125 = arith.constant 0 : index
    %288 = vector.load %arg22[%c0_123, %c0_124, %c0_125] : memref<2x1x32xf32, #tpu.memory_space<vmem>>, vector<1x1x32xf32>
    %289 = vector.shape_cast %288 : vector<1x1x32xf32> to vector<1x32xf32>
    %290 = vector.broadcast %289 : vector<1x32xf32> to vector<16x32xf32>
    %291 = arith.addf %287, %290 : vector<16x32xf32>
    %292 = arith.addf %275, %291 : vector<16x32xf32>
    %c0_126 = arith.constant 0 : index
    %c0_127 = arith.constant 0 : index
    %c0_128 = arith.constant 0 : index
    %293 = vector.load %arg17[%c0_126, %c0_127, %c0_128] : memref<2x1x32xf32, #tpu.memory_space<vmem>>, vector<1x1x32xf32>
    %294 = vector.shape_cast %293 : vector<1x1x32xf32> to vector<1x32xf32>
    %c0_129 = arith.constant 0 : index
    %c0_130 = arith.constant 0 : index
    %c0_131 = arith.constant 0 : index
    %295 = vector.load %arg18[%c0_129, %c0_130, %c0_131] : memref<2x1x32xf32, #tpu.memory_space<vmem>>, vector<1x1x32xf32>
    %296 = vector.shape_cast %295 : vector<1x1x32xf32> to vector<1x32xf32>
    %cst_132 = arith.constant dense<0.000000e+00> : vector<16xf32>
    %297 = vector.multi_reduction <add>, %292, %cst_132 [1] : vector<16x32xf32> to vector<16xf32>
    %298 = vector.shape_cast %297 : vector<16xf32> to vector<16x1xf32>
    %cst_133 = arith.constant 3.200000e+01 : f32
    %299 = vector.broadcast %cst_133 : f32 to vector<16x1xf32>
    %300 = arith.divf %298, %299 : vector<16x1xf32>
    %301 = vector.broadcast %300 : vector<16x1xf32> to vector<16x32xf32>
    %302 = arith.subf %292, %301 : vector<16x32xf32>
    %303 = arith.mulf %302, %302 : vector<16x32xf32>
    %cst_134 = arith.constant dense<0.000000e+00> : vector<16xf32>
    %304 = vector.multi_reduction <add>, %303, %cst_134 [1] : vector<16x32xf32> to vector<16xf32>
    %305 = vector.shape_cast %304 : vector<16xf32> to vector<16x1xf32>
    %cst_135 = arith.constant 3.200000e+01 : f32
    %306 = vector.broadcast %cst_135 : f32 to vector<16x1xf32>
    %307 = arith.divf %305, %306 : vector<16x1xf32>
    %cst_136 = arith.constant 9.99999974E-6 : f32
    %308 = vector.broadcast %cst_136 : f32 to vector<16x1xf32>
    %309 = arith.addf %307, %308 : vector<16x1xf32>
    %310 = math.rsqrt %309 : vector<16x1xf32>
    %311 = vector.broadcast %310 : vector<16x1xf32> to vector<16x32xf32>
    %312 = arith.mulf %302, %311 : vector<16x32xf32>
    %313 = vector.broadcast %294 : vector<1x32xf32> to vector<16x32xf32>
    %314 = arith.mulf %312, %313 : vector<16x32xf32>
    %315 = vector.broadcast %296 : vector<1x32xf32> to vector<16x32xf32>
    %316 = arith.addf %314, %315 : vector<16x32xf32>
    %c1 = arith.constant 1 : index
    %c0_137 = arith.constant 0 : index
    %c0_138 = arith.constant 0 : index
    %317 = vector.load %arg3[%c1, %c0_137, %c0_138] : memref<2x32x96xf32, #tpu.memory_space<vmem>>, vector<1x32x96xf32>
    %318 = vector.shape_cast %317 : vector<1x32x96xf32> to vector<32x96xf32>
    %cst_139 = arith.constant dense<0.000000e+00> : vector<16x96xf32>
    %319 = tpu.matmul %316, %318, %cst_139 {dimension_numbers = #tpu.dot_dimension_numbers<[1], [0], [0], [1], [0, 0, 1, 1], [], []>} : vector<16x32xf32>, vector<32x96xf32>, vector<16x96xf32> -> vector<16x96xf32>
    %c1_140 = arith.constant 1 : index
    %c0_141 = arith.constant 0 : index
    %c0_142 = arith.constant 0 : index
    %320 = vector.load %arg4[%c1_140, %c0_141, %c0_142] : memref<2x1x96xf32, #tpu.memory_space<vmem>>, vector<1x1x96xf32>
    %321 = vector.shape_cast %320 : vector<1x1x96xf32> to vector<1x96xf32>
    %322 = vector.broadcast %321 : vector<1x96xf32> to vector<16x96xf32>
    %323 = arith.addf %319, %322 : vector<16x96xf32>
    %324 = vector.extract_strided_slice %323 {offsets = [0, 0], sizes = [16, 32], strides = [1, 1]} : vector<16x96xf32> to vector<16x32xf32>
    %325 = vector.extract_strided_slice %323 {offsets = [0, 32], sizes = [16, 32], strides = [1, 1]} : vector<16x96xf32> to vector<16x32xf32>
    %326 = vector.extract_strided_slice %323 {offsets = [0, 64], sizes = [16, 32], strides = [1, 1]} : vector<16x96xf32> to vector<16x32xf32>
    %c1_143 = arith.constant 1 : index
    %c0_144 = arith.constant 0 : index
    %c0_145 = arith.constant 0 : index
    %c0_146 = arith.constant 0 : index
    %327 = vector.load %arg5[%c1_143, %c0_144, %c0_145, %c0_146] : memref<2x4x8x32xf32, #tpu.memory_space<vmem>>, vector<1x4x8x32xf32>
    %328 = vector.shape_cast %327 : vector<1x4x8x32xf32> to vector<4x8x32xf32>
    %c1_147 = arith.constant 1 : index
    %c0_148 = arith.constant 0 : index
    %c0_149 = arith.constant 0 : index
    %329 = vector.load %arg6[%c1_147, %c0_148, %c0_149] : memref<2x1x32xf32, #tpu.memory_space<vmem>>, vector<1x1x32xf32>
    %330 = vector.shape_cast %329 : vector<1x1x32xf32> to vector<1x32xf32>
    %331 = vector.shape_cast %324 : vector<16x32xf32> to vector<2x8x32xf32>
    %332 = vector.shape_cast %325 : vector<16x32xf32> to vector<2x8x32xf32>
    %333 = vector.shape_cast %326 : vector<16x32xf32> to vector<2x8x32xf32>
    %cst_150 = arith.constant 0.000000e+00 : f32
    %334 = vector.broadcast %cst_150 : f32 to vector<16x32xf32>
    %335 = vector.extract_strided_slice %331 {offsets = [0, 0, 0], sizes = [2, 8, 8], strides = [1, 1, 1]} : vector<2x8x32xf32> to vector<2x8x8xf32>
    %336 = vector.extract_strided_slice %332 {offsets = [0, 0, 0], sizes = [2, 8, 8], strides = [1, 1, 1]} : vector<2x8x32xf32> to vector<2x8x8xf32>
    %337 = vector.extract_strided_slice %333 {offsets = [0, 0, 0], sizes = [2, 8, 8], strides = [1, 1, 1]} : vector<2x8x32xf32> to vector<2x8x8xf32>
    "tpu.trace_start"() <{level = 10 : i32, message = "bqd,bkd->bqk"}> : () -> ()
    %cst_151 = arith.constant dense<0.000000e+00> : vector<2x8x8xf32>
    %338 = tpu.matmul %335, %336, %cst_151 {dimension_numbers = #tpu.dot_dimension_numbers<[2], [2], [1], [1], [0, 0, 0, 1, 1, 1], [0], [0]>} : vector<2x8x8xf32>, vector<2x8x8xf32>, vector<2x8x8xf32> -> vector<2x8x8xf32>
    "tpu.trace_stop"() : () -> ()
    %cst_152 = arith.constant 0.353553385 : f32
    %339 = vector.broadcast %cst_152 : f32 to vector<2x8x8xf32>
    %340 = arith.mulf %338, %339 : vector<2x8x8xf32>
    %cst_153 = arith.constant dense<0xFF800000> : vector<2x8xf32>
    %341 = vector.multi_reduction <maximumf>, %340, %cst_153 [2] : vector<2x8x8xf32> to vector<2x8xf32>
    %342 = vector.shape_cast %341 : vector<2x8xf32> to vector<2x8x1xf32>
    %343 = vector.broadcast %342 : vector<2x8x1xf32> to vector<2x8x8xf32>
    %344 = arith.subf %340, %343 : vector<2x8x8xf32>
    %345 = math.exp %344 : vector<2x8x8xf32>
    %cst_154 = arith.constant dense<0.000000e+00> : vector<2x8xf32>
    %346 = vector.multi_reduction <add>, %345, %cst_154 [2] : vector<2x8x8xf32> to vector<2x8xf32>
    %347 = vector.shape_cast %346 : vector<2x8xf32> to vector<2x8x1xf32>
    %348 = tpu.reciprocal %347 {approx = true} : vector<2x8x1xf32> -> vector<2x8x1xf32>
    %349 = vector.broadcast %348 : vector<2x8x1xf32> to vector<2x8x8xf32>
    %350 = arith.mulf %345, %349 : vector<2x8x8xf32>
    "tpu.trace_start"() <{level = 10 : i32, message = "bqk,bkd->bqd"}> : () -> ()
    %cst_155 = arith.constant dense<0.000000e+00> : vector<2x8x8xf32>
    %351 = tpu.matmul %350, %337, %cst_155 {dimension_numbers = #tpu.dot_dimension_numbers<[2], [1], [1], [2], [0, 0, 0, 1, 1, 2], [0], [0]>} : vector<2x8x8xf32>, vector<2x8x8xf32>, vector<2x8x8xf32> -> vector<2x8x8xf32>
    "tpu.trace_stop"() : () -> ()
    %352 = vector.shape_cast %351 : vector<2x8x8xf32> to vector<16x8xf32>
    %353 = vector.extract_strided_slice %328 {offsets = [0, 0, 0], sizes = [1, 8, 32], strides = [1, 1, 1]} : vector<4x8x32xf32> to vector<1x8x32xf32>
    %354 = vector.shape_cast %353 : vector<1x8x32xf32> to vector<8x32xf32>
    %cst_156 = arith.constant dense<0.000000e+00> : vector<16x32xf32>
    %355 = tpu.matmul %352, %354, %cst_156 {dimension_numbers = #tpu.dot_dimension_numbers<[1], [0], [0], [1], [0, 0, 1, 1], [], []>} : vector<16x8xf32>, vector<8x32xf32>, vector<16x32xf32> -> vector<16x32xf32>
    %356 = arith.addf %334, %355 : vector<16x32xf32>
    %357 = vector.extract_strided_slice %331 {offsets = [0, 0, 8], sizes = [2, 8, 8], strides = [1, 1, 1]} : vector<2x8x32xf32> to vector<2x8x8xf32>
    %358 = vector.extract_strided_slice %332 {offsets = [0, 0, 8], sizes = [2, 8, 8], strides = [1, 1, 1]} : vector<2x8x32xf32> to vector<2x8x8xf32>
    %359 = vector.extract_strided_slice %333 {offsets = [0, 0, 8], sizes = [2, 8, 8], strides = [1, 1, 1]} : vector<2x8x32xf32> to vector<2x8x8xf32>
    "tpu.trace_start"() <{level = 10 : i32, message = "bqd,bkd->bqk"}> : () -> ()
    %cst_157 = arith.constant dense<0.000000e+00> : vector<2x8x8xf32>
    %360 = tpu.matmul %357, %358, %cst_157 {dimension_numbers = #tpu.dot_dimension_numbers<[2], [2], [1], [1], [0, 0, 0, 1, 1, 1], [0], [0]>} : vector<2x8x8xf32>, vector<2x8x8xf32>, vector<2x8x8xf32> -> vector<2x8x8xf32>
    "tpu.trace_stop"() : () -> ()
    %cst_158 = arith.constant 0.353553385 : f32
    %361 = vector.broadcast %cst_158 : f32 to vector<2x8x8xf32>
    %362 = arith.mulf %360, %361 : vector<2x8x8xf32>
    %cst_159 = arith.constant dense<0xFF800000> : vector<2x8xf32>
    %363 = vector.multi_reduction <maximumf>, %362, %cst_159 [2] : vector<2x8x8xf32> to vector<2x8xf32>
    %364 = vector.shape_cast %363 : vector<2x8xf32> to vector<2x8x1xf32>
    %365 = vector.broadcast %364 : vector<2x8x1xf32> to vector<2x8x8xf32>
    %366 = arith.subf %362, %365 : vector<2x8x8xf32>
    %367 = math.exp %366 : vector<2x8x8xf32>
    %cst_160 = arith.constant dense<0.000000e+00> : vector<2x8xf32>
    %368 = vector.multi_reduction <add>, %367, %cst_160 [2] : vector<2x8x8xf32> to vector<2x8xf32>
    %369 = vector.shape_cast %368 : vector<2x8xf32> to vector<2x8x1xf32>
    %370 = tpu.reciprocal %369 {approx = true} : vector<2x8x1xf32> -> vector<2x8x1xf32>
    %371 = vector.broadcast %370 : vector<2x8x1xf32> to vector<2x8x8xf32>
    %372 = arith.mulf %367, %371 : vector<2x8x8xf32>
    "tpu.trace_start"() <{level = 10 : i32, message = "bqk,bkd->bqd"}> : () -> ()
    %cst_161 = arith.constant dense<0.000000e+00> : vector<2x8x8xf32>
    %373 = tpu.matmul %372, %359, %cst_161 {dimension_numbers = #tpu.dot_dimension_numbers<[2], [1], [1], [2], [0, 0, 0, 1, 1, 2], [0], [0]>} : vector<2x8x8xf32>, vector<2x8x8xf32>, vector<2x8x8xf32> -> vector<2x8x8xf32>
    "tpu.trace_stop"() : () -> ()
    %374 = vector.shape_cast %373 : vector<2x8x8xf32> to vector<16x8xf32>
    %375 = vector.extract_strided_slice %328 {offsets = [1, 0, 0], sizes = [1, 8, 32], strides = [1, 1, 1]} : vector<4x8x32xf32> to vector<1x8x32xf32>
    %376 = vector.shape_cast %375 : vector<1x8x32xf32> to vector<8x32xf32>
    %cst_162 = arith.constant dense<0.000000e+00> : vector<16x32xf32>
    %377 = tpu.matmul %374, %376, %cst_162 {dimension_numbers = #tpu.dot_dimension_numbers<[1], [0], [0], [1], [0, 0, 1, 1], [], []>} : vector<16x8xf32>, vector<8x32xf32>, vector<16x32xf32> -> vector<16x32xf32>
    %378 = arith.addf %356, %377 : vector<16x32xf32>
    %379 = vector.extract_strided_slice %331 {offsets = [0, 0, 16], sizes = [2, 8, 8], strides = [1, 1, 1]} : vector<2x8x32xf32> to vector<2x8x8xf32>
    %380 = vector.extract_strided_slice %332 {offsets = [0, 0, 16], sizes = [2, 8, 8], strides = [1, 1, 1]} : vector<2x8x32xf32> to vector<2x8x8xf32>
    %381 = vector.extract_strided_slice %333 {offsets = [0, 0, 16], sizes = [2, 8, 8], strides = [1, 1, 1]} : vector<2x8x32xf32> to vector<2x8x8xf32>
    "tpu.trace_start"() <{level = 10 : i32, message = "bqd,bkd->bqk"}> : () -> ()
    %cst_163 = arith.constant dense<0.000000e+00> : vector<2x8x8xf32>
    %382 = tpu.matmul %379, %380, %cst_163 {dimension_numbers = #tpu.dot_dimension_numbers<[2], [2], [1], [1], [0, 0, 0, 1, 1, 1], [0], [0]>} : vector<2x8x8xf32>, vector<2x8x8xf32>, vector<2x8x8xf32> -> vector<2x8x8xf32>
    "tpu.trace_stop"() : () -> ()
    %cst_164 = arith.constant 0.353553385 : f32
    %383 = vector.broadcast %cst_164 : f32 to vector<2x8x8xf32>
    %384 = arith.mulf %382, %383 : vector<2x8x8xf32>
    %cst_165 = arith.constant dense<0xFF800000> : vector<2x8xf32>
    %385 = vector.multi_reduction <maximumf>, %384, %cst_165 [2] : vector<2x8x8xf32> to vector<2x8xf32>
    %386 = vector.shape_cast %385 : vector<2x8xf32> to vector<2x8x1xf32>
    %387 = vector.broadcast %386 : vector<2x8x1xf32> to vector<2x8x8xf32>
    %388 = arith.subf %384, %387 : vector<2x8x8xf32>
    %389 = math.exp %388 : vector<2x8x8xf32>
    %cst_166 = arith.constant dense<0.000000e+00> : vector<2x8xf32>
    %390 = vector.multi_reduction <add>, %389, %cst_166 [2] : vector<2x8x8xf32> to vector<2x8xf32>
    %391 = vector.shape_cast %390 : vector<2x8xf32> to vector<2x8x1xf32>
    %392 = tpu.reciprocal %391 {approx = true} : vector<2x8x1xf32> -> vector<2x8x1xf32>
    %393 = vector.broadcast %392 : vector<2x8x1xf32> to vector<2x8x8xf32>
    %394 = arith.mulf %389, %393 : vector<2x8x8xf32>
    "tpu.trace_start"() <{level = 10 : i32, message = "bqk,bkd->bqd"}> : () -> ()
    %cst_167 = arith.constant dense<0.000000e+00> : vector<2x8x8xf32>
    %395 = tpu.matmul %394, %381, %cst_167 {dimension_numbers = #tpu.dot_dimension_numbers<[2], [1], [1], [2], [0, 0, 0, 1, 1, 2], [0], [0]>} : vector<2x8x8xf32>, vector<2x8x8xf32>, vector<2x8x8xf32> -> vector<2x8x8xf32>
    "tpu.trace_stop"() : () -> ()
    %396 = vector.shape_cast %395 : vector<2x8x8xf32> to vector<16x8xf32>
    %397 = vector.extract_strided_slice %328 {offsets = [2, 0, 0], sizes = [1, 8, 32], strides = [1, 1, 1]} : vector<4x8x32xf32> to vector<1x8x32xf32>
    %398 = vector.shape_cast %397 : vector<1x8x32xf32> to vector<8x32xf32>
    %cst_168 = arith.constant dense<0.000000e+00> : vector<16x32xf32>
    %399 = tpu.matmul %396, %398, %cst_168 {dimension_numbers = #tpu.dot_dimension_numbers<[1], [0], [0], [1], [0, 0, 1, 1], [], []>} : vector<16x8xf32>, vector<8x32xf32>, vector<16x32xf32> -> vector<16x32xf32>
    %400 = arith.addf %378, %399 : vector<16x32xf32>
    %401 = vector.extract_strided_slice %331 {offsets = [0, 0, 24], sizes = [2, 8, 8], strides = [1, 1, 1]} : vector<2x8x32xf32> to vector<2x8x8xf32>
    %402 = vector.extract_strided_slice %332 {offsets = [0, 0, 24], sizes = [2, 8, 8], strides = [1, 1, 1]} : vector<2x8x32xf32> to vector<2x8x8xf32>
    %403 = vector.extract_strided_slice %333 {offsets = [0, 0, 24], sizes = [2, 8, 8], strides = [1, 1, 1]} : vector<2x8x32xf32> to vector<2x8x8xf32>
    "tpu.trace_start"() <{level = 10 : i32, message = "bqd,bkd->bqk"}> : () -> ()
    %cst_169 = arith.constant dense<0.000000e+00> : vector<2x8x8xf32>
    %404 = tpu.matmul %401, %402, %cst_169 {dimension_numbers = #tpu.dot_dimension_numbers<[2], [2], [1], [1], [0, 0, 0, 1, 1, 1], [0], [0]>} : vector<2x8x8xf32>, vector<2x8x8xf32>, vector<2x8x8xf32> -> vector<2x8x8xf32>
    "tpu.trace_stop"() : () -> ()
    %cst_170 = arith.constant 0.353553385 : f32
    %405 = vector.broadcast %cst_170 : f32 to vector<2x8x8xf32>
    %406 = arith.mulf %404, %405 : vector<2x8x8xf32>
    %cst_171 = arith.constant dense<0xFF800000> : vector<2x8xf32>
    %407 = vector.multi_reduction <maximumf>, %406, %cst_171 [2] : vector<2x8x8xf32> to vector<2x8xf32>
    %408 = vector.shape_cast %407 : vector<2x8xf32> to vector<2x8x1xf32>
    %409 = vector.broadcast %408 : vector<2x8x1xf32> to vector<2x8x8xf32>
    %410 = arith.subf %406, %409 : vector<2x8x8xf32>
    %411 = math.exp %410 : vector<2x8x8xf32>
    %cst_172 = arith.constant dense<0.000000e+00> : vector<2x8xf32>
    %412 = vector.multi_reduction <add>, %411, %cst_172 [2] : vector<2x8x8xf32> to vector<2x8xf32>
    %413 = vector.shape_cast %412 : vector<2x8xf32> to vector<2x8x1xf32>
    %414 = tpu.reciprocal %413 {approx = true} : vector<2x8x1xf32> -> vector<2x8x1xf32>
    %415 = vector.broadcast %414 : vector<2x8x1xf32> to vector<2x8x8xf32>
    %416 = arith.mulf %411, %415 : vector<2x8x8xf32>
    "tpu.trace_start"() <{level = 10 : i32, message = "bqk,bkd->bqd"}> : () -> ()
    %cst_173 = arith.constant dense<0.000000e+00> : vector<2x8x8xf32>
    %417 = tpu.matmul %416, %403, %cst_173 {dimension_numbers = #tpu.dot_dimension_numbers<[2], [1], [1], [2], [0, 0, 0, 1, 1, 2], [0], [0]>} : vector<2x8x8xf32>, vector<2x8x8xf32>, vector<2x8x8xf32> -> vector<2x8x8xf32>
    "tpu.trace_stop"() : () -> ()
    %418 = vector.shape_cast %417 : vector<2x8x8xf32> to vector<16x8xf32>
    %419 = vector.extract_strided_slice %328 {offsets = [3, 0, 0], sizes = [1, 8, 32], strides = [1, 1, 1]} : vector<4x8x32xf32> to vector<1x8x32xf32>
    %420 = vector.shape_cast %419 : vector<1x8x32xf32> to vector<8x32xf32>
    %cst_174 = arith.constant dense<0.000000e+00> : vector<16x32xf32>
    %421 = tpu.matmul %418, %420, %cst_174 {dimension_numbers = #tpu.dot_dimension_numbers<[1], [0], [0], [1], [0, 0, 1, 1], [], []>} : vector<16x8xf32>, vector<8x32xf32>, vector<16x32xf32> -> vector<16x32xf32>
    %422 = arith.addf %400, %421 : vector<16x32xf32>
    %423 = vector.broadcast %330 : vector<1x32xf32> to vector<16x32xf32>
    %424 = arith.addf %422, %423 : vector<16x32xf32>
    %425 = arith.addf %316, %424 : vector<16x32xf32>
    %c1_175 = arith.constant 1 : index
    %c0_176 = arith.constant 0 : index
    %c0_177 = arith.constant 0 : index
    %426 = vector.load %arg13[%c1_175, %c0_176, %c0_177] : memref<2x1x32xf32, #tpu.memory_space<vmem>>, vector<1x1x32xf32>
    %427 = vector.shape_cast %426 : vector<1x1x32xf32> to vector<1x32xf32>
    %c1_178 = arith.constant 1 : index
    %c0_179 = arith.constant 0 : index
    %c0_180 = arith.constant 0 : index
    %428 = vector.load %arg14[%c1_178, %c0_179, %c0_180] : memref<2x1x32xf32, #tpu.memory_space<vmem>>, vector<1x1x32xf32>
    %429 = vector.shape_cast %428 : vector<1x1x32xf32> to vector<1x32xf32>
    %cst_181 = arith.constant dense<0.000000e+00> : vector<16xf32>
    %430 = vector.multi_reduction <add>, %425, %cst_181 [1] : vector<16x32xf32> to vector<16xf32>
    %431 = vector.shape_cast %430 : vector<16xf32> to vector<16x1xf32>
    %cst_182 = arith.constant 3.200000e+01 : f32
    %432 = vector.broadcast %cst_182 : f32 to vector<16x1xf32>
    %433 = arith.divf %431, %432 : vector<16x1xf32>
    %434 = vector.broadcast %433 : vector<16x1xf32> to vector<16x32xf32>
    %435 = arith.subf %425, %434 : vector<16x32xf32>
    %436 = arith.mulf %435, %435 : vector<16x32xf32>
    %cst_183 = arith.constant dense<0.000000e+00> : vector<16xf32>
    %437 = vector.multi_reduction <add>, %436, %cst_183 [1] : vector<16x32xf32> to vector<16xf32>
    %438 = vector.shape_cast %437 : vector<16xf32> to vector<16x1xf32>
    %cst_184 = arith.constant 3.200000e+01 : f32
    %439 = vector.broadcast %cst_184 : f32 to vector<16x1xf32>
    %440 = arith.divf %438, %439 : vector<16x1xf32>
    %cst_185 = arith.constant 9.99999974E-6 : f32
    %441 = vector.broadcast %cst_185 : f32 to vector<16x1xf32>
    %442 = arith.addf %440, %441 : vector<16x1xf32>
    %443 = math.rsqrt %442 : vector<16x1xf32>
    %444 = vector.broadcast %443 : vector<16x1xf32> to vector<16x32xf32>
    %445 = arith.mulf %435, %444 : vector<16x32xf32>
    %446 = vector.broadcast %427 : vector<1x32xf32> to vector<16x32xf32>
    %447 = arith.mulf %445, %446 : vector<16x32xf32>
    %448 = vector.broadcast %429 : vector<1x32xf32> to vector<16x32xf32>
    %449 = arith.addf %447, %448 : vector<16x32xf32>
    %c1_186 = arith.constant 1 : index
    %c0_187 = arith.constant 0 : index
    %c0_188 = arith.constant 0 : index
    %450 = vector.load %arg7[%c1_186, %c0_187, %c0_188] : memref<2x32x32xf32, #tpu.memory_space<vmem>>, vector<1x32x32xf32>
    %451 = vector.shape_cast %450 : vector<1x32x32xf32> to vector<32x32xf32>
    %cst_189 = arith.constant dense<0.000000e+00> : vector<16x32xf32>
    %452 = tpu.matmul %449, %451, %cst_189 {dimension_numbers = #tpu.dot_dimension_numbers<[1], [0], [0], [1], [0, 0, 1, 1], [], []>} : vector<16x32xf32>, vector<32x32xf32>, vector<16x32xf32> -> vector<16x32xf32>
    %c1_190 = arith.constant 1 : index
    %c0_191 = arith.constant 0 : index
    %c0_192 = arith.constant 0 : index
    %453 = vector.load %arg8[%c1_190, %c0_191, %c0_192] : memref<2x1x32xf32, #tpu.memory_space<vmem>>, vector<1x1x32xf32>
    %454 = vector.shape_cast %453 : vector<1x1x32xf32> to vector<1x32xf32>
    %455 = vector.broadcast %454 : vector<1x32xf32> to vector<16x32xf32>
    %456 = arith.addf %452, %455 : vector<16x32xf32>
    %c1_193 = arith.constant 1 : index
    %c0_194 = arith.constant 0 : index
    %c0_195 = arith.constant 0 : index
    %457 = vector.load %arg9[%c1_193, %c0_194, %c0_195] : memref<2x32x64xf32, #tpu.memory_space<vmem>>, vector<1x32x64xf32>
    %458 = vector.shape_cast %457 : vector<1x32x64xf32> to vector<32x64xf32>
    %cst_196 = arith.constant dense<0.000000e+00> : vector<16x64xf32>
    %459 = tpu.matmul %3, %458, %cst_196 {dimension_numbers = #tpu.dot_dimension_numbers<[1], [0], [0], [1], [0, 0, 1, 1], [], []>} : vector<16x32xf32>, vector<32x64xf32>, vector<16x64xf32> -> vector<16x64xf32>
    %c1_197 = arith.constant 1 : index
    %c0_198 = arith.constant 0 : index
    %c0_199 = arith.constant 0 : index
    %460 = vector.load %arg10[%c1_197, %c0_198, %c0_199] : memref<2x1x64xf32, #tpu.memory_space<vmem>>, vector<1x1x64xf32>
    %461 = vector.shape_cast %460 : vector<1x1x64xf32> to vector<1x64xf32>
    %462 = vector.broadcast %461 : vector<1x64xf32> to vector<16x64xf32>
    %463 = arith.addf %459, %462 : vector<16x64xf32>
    %464 = vector.extract_strided_slice %463 {offsets = [0, 0], sizes = [16, 32], strides = [1, 1]} : vector<16x64xf32> to vector<16x32xf32>
    %465 = vector.extract_strided_slice %463 {offsets = [0, 32], sizes = [16, 32], strides = [1, 1]} : vector<16x64xf32> to vector<16x32xf32>
    %c1_200 = arith.constant 1 : index
    %c0_201 = arith.constant 0 : index
    %c0_202 = arith.constant 0 : index
    %c0_203 = arith.constant 0 : index
    %466 = vector.load %arg11[%c1_200, %c0_201, %c0_202, %c0_203] : memref<2x4x8x32xf32, #tpu.memory_space<vmem>>, vector<1x4x8x32xf32>
    %467 = vector.shape_cast %466 : vector<1x4x8x32xf32> to vector<4x8x32xf32>
    %c1_204 = arith.constant 1 : index
    %c0_205 = arith.constant 0 : index
    %c0_206 = arith.constant 0 : index
    %468 = vector.load %arg12[%c1_204, %c0_205, %c0_206] : memref<2x1x32xf32, #tpu.memory_space<vmem>>, vector<1x1x32xf32>
    %469 = vector.shape_cast %468 : vector<1x1x32xf32> to vector<1x32xf32>
    %470 = vector.shape_cast %456 : vector<16x32xf32> to vector<2x8x32xf32>
    %471 = vector.shape_cast %464 : vector<16x32xf32> to vector<2x8x32xf32>
    %472 = vector.shape_cast %465 : vector<16x32xf32> to vector<2x8x32xf32>
    %cst_207 = arith.constant 0.000000e+00 : f32
    %473 = vector.broadcast %cst_207 : f32 to vector<16x32xf32>
    %474 = vector.extract_strided_slice %470 {offsets = [0, 0, 0], sizes = [2, 8, 8], strides = [1, 1, 1]} : vector<2x8x32xf32> to vector<2x8x8xf32>
    %475 = vector.extract_strided_slice %471 {offsets = [0, 0, 0], sizes = [2, 8, 8], strides = [1, 1, 1]} : vector<2x8x32xf32> to vector<2x8x8xf32>
    %476 = vector.extract_strided_slice %472 {offsets = [0, 0, 0], sizes = [2, 8, 8], strides = [1, 1, 1]} : vector<2x8x32xf32> to vector<2x8x8xf32>
    "tpu.trace_start"() <{level = 10 : i32, message = "bqd,bkd->bqk"}> : () -> ()
    %cst_208 = arith.constant dense<0.000000e+00> : vector<2x8x8xf32>
    %477 = tpu.matmul %474, %475, %cst_208 {dimension_numbers = #tpu.dot_dimension_numbers<[2], [2], [1], [1], [0, 0, 0, 1, 1, 1], [0], [0]>} : vector<2x8x8xf32>, vector<2x8x8xf32>, vector<2x8x8xf32> -> vector<2x8x8xf32>
    "tpu.trace_stop"() : () -> ()
    %cst_209 = arith.constant 0.353553385 : f32
    %478 = vector.broadcast %cst_209 : f32 to vector<2x8x8xf32>
    %479 = arith.mulf %477, %478 : vector<2x8x8xf32>
    %cst_210 = arith.constant dense<0xFF800000> : vector<2x8xf32>
    %480 = vector.multi_reduction <maximumf>, %479, %cst_210 [2] : vector<2x8x8xf32> to vector<2x8xf32>
    %481 = vector.shape_cast %480 : vector<2x8xf32> to vector<2x8x1xf32>
    %482 = vector.broadcast %481 : vector<2x8x1xf32> to vector<2x8x8xf32>
    %483 = arith.subf %479, %482 : vector<2x8x8xf32>
    %484 = math.exp %483 : vector<2x8x8xf32>
    %cst_211 = arith.constant dense<0.000000e+00> : vector<2x8xf32>
    %485 = vector.multi_reduction <add>, %484, %cst_211 [2] : vector<2x8x8xf32> to vector<2x8xf32>
    %486 = vector.shape_cast %485 : vector<2x8xf32> to vector<2x8x1xf32>
    %487 = tpu.reciprocal %486 {approx = true} : vector<2x8x1xf32> -> vector<2x8x1xf32>
    %488 = vector.broadcast %487 : vector<2x8x1xf32> to vector<2x8x8xf32>
    %489 = arith.mulf %484, %488 : vector<2x8x8xf32>
    "tpu.trace_start"() <{level = 10 : i32, message = "bqk,bkd->bqd"}> : () -> ()
    %cst_212 = arith.constant dense<0.000000e+00> : vector<2x8x8xf32>
    %490 = tpu.matmul %489, %476, %cst_212 {dimension_numbers = #tpu.dot_dimension_numbers<[2], [1], [1], [2], [0, 0, 0, 1, 1, 2], [0], [0]>} : vector<2x8x8xf32>, vector<2x8x8xf32>, vector<2x8x8xf32> -> vector<2x8x8xf32>
    "tpu.trace_stop"() : () -> ()
    %491 = vector.shape_cast %490 : vector<2x8x8xf32> to vector<16x8xf32>
    %492 = vector.extract_strided_slice %467 {offsets = [0, 0, 0], sizes = [1, 8, 32], strides = [1, 1, 1]} : vector<4x8x32xf32> to vector<1x8x32xf32>
    %493 = vector.shape_cast %492 : vector<1x8x32xf32> to vector<8x32xf32>
    %cst_213 = arith.constant dense<0.000000e+00> : vector<16x32xf32>
    %494 = tpu.matmul %491, %493, %cst_213 {dimension_numbers = #tpu.dot_dimension_numbers<[1], [0], [0], [1], [0, 0, 1, 1], [], []>} : vector<16x8xf32>, vector<8x32xf32>, vector<16x32xf32> -> vector<16x32xf32>
    %495 = arith.addf %473, %494 : vector<16x32xf32>
    %496 = vector.extract_strided_slice %470 {offsets = [0, 0, 8], sizes = [2, 8, 8], strides = [1, 1, 1]} : vector<2x8x32xf32> to vector<2x8x8xf32>
    %497 = vector.extract_strided_slice %471 {offsets = [0, 0, 8], sizes = [2, 8, 8], strides = [1, 1, 1]} : vector<2x8x32xf32> to vector<2x8x8xf32>
    %498 = vector.extract_strided_slice %472 {offsets = [0, 0, 8], sizes = [2, 8, 8], strides = [1, 1, 1]} : vector<2x8x32xf32> to vector<2x8x8xf32>
    "tpu.trace_start"() <{level = 10 : i32, message = "bqd,bkd->bqk"}> : () -> ()
    %cst_214 = arith.constant dense<0.000000e+00> : vector<2x8x8xf32>
    %499 = tpu.matmul %496, %497, %cst_214 {dimension_numbers = #tpu.dot_dimension_numbers<[2], [2], [1], [1], [0, 0, 0, 1, 1, 1], [0], [0]>} : vector<2x8x8xf32>, vector<2x8x8xf32>, vector<2x8x8xf32> -> vector<2x8x8xf32>
    "tpu.trace_stop"() : () -> ()
    %cst_215 = arith.constant 0.353553385 : f32
    %500 = vector.broadcast %cst_215 : f32 to vector<2x8x8xf32>
    %501 = arith.mulf %499, %500 : vector<2x8x8xf32>
    %cst_216 = arith.constant dense<0xFF800000> : vector<2x8xf32>
    %502 = vector.multi_reduction <maximumf>, %501, %cst_216 [2] : vector<2x8x8xf32> to vector<2x8xf32>
    %503 = vector.shape_cast %502 : vector<2x8xf32> to vector<2x8x1xf32>
    %504 = vector.broadcast %503 : vector<2x8x1xf32> to vector<2x8x8xf32>
    %505 = arith.subf %501, %504 : vector<2x8x8xf32>
    %506 = math.exp %505 : vector<2x8x8xf32>
    %cst_217 = arith.constant dense<0.000000e+00> : vector<2x8xf32>
    %507 = vector.multi_reduction <add>, %506, %cst_217 [2] : vector<2x8x8xf32> to vector<2x8xf32>
    %508 = vector.shape_cast %507 : vector<2x8xf32> to vector<2x8x1xf32>
    %509 = tpu.reciprocal %508 {approx = true} : vector<2x8x1xf32> -> vector<2x8x1xf32>
    %510 = vector.broadcast %509 : vector<2x8x1xf32> to vector<2x8x8xf32>
    %511 = arith.mulf %506, %510 : vector<2x8x8xf32>
    "tpu.trace_start"() <{level = 10 : i32, message = "bqk,bkd->bqd"}> : () -> ()
    %cst_218 = arith.constant dense<0.000000e+00> : vector<2x8x8xf32>
    %512 = tpu.matmul %511, %498, %cst_218 {dimension_numbers = #tpu.dot_dimension_numbers<[2], [1], [1], [2], [0, 0, 0, 1, 1, 2], [0], [0]>} : vector<2x8x8xf32>, vector<2x8x8xf32>, vector<2x8x8xf32> -> vector<2x8x8xf32>
    "tpu.trace_stop"() : () -> ()
    %513 = vector.shape_cast %512 : vector<2x8x8xf32> to vector<16x8xf32>
    %514 = vector.extract_strided_slice %467 {offsets = [1, 0, 0], sizes = [1, 8, 32], strides = [1, 1, 1]} : vector<4x8x32xf32> to vector<1x8x32xf32>
    %515 = vector.shape_cast %514 : vector<1x8x32xf32> to vector<8x32xf32>
    %cst_219 = arith.constant dense<0.000000e+00> : vector<16x32xf32>
    %516 = tpu.matmul %513, %515, %cst_219 {dimension_numbers = #tpu.dot_dimension_numbers<[1], [0], [0], [1], [0, 0, 1, 1], [], []>} : vector<16x8xf32>, vector<8x32xf32>, vector<16x32xf32> -> vector<16x32xf32>
    %517 = arith.addf %495, %516 : vector<16x32xf32>
    %518 = vector.extract_strided_slice %470 {offsets = [0, 0, 16], sizes = [2, 8, 8], strides = [1, 1, 1]} : vector<2x8x32xf32> to vector<2x8x8xf32>
    %519 = vector.extract_strided_slice %471 {offsets = [0, 0, 16], sizes = [2, 8, 8], strides = [1, 1, 1]} : vector<2x8x32xf32> to vector<2x8x8xf32>
    %520 = vector.extract_strided_slice %472 {offsets = [0, 0, 16], sizes = [2, 8, 8], strides = [1, 1, 1]} : vector<2x8x32xf32> to vector<2x8x8xf32>
    "tpu.trace_start"() <{level = 10 : i32, message = "bqd,bkd->bqk"}> : () -> ()
    %cst_220 = arith.constant dense<0.000000e+00> : vector<2x8x8xf32>
    %521 = tpu.matmul %518, %519, %cst_220 {dimension_numbers = #tpu.dot_dimension_numbers<[2], [2], [1], [1], [0, 0, 0, 1, 1, 1], [0], [0]>} : vector<2x8x8xf32>, vector<2x8x8xf32>, vector<2x8x8xf32> -> vector<2x8x8xf32>
    "tpu.trace_stop"() : () -> ()
    %cst_221 = arith.constant 0.353553385 : f32
    %522 = vector.broadcast %cst_221 : f32 to vector<2x8x8xf32>
    %523 = arith.mulf %521, %522 : vector<2x8x8xf32>
    %cst_222 = arith.constant dense<0xFF800000> : vector<2x8xf32>
    %524 = vector.multi_reduction <maximumf>, %523, %cst_222 [2] : vector<2x8x8xf32> to vector<2x8xf32>
    %525 = vector.shape_cast %524 : vector<2x8xf32> to vector<2x8x1xf32>
    %526 = vector.broadcast %525 : vector<2x8x1xf32> to vector<2x8x8xf32>
    %527 = arith.subf %523, %526 : vector<2x8x8xf32>
    %528 = math.exp %527 : vector<2x8x8xf32>
    %cst_223 = arith.constant dense<0.000000e+00> : vector<2x8xf32>
    %529 = vector.multi_reduction <add>, %528, %cst_223 [2] : vector<2x8x8xf32> to vector<2x8xf32>
    %530 = vector.shape_cast %529 : vector<2x8xf32> to vector<2x8x1xf32>
    %531 = tpu.reciprocal %530 {approx = true} : vector<2x8x1xf32> -> vector<2x8x1xf32>
    %532 = vector.broadcast %531 : vector<2x8x1xf32> to vector<2x8x8xf32>
    %533 = arith.mulf %528, %532 : vector<2x8x8xf32>
    "tpu.trace_start"() <{level = 10 : i32, message = "bqk,bkd->bqd"}> : () -> ()
    %cst_224 = arith.constant dense<0.000000e+00> : vector<2x8x8xf32>
    %534 = tpu.matmul %533, %520, %cst_224 {dimension_numbers = #tpu.dot_dimension_numbers<[2], [1], [1], [2], [0, 0, 0, 1, 1, 2], [0], [0]>} : vector<2x8x8xf32>, vector<2x8x8xf32>, vector<2x8x8xf32> -> vector<2x8x8xf32>
    "tpu.trace_stop"() : () -> ()
    %535 = vector.shape_cast %534 : vector<2x8x8xf32> to vector<16x8xf32>
    %536 = vector.extract_strided_slice %467 {offsets = [2, 0, 0], sizes = [1, 8, 32], strides = [1, 1, 1]} : vector<4x8x32xf32> to vector<1x8x32xf32>
    %537 = vector.shape_cast %536 : vector<1x8x32xf32> to vector<8x32xf32>
    %cst_225 = arith.constant dense<0.000000e+00> : vector<16x32xf32>
    %538 = tpu.matmul %535, %537, %cst_225 {dimension_numbers = #tpu.dot_dimension_numbers<[1], [0], [0], [1], [0, 0, 1, 1], [], []>} : vector<16x8xf32>, vector<8x32xf32>, vector<16x32xf32> -> vector<16x32xf32>
    %539 = arith.addf %517, %538 : vector<16x32xf32>
    %540 = vector.extract_strided_slice %470 {offsets = [0, 0, 24], sizes = [2, 8, 8], strides = [1, 1, 1]} : vector<2x8x32xf32> to vector<2x8x8xf32>
    %541 = vector.extract_strided_slice %471 {offsets = [0, 0, 24], sizes = [2, 8, 8], strides = [1, 1, 1]} : vector<2x8x32xf32> to vector<2x8x8xf32>
    %542 = vector.extract_strided_slice %472 {offsets = [0, 0, 24], sizes = [2, 8, 8], strides = [1, 1, 1]} : vector<2x8x32xf32> to vector<2x8x8xf32>
    "tpu.trace_start"() <{level = 10 : i32, message = "bqd,bkd->bqk"}> : () -> ()
    %cst_226 = arith.constant dense<0.000000e+00> : vector<2x8x8xf32>
    %543 = tpu.matmul %540, %541, %cst_226 {dimension_numbers = #tpu.dot_dimension_numbers<[2], [2], [1], [1], [0, 0, 0, 1, 1, 1], [0], [0]>} : vector<2x8x8xf32>, vector<2x8x8xf32>, vector<2x8x8xf32> -> vector<2x8x8xf32>
    "tpu.trace_stop"() : () -> ()
    %cst_227 = arith.constant 0.353553385 : f32
    %544 = vector.broadcast %cst_227 : f32 to vector<2x8x8xf32>
    %545 = arith.mulf %543, %544 : vector<2x8x8xf32>
    %cst_228 = arith.constant dense<0xFF800000> : vector<2x8xf32>
    %546 = vector.multi_reduction <maximumf>, %545, %cst_228 [2] : vector<2x8x8xf32> to vector<2x8xf32>
    %547 = vector.shape_cast %546 : vector<2x8xf32> to vector<2x8x1xf32>
    %548 = vector.broadcast %547 : vector<2x8x1xf32> to vector<2x8x8xf32>
    %549 = arith.subf %545, %548 : vector<2x8x8xf32>
    %550 = math.exp %549 : vector<2x8x8xf32>
    %cst_229 = arith.constant dense<0.000000e+00> : vector<2x8xf32>
    %551 = vector.multi_reduction <add>, %550, %cst_229 [2] : vector<2x8x8xf32> to vector<2x8xf32>
    %552 = vector.shape_cast %551 : vector<2x8xf32> to vector<2x8x1xf32>
    %553 = tpu.reciprocal %552 {approx = true} : vector<2x8x1xf32> -> vector<2x8x1xf32>
    %554 = vector.broadcast %553 : vector<2x8x1xf32> to vector<2x8x8xf32>
    %555 = arith.mulf %550, %554 : vector<2x8x8xf32>
    "tpu.trace_start"() <{level = 10 : i32, message = "bqk,bkd->bqd"}> : () -> ()
    %cst_230 = arith.constant dense<0.000000e+00> : vector<2x8x8xf32>
    %556 = tpu.matmul %555, %542, %cst_230 {dimension_numbers = #tpu.dot_dimension_numbers<[2], [1], [1], [2], [0, 0, 0, 1, 1, 2], [0], [0]>} : vector<2x8x8xf32>, vector<2x8x8xf32>, vector<2x8x8xf32> -> vector<2x8x8xf32>
    "tpu.trace_stop"() : () -> ()
    %557 = vector.shape_cast %556 : vector<2x8x8xf32> to vector<16x8xf32>
    %558 = vector.extract_strided_slice %467 {offsets = [3, 0, 0], sizes = [1, 8, 32], strides = [1, 1, 1]} : vector<4x8x32xf32> to vector<1x8x32xf32>
    %559 = vector.shape_cast %558 : vector<1x8x32xf32> to vector<8x32xf32>
    %cst_231 = arith.constant dense<0.000000e+00> : vector<16x32xf32>
    %560 = tpu.matmul %557, %559, %cst_231 {dimension_numbers = #tpu.dot_dimension_numbers<[1], [0], [0], [1], [0, 0, 1, 1], [], []>} : vector<16x8xf32>, vector<8x32xf32>, vector<16x32xf32> -> vector<16x32xf32>
    %561 = arith.addf %539, %560 : vector<16x32xf32>
    %562 = vector.broadcast %469 : vector<1x32xf32> to vector<16x32xf32>
    %563 = arith.addf %561, %562 : vector<16x32xf32>
    %564 = arith.addf %449, %563 : vector<16x32xf32>
    %c1_232 = arith.constant 1 : index
    %c0_233 = arith.constant 0 : index
    %c0_234 = arith.constant 0 : index
    %565 = vector.load %arg15[%c1_232, %c0_233, %c0_234] : memref<2x1x32xf32, #tpu.memory_space<vmem>>, vector<1x1x32xf32>
    %566 = vector.shape_cast %565 : vector<1x1x32xf32> to vector<1x32xf32>
    %c1_235 = arith.constant 1 : index
    %c0_236 = arith.constant 0 : index
    %c0_237 = arith.constant 0 : index
    %567 = vector.load %arg16[%c1_235, %c0_236, %c0_237] : memref<2x1x32xf32, #tpu.memory_space<vmem>>, vector<1x1x32xf32>
    %568 = vector.shape_cast %567 : vector<1x1x32xf32> to vector<1x32xf32>
    %cst_238 = arith.constant dense<0.000000e+00> : vector<16xf32>
    %569 = vector.multi_reduction <add>, %564, %cst_238 [1] : vector<16x32xf32> to vector<16xf32>
    %570 = vector.shape_cast %569 : vector<16xf32> to vector<16x1xf32>
    %cst_239 = arith.constant 3.200000e+01 : f32
    %571 = vector.broadcast %cst_239 : f32 to vector<16x1xf32>
    %572 = arith.divf %570, %571 : vector<16x1xf32>
    %573 = vector.broadcast %572 : vector<16x1xf32> to vector<16x32xf32>
    %574 = arith.subf %564, %573 : vector<16x32xf32>
    %575 = arith.mulf %574, %574 : vector<16x32xf32>
    %cst_240 = arith.constant dense<0.000000e+00> : vector<16xf32>
    %576 = vector.multi_reduction <add>, %575, %cst_240 [1] : vector<16x32xf32> to vector<16xf32>
    %577 = vector.shape_cast %576 : vector<16xf32> to vector<16x1xf32>
    %cst_241 = arith.constant 3.200000e+01 : f32
    %578 = vector.broadcast %cst_241 : f32 to vector<16x1xf32>
    %579 = arith.divf %577, %578 : vector<16x1xf32>
    %cst_242 = arith.constant 9.99999974E-6 : f32
    %580 = vector.broadcast %cst_242 : f32 to vector<16x1xf32>
    %581 = arith.addf %579, %580 : vector<16x1xf32>
    %582 = math.rsqrt %581 : vector<16x1xf32>
    %583 = vector.broadcast %582 : vector<16x1xf32> to vector<16x32xf32>
    %584 = arith.mulf %574, %583 : vector<16x32xf32>
    %585 = vector.broadcast %566 : vector<1x32xf32> to vector<16x32xf32>
    %586 = arith.mulf %584, %585 : vector<16x32xf32>
    %587 = vector.broadcast %568 : vector<1x32xf32> to vector<16x32xf32>
    %588 = arith.addf %586, %587 : vector<16x32xf32>
    %c1_243 = arith.constant 1 : index
    %c0_244 = arith.constant 0 : index
    %c0_245 = arith.constant 0 : index
    %589 = vector.load %arg19[%c1_243, %c0_244, %c0_245] : memref<2x32x128xf32, #tpu.memory_space<vmem>>, vector<1x32x128xf32>
    %590 = vector.shape_cast %589 : vector<1x32x128xf32> to vector<32x128xf32>
    %cst_246 = arith.constant dense<0.000000e+00> : vector<16x128xf32>
    %591 = tpu.matmul %588, %590, %cst_246 {dimension_numbers = #tpu.dot_dimension_numbers<[1], [0], [0], [1], [0, 0, 1, 1], [], []>} : vector<16x32xf32>, vector<32x128xf32>, vector<16x128xf32> -> vector<16x128xf32>
    %c1_247 = arith.constant 1 : index
    %c0_248 = arith.constant 0 : index
    %c0_249 = arith.constant 0 : index
    %592 = vector.load %arg20[%c1_247, %c0_248, %c0_249] : memref<2x1x128xf32, #tpu.memory_space<vmem>>, vector<1x1x128xf32>
    %593 = vector.shape_cast %592 : vector<1x1x128xf32> to vector<1x128xf32>
    %594 = vector.broadcast %593 : vector<1x128xf32> to vector<16x128xf32>
    %595 = arith.addf %591, %594 : vector<16x128xf32>
    %cst_250 = arith.constant 0.000000e+00 : f32
    %596 = vector.broadcast %cst_250 : f32 to vector<16x128xf32>
    %597 = arith.maximumf %595, %596 : vector<16x128xf32>
    %c1_251 = arith.constant 1 : index
    %c0_252 = arith.constant 0 : index
    %c0_253 = arith.constant 0 : index
    %598 = vector.load %arg21[%c1_251, %c0_252, %c0_253] : memref<2x128x32xf32, #tpu.memory_space<vmem>>, vector<1x128x32xf32>
    %599 = vector.shape_cast %598 : vector<1x128x32xf32> to vector<128x32xf32>
    %cst_254 = arith.constant dense<0.000000e+00> : vector<16x32xf32>
    %600 = tpu.matmul %597, %599, %cst_254 {dimension_numbers = #tpu.dot_dimension_numbers<[1], [0], [0], [1], [0, 0, 1, 1], [], []>} : vector<16x128xf32>, vector<128x32xf32>, vector<16x32xf32> -> vector<16x32xf32>
    %c1_255 = arith.constant 1 : index
    %c0_256 = arith.constant 0 : index
    %c0_257 = arith.constant 0 : index
    %601 = vector.load %arg22[%c1_255, %c0_256, %c0_257] : memref<2x1x32xf32, #tpu.memory_space<vmem>>, vector<1x1x32xf32>
    %602 = vector.shape_cast %601 : vector<1x1x32xf32> to vector<1x32xf32>
    %603 = vector.broadcast %602 : vector<1x32xf32> to vector<16x32xf32>
    %604 = arith.addf %600, %603 : vector<16x32xf32>
    %605 = arith.addf %588, %604 : vector<16x32xf32>
    %c1_258 = arith.constant 1 : index
    %c0_259 = arith.constant 0 : index
    %c0_260 = arith.constant 0 : index
    %606 = vector.load %arg17[%c1_258, %c0_259, %c0_260] : memref<2x1x32xf32, #tpu.memory_space<vmem>>, vector<1x1x32xf32>
    %607 = vector.shape_cast %606 : vector<1x1x32xf32> to vector<1x32xf32>
    %c1_261 = arith.constant 1 : index
    %c0_262 = arith.constant 0 : index
    %c0_263 = arith.constant 0 : index
    %608 = vector.load %arg18[%c1_261, %c0_262, %c0_263] : memref<2x1x32xf32, #tpu.memory_space<vmem>>, vector<1x1x32xf32>
    %609 = vector.shape_cast %608 : vector<1x1x32xf32> to vector<1x32xf32>
    %cst_264 = arith.constant dense<0.000000e+00> : vector<16xf32>
    %610 = vector.multi_reduction <add>, %605, %cst_264 [1] : vector<16x32xf32> to vector<16xf32>
    %611 = vector.shape_cast %610 : vector<16xf32> to vector<16x1xf32>
    %cst_265 = arith.constant 3.200000e+01 : f32
    %612 = vector.broadcast %cst_265 : f32 to vector<16x1xf32>
    %613 = arith.divf %611, %612 : vector<16x1xf32>
    %614 = vector.broadcast %613 : vector<16x1xf32> to vector<16x32xf32>
    %615 = arith.subf %605, %614 : vector<16x32xf32>
    %616 = arith.mulf %615, %615 : vector<16x32xf32>
    %cst_266 = arith.constant dense<0.000000e+00> : vector<16xf32>
    %617 = vector.multi_reduction <add>, %616, %cst_266 [1] : vector<16x32xf32> to vector<16xf32>
    %618 = vector.shape_cast %617 : vector<16xf32> to vector<16x1xf32>
    %cst_267 = arith.constant 3.200000e+01 : f32
    %619 = vector.broadcast %cst_267 : f32 to vector<16x1xf32>
    %620 = arith.divf %618, %619 : vector<16x1xf32>
    %cst_268 = arith.constant 9.99999974E-6 : f32
    %621 = vector.broadcast %cst_268 : f32 to vector<16x1xf32>
    %622 = arith.addf %620, %621 : vector<16x1xf32>
    %623 = math.rsqrt %622 : vector<16x1xf32>
    %624 = vector.broadcast %623 : vector<16x1xf32> to vector<16x32xf32>
    %625 = arith.mulf %615, %624 : vector<16x32xf32>
    %626 = vector.broadcast %607 : vector<1x32xf32> to vector<16x32xf32>
    %627 = arith.mulf %625, %626 : vector<16x32xf32>
    %628 = vector.broadcast %609 : vector<1x32xf32> to vector<16x32xf32>
    %629 = arith.addf %627, %628 : vector<16x32xf32>
    %630 = vector.shape_cast %629 : vector<16x32xf32> to vector<2x8x32xf32>
    %c0_269 = arith.constant 0 : index
    %c0_270 = arith.constant 0 : index
    %c0_271 = arith.constant 0 : index
    %631 = vector.load %arg23[%c0_269, %c0_270, %c0_271] : memref<2x8x32xf32, #tpu.memory_space<vmem>>, vector<2x8x32xf32>
    tpu.vector_store %arg23[%c0_269, %c0_270, %c0_271], %630 {strides = array<i32>} : memref<2x8x32xf32, #tpu.memory_space<vmem>>, vector<2x8x32xf32>,
    return
  }
  func.func @transform_0(%arg0: i32) -> (i32, i32, i32) {
    %c0_i32 = arith.constant 0 : i32
    %c0_i32_0 = arith.constant 0 : i32
    %c0_i32_1 = arith.constant 0 : i32
    %c0_i32_2 = arith.constant 0 : i32
    return %c0_i32, %c0_i32_0, %c0_i32_1 : i32, i32, i32
  }
  func.func @transform_1(%arg0: i32) -> (i32, i32, i32) {
    %c0_i32 = arith.constant 0 : i32
    %c0_i32_0 = arith.constant 0 : i32
    %c0_i32_1 = arith.constant 0 : i32
    %c0_i32_2 = arith.constant 0 : i32
    return %c0_i32, %c0_i32_0, %c0_i32_1 : i32, i32, i32
  }
  func.func @transform_2(%arg0: i32) -> (i32, i32, i32) {
    %c0_i32 = arith.constant 0 : i32
    %c0_i32_0 = arith.constant 0 : i32
    %c0_i32_1 = arith.constant 0 : i32
    %c0_i32_2 = arith.constant 0 : i32
    return %c0_i32, %c0_i32_0, %c0_i32_1 : i32, i32, i32
  }
  func.func @transform_3(%arg0: i32) -> (i32, i32, i32) {
    %c0_i32 = arith.constant 0 : i32
    %c0_i32_0 = arith.constant 0 : i32
    %c0_i32_1 = arith.constant 0 : i32
    %c0_i32_2 = arith.constant 0 : i32
    return %c0_i32, %c0_i32_0, %c0_i32_1 : i32, i32, i32
  }
  func.func @transform_4(%arg0: i32) -> (i32, i32, i32, i32) {
    %c0_i32 = arith.constant 0 : i32
    %c0_i32_0 = arith.constant 0 : i32
    %c0_i32_1 = arith.constant 0 : i32
    %c0_i32_2 = arith.constant 0 : i32
    %c0_i32_3 = arith.constant 0 : i32
    return %c0_i32, %c0_i32_0, %c0_i32_1, %c0_i32_2 : i32, i32, i32, i32
  }
  func.func @transform_5(%arg0: i32) -> (i32, i32, i32) {
    %c0_i32 = arith.constant 0 : i32
    %c0_i32_0 = arith.constant 0 : i32
    %c0_i32_1 = arith.constant 0 : i32
    %c0_i32_2 = arith.constant 0 : i32
    return %c0_i32, %c0_i32_0, %c0_i32_1 : i32, i32, i32
  }
  func.func @transform_6(%arg0: i32) -> (i32, i32, i32) {
    %c0_i32 = arith.constant 0 : i32
    %c0_i32_0 = arith.constant 0 : i32
    %c0_i32_1 = arith.constant 0 : i32
    %c0_i32_2 = arith.constant 0 : i32
    return %c0_i32, %c0_i32_0, %c0_i32_1 : i32, i32, i32
  }
  func.func @transform_7(%arg0: i32) -> (i32, i32, i32) {
    %c0_i32 = arith.constant 0 : i32
    %c0_i32_0 = arith.constant 0 : i32
    %c0_i32_1 = arith.constant 0 : i32
    %c0_i32_2 = arith.constant 0 : i32
    return %c0_i32, %c0_i32_0, %c0_i32_1 : i32, i32, i32
  }
  func.func @transform_8(%arg0: i32) -> (i32, i32, i32) {
    %c0_i32 = arith.constant 0 : i32
    %c0_i32_0 = arith.constant 0 : i32
    %c0_i32_1 = arith.constant 0 : i32
    %c0_i32_2 = arith.constant 0 : i32
    return %c0_i32, %c0_i32_0, %c0_i32_1 : i32, i32, i32
  }
  func.func @transform_9(%arg0: i32) -> (i32, i32, i32) {
    %c0_i32 = arith.constant 0 : i32
    %c0_i32_0 = arith.constant 0 : i32
    %c0_i32_1 = arith.constant 0 : i32
    %c0_i32_2 = arith.constant 0 : i32
    return %c0_i32, %c0_i32_0, %c0_i32_1 : i32, i32, i32
  }
  func.func @transform_10(%arg0: i32) -> (i32, i32, i32, i32) {
    %c0_i32 = arith.constant 0 : i32
    %c0_i32_0 = arith.constant 0 : i32
    %c0_i32_1 = arith.constant 0 : i32
    %c0_i32_2 = arith.constant 0 : i32
    %c0_i32_3 = arith.constant 0 : i32
    return %c0_i32, %c0_i32_0, %c0_i32_1, %c0_i32_2 : i32, i32, i32, i32
  }
  func.func @transform_11(%arg0: i32) -> (i32, i32, i32) {
    %c0_i32 = arith.constant 0 : i32
    %c0_i32_0 = arith.constant 0 : i32
    %c0_i32_1 = arith.constant 0 : i32
    %c0_i32_2 = arith.constant 0 : i32
    return %c0_i32, %c0_i32_0, %c0_i32_1 : i32, i32, i32
  }
  func.func @transform_12(%arg0: i32) -> (i32, i32, i32) {
    %c0_i32 = arith.constant 0 : i32
    %c0_i32_0 = arith.constant 0 : i32
    %c0_i32_1 = arith.constant 0 : i32
    %c0_i32_2 = arith.constant 0 : i32
    return %c0_i32, %c0_i32_0, %c0_i32_1 : i32, i32, i32
  }
  func.func @transform_13(%arg0: i32) -> (i32, i32, i32) {
    %c0_i32 = arith.constant 0 : i32
    %c0_i32_0 = arith.constant 0 : i32
    %c0_i32_1 = arith.constant 0 : i32
    %c0_i32_2 = arith.constant 0 : i32
    return %c0_i32, %c0_i32_0, %c0_i32_1 : i32, i32, i32
  }
  func.func @transform_14(%arg0: i32) -> (i32, i32, i32) {
    %c0_i32 = arith.constant 0 : i32
    %c0_i32_0 = arith.constant 0 : i32
    %c0_i32_1 = arith.constant 0 : i32
    %c0_i32_2 = arith.constant 0 : i32
    return %c0_i32, %c0_i32_0, %c0_i32_1 : i32, i32, i32
  }
  func.func @transform_15(%arg0: i32) -> (i32, i32, i32) {
    %c0_i32 = arith.constant 0 : i32
    %c0_i32_0 = arith.constant 0 : i32
    %c0_i32_1 = arith.constant 0 : i32
    %c0_i32_2 = arith.constant 0 : i32
    return %c0_i32, %c0_i32_0, %c0_i32_1 : i32, i32, i32
  }
  func.func @transform_16(%arg0: i32) -> (i32, i32, i32) {
    %c0_i32 = arith.constant 0 : i32
    %c0_i32_0 = arith.constant 0 : i32
    %c0_i32_1 = arith.constant 0 : i32
    %c0_i32_2 = arith.constant 0 : i32
    return %c0_i32, %c0_i32_0, %c0_i32_1 : i32, i32, i32
  }
  func.func @transform_17(%arg0: i32) -> (i32, i32, i32) {
    %c0_i32 = arith.constant 0 : i32
    %c0_i32_0 = arith.constant 0 : i32
    %c0_i32_1 = arith.constant 0 : i32
    %c0_i32_2 = arith.constant 0 : i32
    return %c0_i32, %c0_i32_0, %c0_i32_1 : i32, i32, i32
  }
  func.func @transform_18(%arg0: i32) -> (i32, i32, i32) {
    %c0_i32 = arith.constant 0 : i32
    %c0_i32_0 = arith.constant 0 : i32
    %c0_i32_1 = arith.constant 0 : i32
    %c0_i32_2 = arith.constant 0 : i32
    return %c0_i32, %c0_i32_0, %c0_i32_1 : i32, i32, i32
  }
  func.func @transform_19(%arg0: i32) -> (i32, i32, i32) {
    %c0_i32 = arith.constant 0 : i32
    %c0_i32_0 = arith.constant 0 : i32
    %c0_i32_1 = arith.constant 0 : i32
    %c0_i32_2 = arith.constant 0 : i32
    return %c0_i32, %c0_i32_0, %c0_i32_1 : i32, i32, i32
  }
  func.func @transform_20(%arg0: i32) -> (i32, i32, i32) {
    %c0_i32 = arith.constant 0 : i32
    %c0_i32_0 = arith.constant 0 : i32
    %c0_i32_1 = arith.constant 0 : i32
    %c0_i32_2 = arith.constant 0 : i32
    return %c0_i32, %c0_i32_0, %c0_i32_1 : i32, i32, i32
  }
  func.func @transform_21(%arg0: i32) -> (i32, i32, i32) {
    %c0_i32 = arith.constant 0 : i32
    %c0_i32_0 = arith.constant 0 : i32
    %c0_i32_1 = arith.constant 0 : i32
    %c0_i32_2 = arith.constant 0 : i32
    return %c0_i32, %c0_i32_0, %c0_i32_1 : i32, i32, i32
  }
  func.func @transform_22(%arg0: i32) -> (i32, i32, i32) {
    %c0_i32 = arith.constant 0 : i32
    %c0_i32_0 = arith.constant 0 : i32
    %c0_i32_1 = arith.constant 0 : i32
    %c0_i32_2 = arith.constant 0 : i32
    return %c0_i32, %c0_i32_0, %c0_i32_1 : i32, i32, i32
  }
}

</mosaic_0001>

<bundles_post_ra>
// kernel: tpu_custom_call.1
= control target key start
LH: loop header
LB: loop body
LE: loop exit
PB: predicated region body
PF: predicated region fallthrough
CT: control target
= control target key end

     0   :  { %s11060_s0 = inlined_call_operand.hbm [shape: f32[2,8,32], index: 0, kind: input, shape index: {}]   ;;  %s11061_s1 = inlined_call_operand.hbm [shape: f32[2,8,32], index: 1, kind: input, shape index: {}]   ;;  %s11062_s2 = inlined_call_operand.vmem [shape: f32[2,32,96], index: 2, kind: input, shape index: {}]   ;;  %s11063_s3 = inlined_call_operand.vmem [shape: f32[2,1,96], index: 3, kind: input, shape index: {}]   ;;  %s11064_s4 = inlined_call_operand.vmem [shape: f32[2,4,8,32], index: 4, kind: input, shape index: {}]   ;;  %s11065_s5 = inlined_call_operand.vmem [shape: f32[2,1,32], index: 5, kind: input, shape index: {}]   ;;  %s11066_s6 = inlined_call_operand.vmem [shape: f32[2,32,32], index: 6, kind: input, shape index: {}]   ;;  %s11067_s7 = inlined_call_operand.vmem [shape: f32[2,1,32], index: 7, kind: input, shape index: {}]   ;;  %s11068_s8 = inlined_call_operand.vmem [shape: f32[2,32,64], index: 8, kind: input, shape index: {}]   ;;  %s11069_s9 = inlined_call_operand.vmem [shape: f32[2,1,64], index: 9, kind: input, shape index: {}]   ;;  %s11070_s10 = inlined_call_operand.vmem [shape: f32[2,4,8,32], index: 10, kind: input, shape index: {}]   ;;  %s11071_s11 = inlined_call_operand.vmem [shape: f32[2,1,32], index: 11, kind: input, shape index: {}]   ;;  %s11072_s12 = inlined_call_operand.hbm [shape: f32[2,1,32], index: 12, kind: input, shape index: {}]   ;;  %s11073_s13 = inlined_call_operand.hbm [shape: f32[2,1,32], index: 13, kind: input, shape index: {}]   ;;  %s11074_s14 = inlined_call_operand.hbm [shape: f32[2,1,32], index: 14, kind: input, shape index: {}]   ;;  %s11075_s15 = inlined_call_operand.hbm [shape: f32[2,1,32], index: 15, kind: input, shape index: {}]   ;;  %s11076_s16 = inlined_call_operand.hbm [shape: f32[2,1,32], index: 16, kind: input, shape index: {}]   ;;  %s11077_s17 = inlined_call_operand.hbm [shape: f32[2,1,32], index: 17, kind: input, shape index: {}]   ;;  %s11078_s18 = inlined_call_operand.hbm [shape: f32[2,32,128], index: 18, kind: input, shape index: {}]   ;;  %s11079_s19 = inlined_call_operand.hbm [shape: f32[2,1,128], index: 19, kind: input, shape index: {}]   ;;  %s11080_s20 = inlined_call_operand.vmem [shape: f32[2,128,32], index: 20, kind: input, shape index: {}]   ;;  %s11081_s21 = inlined_call_operand.hbm [shape: f32[2,1,32], index: 21, kind: input, shape index: {}]   ;;  %s11082_s22 = inlined_call_operand.hbm [shape: f32[2,8,32], index: 22, kind: output, shape index: {}]  }
   0x1   :  { %11096 = sst [smem:[#allocation28_spill]] %s11060_s0 }
   0x2   :  { %11097 = sst [smem:[#allocation29_spill]] %s11061_s1 }
   0x3   :  { %11098 = sst [smem:[#allocation30_spill]] %s11062_s2 }
   0x4   :  { %11099 = sst [smem:[#allocation31_spill]] %s11063_s3 }
   0x5   :  { %11100 = sst [smem:[#allocation32_spill]] %s11064_s4 }
   0x6   :  { %11101 = sst [smem:[#allocation33_spill]] %s11065_s5 }
   0x7   :  { %11102 = sst [smem:[#allocation34_spill]] %s11066_s6 }
   0x8   :  { %11103 = sst [smem:[#allocation35_spill]] %s11080_s20 }
   0x9   :  { %11104 = sst [smem:[#allocation36_spill]] %s11082_s22 }
   0xa   :  { %27 = vsyncpa [#allocation3], 0 }
   0xb   :  { %28 = vsyncpa [#allocation6], 0 }
   0xc   :  { %29 = vsyncpa [#allocation9], 0 }
   0xd   :  { %30 = vsyncpa [#allocation12], 0 }
   0xe   :  { %31 = vsyncpa [#allocation15], 0 }
   0xf   :  { %32 = vsyncpa [#allocation18], 0 }
  0x10   :  { %33 = vsyncpa [#allocation4], 0  ;;  %s9784_s3 = smov [#allocation5]   ;;  %s11105_s4 = sld [smem:[#allocation29_spill]] }
  0x11   :  { %s51_s28 = sshll.u32 %s9784_s3, 4  ;;  %s52_s28 = int_to_ptr.vmem [resolvable:$true] %s51_s28 }
  0x16   :  { %s9506_s0 = scalar_lea.hbm %s11105_s4, 256 }
  0x17   :  { %p9507_p0 = scmp.ne.s32.totalorder %s11105_s4, %s9506_s0  ;;  %p9510_p1 = scmp.lt.u32.totalorder %s9506_s0, %s11105_s4 }
  0x19   :  { %p9512_p2 = pnand %p9510_p1, %p9507_p0 }
  0x1b   :  { %9515 = shalt.err (!%p9512_p2)
}
  0x1c   :  { %s9516_s6 = scalar_lea.vmem %s52_s28, 256  ;;  %p9521_p4 = scmp.lt.s32.totalorder %s52_s28, %s52_s28 }
  0x1d   :  { %p9517_p3 = scmp.ne.s32.totalorder %s52_s28, %s9516_s6  ;;  %p9522_p5 = scmp.lt.s32.totalorder %s9516_s6, %s9516_s6 }
  0x1f   :  { %p9523_p6 = por %p9522_p5, %p9521_p4 }
  0x21   :  { %p9524_p7 = pnand %p9523_p6, %p9517_p3 }
  0x23   :  { %9527 = shalt.err (!%p9524_p7)
}
  0x24   :  { %s11092_s25 = smov 128   ;;  %s11093_s26 = smov 8  }
  0x25   :  { %57 = dma.hbm_to_vmem [thread:$0]  %s11105_s4, 256, %s52_s28, [#allocation6], %s11092_s25, %s11092_s25, %s11093_s26  }
  0x26   :  { %s9787_s3 = smov [#allocation8]   ;;  %s9788_s30 = smov [#allocation11]  }
  0x27   :  { %s95_s29 = sshll.u32 %s9787_s3, 4  ;;  %s119_s0 = sshll.u32 %s9788_s30, 4  ;;  %s96_s29 = int_to_ptr.vmem [resolvable:$true] %s95_s29  ;;  %s120_s0 = int_to_ptr.vmem [resolvable:$true] %s119_s0 }
  0x28   :  { %s9528_s5 = scalar_lea.hbm %s11073_s13, 32 }
  0x29   :  { %p9529_p8 = scmp.ne.s32.totalorder %s11073_s13, %s9528_s5  ;;  %p9532_p9 = scmp.lt.u32.totalorder %s9528_s5, %s11073_s13 }
  0x2b   :  { %p9534_p10 = pnand %p9532_p9, %p9529_p8 }
  0x2d   :  { %9537 = shalt.err (!%p9534_p10)
}
  0x2e   :  { %s9538_s28 = scalar_lea.vmem %s96_s29, 32  ;;  %p9543_p12 = scmp.lt.s32.totalorder %s96_s29, %s96_s29 }
  0x2f   :  { %p9539_p11 = scmp.ne.s32.totalorder %s96_s29, %s9538_s28  ;;  %p9544_p13 = scmp.lt.s32.totalorder %s9538_s28, %s9538_s28 }
  0x31   :  { %p9545_p0 = por %p9544_p13, %p9543_p12 }
  0x33   :  { %p9546_p1 = pnand %p9545_p0, %p9539_p11 }
  0x35   :  { %9549 = shalt.err (!%p9546_p1)
}
  0x36   :  { %s9789_s4 = smov 16   ;;  %s9790_s2 = smov 1  }
  0x37   :  { %101 = dma.hbm_to_vmem [thread:$0]  %s11073_s13, 32, %s96_s29, [#allocation9], %s9789_s4, %s9789_s4, %s9790_s2  }
  0x38   :  { %s9550_s30 = scalar_lea.hbm %s11075_s15, 32 }
  0x39   :  { %p9551_p2 = scmp.ne.s32.totalorder %s11075_s15, %s9550_s30  ;;  %p9554_p3 = scmp.lt.u32.totalorder %s9550_s30, %s11075_s15 }
  0x3b   :  { %p9556_p4 = pnand %p9554_p3, %p9551_p2 }
  0x3d   :  { %9559 = shalt.err (!%p9556_p4)
}
  0x3e   :  { %s9560_s6 = scalar_lea.vmem %s120_s0, 32  ;;  %p9565_p6 = scmp.lt.s32.totalorder %s120_s0, %s120_s0 }
  0x3f   :  { %p9561_p5 = scmp.ne.s32.totalorder %s120_s0, %s9560_s6  ;;  %p9566_p7 = scmp.lt.s32.totalorder %s9560_s6, %s9560_s6 }
  0x41   :  { %p9567_p8 = por %p9566_p7, %p9565_p6 }
  0x43   :  { %p9568_p9 = pnand %p9567_p8, %p9561_p5 }
  0x45   :  { %9571 = shalt.err (!%p9568_p9)
}
  0x46   :  { %125 = dma.hbm_to_vmem [thread:$0]  %s11075_s15, 32, %s120_s0, [#allocation12], %s9789_s4, %s9789_s4, %s9790_s2  }
  0x47   :  { %s9791_s28 = smov [#allocation14]   ;;  %s9792_s3 = smov [#allocation17]  }
  0x48   :  { %s143_s27 = sshll.u32 %s9791_s28, 4  ;;  %s167_s20 = sshll.u32 %s9792_s3, 4  ;;  %s144_s27 = int_to_ptr.vmem [resolvable:$true] %s143_s27  ;;  %s168_s20 = int_to_ptr.vmem [resolvable:$true] %s167_s20 }
  0x49   :  { %s9572_s23 = scalar_lea.hbm %s11077_s17, 32 }
  0x4a   :  { %p9573_p10 = scmp.ne.s32.totalorder %s11077_s17, %s9572_s23  ;;  %p9576_p11 = scmp.lt.u32.totalorder %s9572_s23, %s11077_s17 }
  0x4c   :  { %p9578_p12 = pnand %p9576_p11, %p9573_p10 }
  0x4e   :  { %9581 = shalt.err (!%p9578_p12)
}
  0x4f   :  { %s9582_s15 = scalar_lea.vmem %s144_s27, 32  ;;  %p9587_p0 = scmp.lt.s32.totalorder %s144_s27, %s144_s27 }
  0x50   :  { %p9583_p13 = scmp.ne.s32.totalorder %s144_s27, %s9582_s15  ;;  %p9588_p1 = scmp.lt.s32.totalorder %s9582_s15, %s9582_s15 }
  0x52   :  { %p9589_p2 = por %p9588_p1, %p9587_p0 }
  0x54   :  { %p9590_p3 = pnand %p9589_p2, %p9583_p13 }
  0x56   :  { %9593 = shalt.err (!%p9590_p3)
}
  0x57   :  { %149 = dma.hbm_to_vmem [thread:$0]  %s11077_s17, 32, %s144_s27, [#allocation15], %s9789_s4, %s9789_s4, %s9790_s2  }
  0x58   :  { %s9594_s3 = scalar_lea.hbm %s11079_s19, 32 }
  0x59   :  { %p9595_p4 = scmp.ne.s32.totalorder %s11079_s19, %s9594_s3  ;;  %p9598_p5 = scmp.lt.u32.totalorder %s9594_s3, %s11079_s19 }
  0x5b   :  { %p9600_p6 = pnand %p9598_p5, %p9595_p4 }
  0x5d   :  { %9603 = shalt.err (!%p9600_p6)
}
  0x5e   :  { %s9604_s5 = scalar_lea.vmem %s168_s20, 32  ;;  %p9609_p8 = scmp.lt.s32.totalorder %s168_s20, %s168_s20 }
  0x5f   :  { %p9605_p7 = scmp.ne.s32.totalorder %s168_s20, %s9604_s5  ;;  %p9610_p9 = scmp.lt.s32.totalorder %s9604_s5, %s9604_s5 }
  0x61   :  { %p9611_p10 = por %p9610_p9, %p9609_p8 }
  0x63   :  { %p9612_p11 = pnand %p9611_p10, %p9605_p7 }
  0x65   :  { %9615 = shalt.err (!%p9612_p11)
}
  0x66   :  { %173 = dma.hbm_to_vmem [thread:$0]  %s11079_s19, 32, %s168_s20, [#allocation18], %s9789_s4, %s9789_s4, %s9790_s2  }
  0x67   :  { %s9793_s24 = smov [#allocation2]   ;;  %s9794_s15 = smov [#allocation7]  }
  0x68   :  { %s39_s6 = sshll.u32 %s9793_s24, 4  ;;  %s83_s0 = sshll.u32 %s9794_s15, 4  ;;  %s40_s6 = int_to_ptr.vmem [resolvable:$true] %s39_s6  ;;  %s84_s0 = int_to_ptr.vmem [resolvable:$true] %s83_s0 }
  0x69   :  { %s11106_s28 = sld [smem:[#allocation28_spill]] }
  0x6f   :  { %s9616_s3 = scalar_lea.hbm %s11106_s28, 256 }
  0x70   :  { %p9617_p12 = scmp.ne.s32.totalorder %s11106_s28, %s9616_s3  ;;  %p9620_p13 = scmp.lt.u32.totalorder %s9616_s3, %s11106_s28 }
  0x72   :  { %p9622_p0 = pnand %p9620_p13, %p9617_p12 }
  0x74   :  { %9625 = shalt.err (!%p9622_p0)
}
  0x75   :  { %s9626_s19 = scalar_lea.vmem %s40_s6, 256  ;;  %p9631_p2 = scmp.lt.s32.totalorder %s40_s6, %s40_s6 }
  0x76   :  { %p9627_p1 = scmp.ne.s32.totalorder %s40_s6, %s9626_s19  ;;  %p9632_p3 = scmp.lt.s32.totalorder %s9626_s19, %s9626_s19 }
  0x78   :  { %p9633_p4 = por %p9632_p3, %p9631_p2 }
  0x7a   :  { %p9634_p5 = pnand %p9633_p4, %p9627_p1 }
  0x7c   :  { %9637 = shalt.err (!%p9634_p5)
}
  0x7d   :  { %45 = dma.hbm_to_vmem [thread:$0]  %s11106_s28, 256, %s40_s6, [#allocation3], %s11092_s25, %s11092_s25, %s11093_s26  }
  0x7e   :  { %s9638_s24 = scalar_lea.hbm %s11072_s12, 32 }
  0x7f   :  { %p9639_p6 = scmp.ne.s32.totalorder %s11072_s12, %s9638_s24  ;;  %p9642_p7 = scmp.lt.u32.totalorder %s9638_s24, %s11072_s12 }
  0x81   :  { %p9644_p8 = pnand %p9642_p7, %p9639_p6 }
  0x83   :  { %9647 = shalt.err (!%p9644_p8)
}
  0x84   :  { %s9648_s22 = scalar_lea.vmem %s84_s0, 32  ;;  %p9653_p10 = scmp.lt.s32.totalorder %s84_s0, %s84_s0 }
  0x85   :  { %p9649_p9 = scmp.ne.s32.totalorder %s84_s0, %s9648_s22  ;;  %p9654_p11 = scmp.lt.s32.totalorder %s9648_s22, %s9648_s22 }
  0x87   :  { %p9655_p12 = por %p9654_p11, %p9653_p10 }
  0x89   :  { %p9656_p13 = pnand %p9655_p12, %p9649_p9 }
  0x8b   :  { %9659 = shalt.err (!%p9656_p13)
}
  0x8c   :  { %89 = dma.hbm_to_vmem [thread:$0]  %s11072_s12, 32, %s84_s0, [#allocation6], %s9789_s4, %s9789_s4, %s9790_s2  }
  0x8d   :  { %s9795_s30 = smov [#allocation10]   ;;  %s9796_s1 = smov [#allocation13]  }
  0x8e   :  { %s107_s23 = sshll.u32 %s9795_s30, 4  ;;  %s131_s19 = sshll.u32 %s9796_s1, 4  ;;  %s108_s23 = int_to_ptr.vmem [resolvable:$true] %s107_s23  ;;  %s132_s19 = int_to_ptr.vmem [resolvable:$true] %s131_s19 }
  0x8f   :  { %s9660_s17 = scalar_lea.hbm %s11074_s14, 32 }
  0x90   :  { %p9661_p0 = scmp.ne.s32.totalorder %s11074_s14, %s9660_s17  ;;  %p9664_p1 = scmp.lt.u32.totalorder %s9660_s17, %s11074_s14 }
  0x92   :  { %p9666_p2 = pnand %p9664_p1, %p9661_p0 }
  0x94   :  { %9669 = shalt.err (!%p9666_p2)
}
  0x95   :  { %s9670_s12 = scalar_lea.vmem %s108_s23, 32  ;;  %p9675_p4 = scmp.lt.s32.totalorder %s108_s23, %s108_s23 }
  0x96   :  { %p9671_p3 = scmp.ne.s32.totalorder %s108_s23, %s9670_s12  ;;  %p9676_p5 = scmp.lt.s32.totalorder %s9670_s12, %s9670_s12 }
  0x98   :  { %p9677_p6 = por %p9676_p5, %p9675_p4 }
  0x9a   :  { %p9678_p7 = pnand %p9677_p6, %p9671_p3 }
  0x9c   :  { %9681 = shalt.err (!%p9678_p7)
}
  0x9d   :  { %113 = dma.hbm_to_vmem [thread:$0]  %s11074_s14, 32, %s108_s23, [#allocation9], %s9789_s4, %s9789_s4, %s9790_s2  }
  0x9e   :  { %s9682_s6 = scalar_lea.hbm %s11076_s16, 32 }
  0x9f   :  { %p9683_p8 = scmp.ne.s32.totalorder %s11076_s16, %s9682_s6  ;;  %p9686_p9 = scmp.lt.u32.totalorder %s9682_s6, %s11076_s16 }
  0xa1   :  { %p9688_p10 = pnand %p9686_p9, %p9683_p8 }
  0xa3   :  { %9691 = shalt.err (!%p9688_p10)
}
  0xa4   :  { %s9692_s5 = scalar_lea.vmem %s132_s19, 32  ;;  %p9697_p12 = scmp.lt.s32.totalorder %s132_s19, %s132_s19 }
  0xa5   :  { %p9693_p11 = scmp.ne.s32.totalorder %s132_s19, %s9692_s5  ;;  %p9698_p13 = scmp.lt.s32.totalorder %s9692_s5, %s9692_s5 }
  0xa7   :  { %p9699_p0 = por %p9698_p13, %p9697_p12 }
  0xa9   :  { %p9700_p1 = pnand %p9699_p0, %p9693_p11 }
  0xab   :  { %9703 = shalt.err (!%p9700_p1)
}
  0xac   :  { %137 = dma.hbm_to_vmem [thread:$0]  %s11076_s16, 32, %s132_s19, [#allocation12], %s9789_s4, %s9789_s4, %s9790_s2  }
  0xad   :  { %s9797_s17 = smov [#allocation16]   ;;  %s9798_s24 = smov [#allocation19]  }
  0xae   :  { %s155_s27 = sshll.u32 %s9797_s17, 4  ;;  %s181_s15 = sshll.u32 %s9798_s24, 4  ;;  %s156_s27 = int_to_ptr.vmem [resolvable:$true] %s155_s27  ;;  %s182_s15 = int_to_ptr.vmem [resolvable:$true] %s181_s15 }
  0xaf   :  { %s9704_s0 = scalar_lea.hbm %s11078_s18, 1024 }
  0xb0   :  { %p9705_p2 = scmp.ne.s32.totalorder %s11078_s18, %s9704_s0  ;;  %p9708_p3 = scmp.lt.u32.totalorder %s9704_s0, %s11078_s18 }
  0xb2   :  { %p9710_p4 = pnand %p9708_p3, %p9705_p2 }
  0xb4   :  { %9713 = shalt.err (!%p9710_p4)
}
  0xb5   :  { %s9714_s16 = scalar_lea.vmem %s156_s27, 1024  ;;  %p9719_p6 = scmp.lt.s32.totalorder %s156_s27, %s156_s27 }
  0xb6   :  { %p9715_p5 = scmp.ne.s32.totalorder %s156_s27, %s9714_s16  ;;  %p9720_p7 = scmp.lt.s32.totalorder %s9714_s16, %s9714_s16 }
  0xb8   :  { %p9721_p8 = por %p9720_p7, %p9719_p6 }
  0xba   :  { %p9722_p9 = pnand %p9721_p8, %p9715_p5 }
  0xbc   :  { %9725 = shalt.err (!%p9722_p9)
}
  0xbd   :  { %161 = dma.hbm_to_vmem [thread:$0]  %s11078_s18, 1024, %s156_s27, [#allocation15], %s11092_s25, %s11092_s25, %s11093_s26  }
  0xbe   :  { %s9726_s20 = scalar_lea.hbm %s11081_s21, 32 }
  0xbf   :  { %p9727_p10 = scmp.ne.s32.totalorder %s11081_s21, %s9726_s20  ;;  %p9730_p11 = scmp.lt.u32.totalorder %s9726_s20, %s11081_s21 }
  0xc1   :  { %p9732_p12 = pnand %p9730_p11, %p9727_p10 }
  0xc3   :  { %9735 = shalt.err (!%p9732_p12)
}
  0xc4   :  { %s9736_s24 = scalar_lea.vmem %s182_s15, 32  ;;  %p9741_p0 = scmp.lt.s32.totalorder %s182_s15, %s182_s15 }
  0xc5   :  { %p9737_p13 = scmp.ne.s32.totalorder %s182_s15, %s9736_s24  ;;  %p9742_p1 = scmp.lt.s32.totalorder %s9736_s24, %s9736_s24 }
  0xc7   :  { %p9743_p2 = por %p9742_p1, %p9741_p0 }
  0xc9   :  { %p9744_p3 = pnand %p9743_p2, %p9737_p13 }
  0xcb   :  { %9747 = shalt.err (!%p9744_p3)
}
  0xcc   :  { %187 = dma.hbm_to_vmem [thread:$0]  %s11081_s21, 32, %s182_s15, [#allocation18], %s9789_s4, %s9789_s4, %s9790_s2  }
  0xcd   :  { %9770 = dma.done.wait [#allocation3], 256  }
  0xce   :  { %9771 = vsyncadd [#allocation3], 4294967040 }
  0xcf   :  { %9772 = dma.done.wait [#allocation6], 288  }
  0xd0   :  { %9773 = vsyncadd [#allocation6], 4294967008 }
  0xd1   :  { %9774 = dma.done.wait [#allocation9], 64  }
  0xd2   :  { %9775 = vsyncadd [#allocation9], 4294967232 }
  0xd3   :  { %9776 = dma.done.wait [#allocation12], 64  }
  0xd4   :  { %9777 = vsyncadd [#allocation12], 4294967232 }
  0xd5   :  { %9778 = dma.done.wait [#allocation15], 1056  }
  0xd6   :  { %9779 = vsyncadd [#allocation15], 4294966240 }
  0xd7   :  { %9780 = dma.done.wait [#allocation18], 64  }
  0xd8   :  { %9781 = vsyncadd [#allocation18], 4294967232  ;;  %vm236_vm0 = vcmask 261120   ;;  %s11107_s0 = sld [smem:[#allocation30_spill]]  ;;  %v10105_v5 = vld [vmem:[#allocation2] sm:$0xff]  ;;  %v10109_v7 = vld [vmem:[#allocation2 + $0x8] sm:$0xff] }
  0xd9   :  { %8621 = vmatprep.mubr.msk.f32.mxu1 %vm236_vm0, %v10105_v5  ;;  %v9799_v8 = vmov 0.0   ;;  %vm9800_vm1 = vmmov 0   ;;  %s11108_s16 = sld [smem:[#allocation31_spill]]  ;;  %s9801_s19 = smov 96   ;;  %vm326_vm2 = vcmask 64512  }
  0xda   :  { %8634 = vmatprep.subr.mxu0 %v9799_v8  ;;  %8636 = vmatprep.mubr.msk.f32.mxu0 %vm9800_vm1, %v9799_v8  ;;  %s9802_s28 = smov 64   ;;  %s9803_s30 = smov 120  }
  0xdb   :  { %s9804_s1 = smov 88   ;;  %s9805_s20 = smov 80  }
  0xdc   :  { %s9806_s5 = smov 56   ;;  %s9807_s14 = smov 112  }
  0xdd   :  { %s9808_s23 = smov 48   ;;  %s9809_s17 = smov 72  }
  0xde   :  { %v225_v0 = vld [vmem:[%s11107_s0] sm:$0xff]  ;;  %v226_v1 = vld [vmem:[%s11107_s0 + $0x8] sm:$0xff]  ;;  %v227_v2 = vld [vmem:[%s11107_s0 + $0x10] sm:$0xff]  ;;  %s9810_s24 = smov 104   ;;  %s11109_s13 = sld [smem:[#allocation32_spill]] }
  0xdf   :  { %v9171_v3 = vpack.c.bf16 %v226_v1, %v225_v0  ;;  %v228_v4 = vld [vmem:[%s11107_s0 + $0x18] sm:$0xff]  ;;  %v8142_v9 = vld [vmem:[%s11108_s16] ss:$0 sm:$0xff]  ;;  %s11094_s4 = smov 40   ;;  %s11110_s18 = sld [smem:[#allocation33_spill]] }
  0xe0   :  { %v9175_v6 = vpack.c.bf16 %v228_v4, %v227_v2  ;;  %s11111_s29 = sld [smem:[#allocation34_spill]]  ;;  %s11112_s27 = sld [smem:[#allocation35_spill]] }
  0xe1   :  { %9172 = vmatprep.subr.bf16.mxu1 %v9171_v3 }
  0xe2   :  { %9174 = vmatpush3.bf16.msra.mxu1 %v9171_v3 }
  0xe3   :  { %9176 = vmatprep.subr.bf16.mxu1 %v9175_v6 }
  0xe6   :  { %9178 = vmatpush3.bf16.msra.mxu1 %v9175_v6 }
  0xe7   :  { %8624 = vmatprep.subr.mxu1 %v9799_v8 }
  0xe9   :  { %8622 = vmatmul.mubr.msk.f32.vlgmr.msra.gmra.mrb[0].mxu1 %vm236_vm0, %v10109_v7 }
  0xea   :  { %8626 = vmatprep.mubr.msk.f32.mxu1 %vm9800_vm1, %v9799_v8 }
 0x1bc   :  { %v8623_v10 = vpop.f32.mrb[0].mxu1 }
 0x1bd   :  { %v309_v11 = vpop.f32.mrb[1].mxu1  ;;  %v10126_v13 = vadd.f32 %v8623_v10, %v8142_v9 }
 0x1be   :  { %v10122_v12 = vadd.f32 %v8142_v9, %v309_v11 }
 0x1c0   :  { %324 = vrot.lane.b32.xlu0 %v10122_v12, %s9801_s19 }
 0x1c4   :  { %402 = vrot.lane.b32.xlu0 %v10126_v13, %s9801_s19 }
 0x1c8   :  { %578 = vrot.lane.b32.xlu0 %v10126_v13, %s9802_s28 }
 0x1cc   :  { %732 = vrot.lane.b32.xlu0 %v10126_v13, %s9803_s30 }
 0x232   :  { %v325_v14 = vpop.permute.xlu0 %324 }
 0x233   :  { %8625 = vmatpush3.xpose.msk.msra.mxu1 %vm326_vm2, %v325_v14 }
 0x234   :  { %8629 = vmatprep.subr.mxu1 %v9799_v8 }
 0x236   :  { %8627 = vmatmul.mubr.msk.f32.vlgmr.msra.gmra.mrb[2].mxu1 %vm326_vm2, %v10122_v12  ;;  %v403_v15 = vpop.permute.xlu0 %402 }
 0x237   :  { %8630 = vmatpush3.xpose.msk.msra.mxu1 %vm326_vm2, %v403_v15  ;;  %8631 = vmatprep.mubr.msk.f32.mxu1 %vm9800_vm1, %v9799_v8 }
 0x238   :  { %8639 = vmatprep.subr.mxu1 %v9799_v8 }
 0x23a   :  { %8632 = vmatmul.mubr.msk.f32.vlgmr.msra.gmra.mrb[4].mxu1 %vm326_vm2, %v10126_v13  ;;  %v579_v16 = vpop.permute.xlu0 %578 }
 0x23b   :  { %8640 = vmatpush3.msra.mxu1 %v579_v16  ;;  %8641 = vmatprep.mubr.msk.f32.mxu1 %vm9800_vm1, %v9799_v8 }
 0x23c   :  { %8649 = vmatprep.subr.mxu1 %v9799_v8 }
 0x23e   :  { %v733_v25 = vpop.permute.xlu0 %732 }
 0x309   :  { %v397_v17 = vpop.f32.mrb[2].mxu1 }
 0x30a   :  { %v478_v18 = vmul.f32 0.35355338, %v397_v17  ;;  %v8628_v19 = vpop.f32.mrb[3].mxu1 }
 0x30c   :  { %v480_v20 = vsel %vm326_vm2, %v478_v18, -inf }
 0x30d   :  { %481 = vmax.xlane.f32.xlu0 %v480_v20  ;;  %v474_v21 = vpop.f32.mrb[4].mxu1 }
 0x30e   :  { %v479_v22 = vmul.f32 0.35355338, %v474_v21  ;;  %v8633_v23 = vpop.f32.mrb[5].mxu1  ;;  %v319_v21 = vld [vmem:[%s11109_s13 + $0x8] sm:$0xff] }
 0x310   :  { %v483_v24 = vsel %vm326_vm2, %v479_v22, -inf }
 0x311   :  { %484 = vmax.xlane.f32.xlu1 %v483_v24 }
 0x323   :  { %502 = vrot.lane.b32.xlu0 %v10122_v12, %s9802_s28 }
 0x327   :  { %654 = vrot.lane.b32.xlu0 %v10122_v12, %s9803_s30 }
 0x39a   :  { %v482_v26 = vpop.xlane.xlu0 %481 }
 0x39b   :  { %v486_v33 = vsub.f32 %v478_v18, %v482_v26 }
 0x39d   :  { %v488_v34 = vmul.f32 1.442695, %v486_v33 }
 0x39e   :  { %v485_v27 = vpop.xlane.xlu1 %484  ;;  %v503_v28 = vpop.permute.xlu0 %502 }
 0x39f   :  { %v487_v29 = vsub.f32 %v479_v22, %v485_v27  ;;  %8635 = vmatpush3.msra.mxu0 %v503_v28  ;;  %v318_v22 = vld [vmem:[%s11109_s13] sm:$0xff] }
 0x3a0   :  { %8644 = vmatprep.subr.mxu0 %v9799_v8 }
 0x3a1   :  { %v490_v30 = vmul.f32 1.442695, %v487_v29 }
 0x3a2   :  { %v655_v45 = vpop.permute.xlu0 %654 }
 0x3a3   :  { %9352 = vpow2.f32 %v490_v30 }
 0x3a4   :  { %9354 = vpow2.f32 %v488_v34 }
 0x3ad   :  { %v9353_v31 = vpop.eup %9352 }
 0x3ae   :  { %v495_v32 = vsel %vm326_vm2, %v9353_v31, 0.0  ;;  %v9355_v35 = vpop.eup %9354 }
 0x3af   :  { %496 = vadd.xlane.f32.xlu1 %v495_v32  ;;  %v492_v36 = vsel %vm326_vm2, %v9355_v35, 0.0 }
 0x3c0   :  { %734 = vrot.lane.b32.xlu1 %v10126_v13, %s9804_s1 }
 0x3e4   :  { %493 = vadd.xlane.f32.xlu1 %v492_v36 }
 0x3f5   :  { %656 = vrot.lane.b32.xlu1 %v10122_v12, %s9804_s1 }
 0x3f9   :  { %1150 = vrot.lane.b32.xlu1 %v10122_v12, %s9805_s20 }
 0x43c   :  { %v497_v37 = vpop.xlane.xlu1 %496 }
 0x43d   :  { %9356 = vrcp.f32 %v497_v37 }
 0x440   :  { %v735_v40 = vpop.permute.xlu1 %734 }
 0x447   :  { %v9357_v38 = vpop.eup %9356 }
 0x448   :  { %v501_v39 = vmul.f32 %v9357_v38, %v9353_v31 }
 0x44a   :  { %8642 = vmatmul.mubr.msk.f32.vlgmr.msra.gmra.mrb[6].mxu1 %vm326_vm2, %v501_v39 }
 0x44b   :  { %8650 = vmatpush3.xpose.msk.msra.mxu1 %vm326_vm2, %v735_v40  ;;  %8651 = vmatprep.mubr.msk.f32.mxu1 %vm9800_vm1, %v9799_v8 }
 0x44c   :  { %8659 = vmatprep.subr.mxu1 %v9799_v8 }
 0x44e   :  { %8652 = vmatmul.mubr.msk.f32.vlgmr.msra.gmra.mrb[8].mxu1 %vm326_vm2, %v733_v25 }
 0x44f   :  { %8661 = vmatprep.mubr.msk.f32.mxu1 %vm9800_vm1, %v9799_v8 }
 0x471   :  { %v494_v41 = vpop.xlane.xlu1 %493 }
 0x472   :  { %9358 = vrcp.f32 %v494_v41 }
 0x475   :  { %v657_v44 = vpop.permute.xlu1 %656 }
 0x479   :  { %v1151_v11 = vpop.permute.xlu1 %1150 }
 0x47c   :  { %v9359_v42 = vpop.eup %9358 }
 0x47d   :  { %v500_v43 = vmul.f32 %v9359_v42, %v9355_v35 }
 0x47f   :  { %8637 = vmatmul.mubr.msk.f32.vlgmr.msra.gmra.mrb[0].mxu0 %vm326_vm2, %v500_v43 }
 0x480   :  { %8645 = vmatpush3.xpose.msk.msra.mxu0 %vm326_vm2, %v657_v44  ;;  %8646 = vmatprep.mubr.msk.f32.mxu0 %vm9800_vm1, %v9799_v8 }
 0x481   :  { %8654 = vmatprep.subr.mxu0 %v9799_v8 }
 0x483   :  { %8647 = vmatmul.mubr.msk.f32.vlgmr.msra.gmra.mrb[2].mxu0 %vm326_vm2, %v655_v45 }
 0x484   :  { %8656 = vmatprep.mubr.msk.f32.mxu0 %vm9800_vm1, %v9799_v8 }
 0x51d   :  { %v10178_v46 = vpop.f32.mrb[6].mxu1 }
 0x51e   :  { %v8643_v47 = vpop.f32.mrb[7].mxu1 }
 0x521   :  { %v806_v48 = vpop.f32.mrb[8].mxu1 }
 0x522   :  { %v811_v49 = vmul.f32 0.35355338, %v806_v48  ;;  %v8653_v50 = vpop.f32.mrb[9].mxu1 }
 0x524   :  { %v815_v51 = vsel %vm326_vm2, %v811_v49, -inf }
 0x525   :  { %816 = vmax.xlane.f32.xlu0 %v815_v51 }
 0x53b   :  { %910 = vrot.lane.b32.xlu0 %v10126_v13, %s9806_s5 }
 0x53f   :  { %1148 = vrot.lane.b32.xlu0 %v10122_v12, %s9807_s14 }
 0x543   :  { %1228 = vrot.lane.b32.xlu0 %v10126_v13, %s9805_s20 }
 0x552   :  { %v10187_v52 = vpop.f32.mrb[0].mxu0 }
 0x553   :  { %v8638_v53 = vpop.f32.mrb[1].mxu0 }
 0x556   :  { %v728_v54 = vpop.f32.mrb[2].mxu0 }
 0x557   :  { %v8648_v55 = vpop.f32.mrb[3].mxu0  ;;  %v810_v56 = vmul.f32 0.35355338, %v728_v54 }
 0x559   :  { %v812_v57 = vsel %vm326_vm2, %v810_v56, -inf }
 0x562   :  { %813 = vmax.xlane.f32.xlu0 %v812_v57 }
 0x578   :  { %834 = vrot.lane.b32.xlu0 %v10122_v12, %s9806_s5 }
 0x57c   :  { %1328 = vrot.lane.b32.xlu0 %v10122_v12, %s9808_s23 }
 0x580   :  { %1565 = vrot.lane.b32.xlu0 %v10122_v12, %s9809_s17 }
 0x584   :  { %1643 = vrot.lane.b32.xlu0 %v10126_v13, %s9809_s17 }
 0x588   :  { %1563 = vrot.lane.b32.xlu0 %v10122_v12, %s9810_s24 }
 0x58c   :  { %1641 = vrot.lane.b32.xlu0 %v10126_v13, %s9810_s24 }
 0x5b2   :  { %v817_v58 = vpop.xlane.xlu0 %816 }
 0x5b3   :  { %v819_v59 = vsub.f32 %v811_v49, %v817_v58 }
 0x5b5   :  { %v822_v60 = vmul.f32 1.442695, %v819_v59 }
 0x5b6   :  { %v911_v61 = vpop.permute.xlu0 %910 }
 0x5b7   :  { %9360 = vpow2.f32 %v822_v60  ;;  %8660 = vmatpush3.msra.mxu1 %v911_v61 }
 0x5b8   :  { %8674 = vmatprep.subr.mxu1 %v9799_v8 }
 0x5ba   :  { %v1149_v0 = vpop.permute.xlu0 %1148 }
 0x5be   :  { %v1229_v1 = vpop.permute.xlu0 %1228 }
 0x5c1   :  { %v9361_v62 = vpop.eup %9360 }
 0x5c2   :  { %v827_v63 = vsel %vm326_vm2, %v9361_v62, 0.0 }
 0x5c3   :  { %828 = vadd.xlane.f32.xlu1 %v827_v63 }
 0x5d4   :  { %1226 = vrot.lane.b32.xlu1 %v10126_v13, %s9807_s14 }
 0x5ef   :  { %v814_v2 = vpop.xlane.xlu0 %813 }
 0x5f0   :  { %v818_v3 = vsub.f32 %v810_v56, %v814_v2 }
 0x5f2   :  { %v820_v4 = vmul.f32 1.442695, %v818_v3 }
 0x5f3   :  { %v835_v6 = vpop.permute.xlu0 %834 }
 0x5f4   :  { %9362 = vpow2.f32 %v820_v4  ;;  %8655 = vmatpush3.msra.mxu0 %v835_v6 }
 0x5f5   :  { %8664 = vmatprep.subr.mxu0 %v319_v21 }
 0x5f7   :  { %v1329_v35 = vpop.permute.xlu0 %1328 }
 0x5fb   :  { %v1566_v50 = vpop.permute.xlu0 %1565 }
 0x5fe   :  { %v9363_v9 = vpop.eup %9362 }
 0x5ff   :  { %v824_v10 = vsel %vm326_vm2, %v9363_v9, 0.0  ;;  %v1644_v54 = vpop.permute.xlu0 %1643 }
 0x600   :  { %825 = vadd.xlane.f32.xlu1 %v824_v10 }
 0x603   :  { %v1564_v56 = vpop.permute.xlu0 %1563 }
 0x607   :  { %v1642_v61 = vpop.permute.xlu0 %1641 }
 0x650   :  { %v829_v14 = vpop.xlane.xlu1 %828 }
 0x651   :  { %9364 = vrcp.f32 %v829_v14 }
 0x654   :  { %v1227_v17 = vpop.permute.xlu1 %1226 }
 0x65b   :  { %v9365_v15 = vpop.eup %9364 }
 0x65c   :  { %v833_v16 = vmul.f32 %v9365_v15, %v9361_v62 }
 0x65e   :  { %8662 = vmatmul.mubr.msk.f32.vlgmr.msra.gmra.mrb[10].mxu1 %vm326_vm2, %v833_v16 }
 0x65f   :  { %8675 = vmatpush3.xpose.msk.msra.mxu1 %vm326_vm2, %v1151_v11  ;;  %8676 = vmatprep.mubr.msk.f32.mxu1 %vm9800_vm1, %v9799_v8 }
 0x660   :  { %8679 = vmatprep.subr.mxu1 %v9799_v8 }
 0x662   :  { %8677 = vmatmul.mubr.msk.f32.vlgmr.msra.gmra.mrb[12].mxu1 %vm326_vm2, %v1149_v0 }
 0x663   :  { %8680 = vmatpush3.xpose.msk.msra.mxu1 %vm326_vm2, %v1229_v1  ;;  %8681 = vmatprep.mubr.msk.f32.mxu1 %vm9800_vm1, %v9799_v8 }
 0x664   :  { %8689 = vmatprep.subr.mxu1 %v9799_v8 }
 0x666   :  { %8682 = vmatmul.mubr.msk.f32.vlgmr.msra.gmra.mrb[14].mxu1 %vm326_vm2, %v1227_v17 }
 0x667   :  { %8691 = vmatprep.mubr.msk.f32.mxu1 %vm9800_vm1, %v9799_v8 }
 0x68d   :  { %v826_v18 = vpop.xlane.xlu1 %825 }
 0x68e   :  { %9366 = vrcp.f32 %v826_v18 }
 0x698   :  { %v9367_v19 = vpop.eup %9366 }
 0x699   :  { %v832_v20 = vmul.f32 %v9367_v19, %v9363_v9 }
 0x69b   :  { %8657 = vmatmul.mubr.msk.f32.vlgmr.msra.gmra.mrb[4].mxu0 %vm326_vm2, %v832_v20 }
 0x69c   :  { %8665 = vmatpush3.msra.mxu0 %v319_v21 }
 0x69d   :  { %8669 = vmatprep.subr.mxu0 %v318_v22 }
 0x731   :  { %v982_v23 = vpop.f32.mrb[10].mxu1 }
 0x732   :  { %v8663_v24 = vpop.f32.mrb[11].mxu1 }
 0x735   :  { %v1222_v25 = vpop.f32.mrb[12].mxu1 }
 0x736   :  { %v1304_v26 = vmul.f32 0.35355338, %v1222_v25  ;;  %v8678_v27 = vpop.f32.mrb[13].mxu1  ;;  %v321_v25 = vld [vmem:[%s11109_s13 + $0x18] sm:$0xff] }
 0x738   :  { %v1306_v28 = vsel %vm326_vm2, %v1304_v26, -inf }
 0x739   :  { %v1300_v29 = vpop.f32.mrb[14].mxu1  ;;  %1307 = vmax.xlane.f32.xlu1 %v1306_v28 }
 0x73a   :  { %v1305_v30 = vmul.f32 0.35355338, %v1300_v29  ;;  %v8683_v31 = vpop.f32.mrb[15].mxu1 }
 0x73c   :  { %v1309_v32 = vsel %vm326_vm2, %v1305_v30, -inf }
 0x73d   :  { %1310 = vmax.xlane.f32.xlu1 %v1309_v32  ;;  %v8177_v32 = vld [vmem:[%s11110_s18] ss:$0 sm:$0xff] }
 0x76e   :  { %v906_v33 = vpop.f32.mrb[4].mxu0 }
 0x76f   :  { %v8658_v34 = vpop.f32.mrb[5].mxu0  ;;  %8666 = vmatprep.mubr.msk.f32.mxu0 %vm326_vm2, %v906_v33 }
 0x770   :  { %8667 = vmatmul.mubr.msk.f32.vlgmr.msra.gmra.mrb[6].mxu0 %vm326_vm2, %v982_v23 }
 0x771   :  { %8671 = vmatprep.mubr.msk.f32.mxu0 %vm326_vm2, %v10187_v52  ;;  %8670 = vmatpush3.msra.mxu0 %v318_v22 }
 0x772   :  { %8684 = vmatprep.subr.mxu0 %v9799_v8 }
 0x778   :  { %8672 = vmatmul.mubr.msk.f32.vlgmr.msra.gmra.mrb[6].mxu0 %vm326_vm2, %v10178_v46  ;;  %v320_v46 = vld [vmem:[%s11109_s13 + $0x10] sm:$0xff] }
 0x779   :  { %8685 = vmatpush3.msra.mxu0 %v1329_v35  ;;  %8686 = vmatprep.mubr.msk.f32.mxu0 %vm9800_vm1, %v9799_v8 }
 0x77a   :  { %8694 = vmatprep.subr.mxu0 %v320_v46 }
 0x7c6   :  { %v1308_v36 = vpop.xlane.xlu1 %1307 }
 0x7c7   :  { %v1312_v37 = vsub.f32 %v1304_v26, %v1308_v36 }
 0x7c9   :  { %v1314_v38 = vmul.f32 1.442695, %v1312_v37 }
 0x7ca   :  { %v1311_v39 = vpop.xlane.xlu1 %1310 }
 0x7cb   :  { %9368 = vpow2.f32 %v1314_v38  ;;  %v1313_v40 = vsub.f32 %v1305_v30, %v1311_v39 }
 0x7cd   :  { %v1316_v41 = vmul.f32 1.442695, %v1313_v40 }
 0x7cf   :  { %9370 = vpow2.f32 %v1316_v41 }
 0x7d5   :  { %v9369_v42 = vpop.eup %9368 }
 0x7d6   :  { %v1318_v43 = vsel %vm326_vm2, %v9369_v42, 0.0 }
 0x7d7   :  { %1319 = vadd.xlane.f32.xlu1 %v1318_v43 }
 0x7d9   :  { %v9371_v44 = vpop.eup %9370 }
 0x7da   :  { %v1321_v45 = vsel %vm326_vm2, %v9371_v44, 0.0 }
 0x7db   :  { %1322 = vadd.xlane.f32.xlu1 %v1321_v45 }
 0x7ec   :  { %1404 = vrot.lane.b32.xlu1 %v10126_v13, %s9808_s23 }
 0x864   :  { %v1320_v47 = vpop.xlane.xlu1 %1319 }
 0x865   :  { %9372 = vrcp.f32 %v1320_v47 }
 0x868   :  { %v1323_v48 = vpop.xlane.xlu1 %1322 }
 0x869   :  { %9374 = vrcp.f32 %v1323_v48 }
 0x86c   :  { %v1405_v49 = vpop.permute.xlu1 %1404 }
 0x86d   :  { %8690 = vmatpush3.msra.mxu1 %v1405_v49 }
 0x86e   :  { %8699 = vmatprep.subr.mxu1 %v9799_v8 }
 0x86f   :  { %v9373_v51 = vpop.eup %9372 }
 0x870   :  { %v1326_v52 = vmul.f32 %v9373_v51, %v9369_v42  ;;  %v2035_v51 = vld [vmem:[%s11111_s29 + $0x10] sm:$0xff] }
 0x872   :  { %8687 = vmatmul.mubr.msk.f32.vlgmr.msra.gmra.mrb[8].mxu0 %vm326_vm2, %v1326_v52 }
 0x873   :  { %v9375_v53 = vpop.eup %9374  ;;  %8695 = vmatpush3.msra.mxu0 %v320_v46 }
 0x874   :  { %v1327_v55 = vmul.f32 %v9375_v53, %v9371_v44  ;;  %8704 = vmatprep.subr.mxu0 %v9799_v8  ;;  %v2036_v53 = vld [vmem:[%s11111_s29 + $0x18] sm:$0xff] }
 0x876   :  { %8692 = vmatmul.mubr.msk.f32.vlgmr.msra.gmra.mrb[16].mxu1 %vm326_vm2, %v1327_v55  ;;  %v2125_v55 = vld [vmem:[%s11068_s8] sm:$0xff] }
 0x877   :  { %8700 = vmatpush3.xpose.msk.msra.mxu1 %vm326_vm2, %v1566_v50  ;;  %8701 = vmatprep.mubr.msk.f32.mxu1 %vm9800_vm1, %v9799_v8  ;;  %v2034_v50 = vld [vmem:[%s11111_s29 + $0x8] sm:$0xff] }
 0x878   :  { %8709 = vmatprep.subr.mxu1 %v9799_v8 }
 0x87a   :  { %8702 = vmatmul.mubr.msk.f32.vlgmr.msra.gmra.mrb[18].mxu1 %vm326_vm2, %v1564_v56  ;;  %v2126_v56 = vld [vmem:[%s11068_s8 + $0x8] sm:$0xff] }
 0x87b   :  { %8711 = vmatprep.mubr.msk.f32.mxu1 %vm9800_vm1, %v9799_v8 }
 0x945   :  { %v1400_v57 = vpop.f32.mrb[8].mxu0 }
 0x946   :  { %v8688_v58 = vpop.f32.mrb[9].mxu0  ;;  %8696 = vmatprep.mubr.msk.f32.mxu0 %vm326_vm2, %v1400_v57  ;;  %v9187_v57 = vpack.c.bf16 %v2126_v56, %v2125_v55 }
 0x949   :  { %v1476_v59 = vpop.f32.mrb[16].mxu1 }
 0x94a   :  { %v8693_v60 = vpop.f32.mrb[17].mxu1  ;;  %8697 = vmatmul.mubr.msk.f32.vlgmr.msra.gmra.mrb[6].mxu0 %vm326_vm2, %v1476_v59 }
 0x94b   :  { %8705 = vmatpush3.xpose.msk.msra.mxu0 %vm326_vm2, %v1644_v54  ;;  %8706 = vmatprep.mubr.msk.f32.mxu0 %vm9800_vm1, %v9799_v8  ;;  %v9183_v54 = vpack.c.bf16 %v2036_v53, %v2035_v51 }
 0x94c   :  { %8714 = vmatprep.subr.mxu0 %v9799_v8 }
 0x94d   :  { %v1637_v62 = vpop.f32.mrb[18].mxu1 }
 0x94e   :  { %v1719_v63 = vmul.f32 0.35355338, %v1637_v62  ;;  %v8703_v0 = vpop.f32.mrb[19].mxu1  ;;  %8707 = vmatmul.mubr.msk.f32.vlgmr.msra.gmra.mrb[10].mxu0 %vm326_vm2, %v1642_v61 }
 0x94f   :  { %8716 = vmatprep.mubr.msk.f32.mxu0 %vm9800_vm1, %v9799_v8 }
 0x950   :  { %v1721_v1 = vsel %vm326_vm2, %v1719_v63, -inf }
 0x951   :  { %1722 = vmax.xlane.f32.xlu1 %v1721_v1  ;;  %v8178_v1 = vld [vmem:[#allocation7] ss:$0 sm:$0xff] }
 0x9de   :  { %v1723_v2 = vpop.xlane.xlu1 %1722 }
 0x9df   :  { %v1727_v3 = vsub.f32 %v1719_v63, %v1723_v2 }
 0x9e1   :  { %v1729_v4 = vmul.f32 1.442695, %v1727_v3 }
 0x9e3   :  { %9376 = vpow2.f32 %v1729_v4 }
 0x9ed   :  { %v9377_v14 = vpop.eup %9376 }
 0x9ee   :  { %v1733_v15 = vsel %vm326_vm2, %v9377_v14, 0.0 }
 0xa21   :  { %v1715_v6 = vpop.f32.mrb[10].mxu0 }
 0xa22   :  { %v1720_v9 = vmul.f32 0.35355338, %v1715_v6  ;;  %v8708_v10 = vpop.f32.mrb[11].mxu0  ;;  %v8179_v6 = vld [vmem:[#allocation8] ss:$0 sm:$0xff] }
 0xa24   :  { %v1724_v11 = vsel %vm326_vm2, %v1720_v9, -inf }
 0xa25   :  { %1725 = vmax.xlane.f32.xlu0 %v1724_v11  ;;  %v2127_v11 = vld [vmem:[%s11068_s8 + $0x10] sm:$0xff] }
 0xa29   :  { %1734 = vadd.xlane.f32.xlu0 %v1733_v15 }
 0xa3f   :  { %1743 = vrot.lane.b32.xlu0 %v10122_v12, %s11094_s4 }
 0xab2   :  { %v1726_v16 = vpop.xlane.xlu0 %1725 }
 0xab3   :  { %v1728_v17 = vsub.f32 %v1720_v9, %v1726_v16 }
 0xab5   :  { %v1731_v18 = vmul.f32 1.442695, %v1728_v17 }
 0xab6   :  { %v1735_v19 = vpop.xlane.xlu0 %1734 }
 0xab7   :  { %9378 = vpow2.f32 %v1731_v18  ;;  %v223_v18 = vld [vmem:[#allocation5] sm:$0xff] }
 0xab8   :  { %9380 = vrcp.f32 %v1735_v19  ;;  %v224_v19 = vld [vmem:[#allocation5 + $0x8] sm:$0xff] }
 0xaba   :  { %v1744_v20 = vpop.permute.xlu0 %1743 }
 0xabb   :  { %8710 = vmatpush3.msra.mxu1 %v1744_v20 }
 0xac1   :  { %v9379_v21 = vpop.eup %9378 }
 0xac2   :  { %v9381_v22 = vpop.eup %9380  ;;  %v1736_v23 = vsel %vm326_vm2, %v9379_v21, 0.0 }
 0xac3   :  { %1737 = vadd.xlane.f32.xlu1 %v1736_v23  ;;  %v1741_v24 = vmul.f32 %v9381_v22, %v9377_v14  ;;  %v2128_v14 = vld [vmem:[%s11068_s8 + $0x18] sm:$0xff]  ;;  %v8183_v22 = vld [vmem:[%s11069_s9] ss:$0 sm:$0xff] }
 0xac4   :  { %v9191_v17 = vpack.c.bf16 %v2128_v14, %v2127_v11 }
 0xac5   :  { %8712 = vmatmul.mubr.msk.f32.vlgmr.msra.gmra.mrb[20].mxu1 %vm326_vm2, %v1741_v24 }
 0xad4   :  { %1819 = vrot.lane.b32.xlu1 %v10126_v13, %s11094_s4 }
 0xb50   :  { %v1738_v12 = vpop.xlane.xlu1 %1737 }
 0xb51   :  { %9382 = vrcp.f32 %v1738_v12 }
 0xb54   :  { %v1820_v26 = vpop.permute.xlu1 %1819 }
 0xb55   :  { %8715 = vmatpush3.msra.mxu0 %v1820_v26 }
 0xb56   :  { %8719 = vmatprep.subr.mxu0 %v321_v25 }
 0xb5b   :  { %v9383_v27 = vpop.eup %9382 }
 0xb5c   :  { %v1742_v28 = vmul.f32 %v9383_v27, %v9379_v21 }
 0xb5e   :  { %8717 = vmatmul.mubr.msk.f32.vlgmr.msra.gmra.mrb[12].mxu0 %vm326_vm2, %v1742_v28 }
 0xb5f   :  { %8720 = vmatpush3.msra.mxu0 %v321_v25  ;;  %v8180_v25 = vld [vmem:[%s11067_s7] ss:$0 sm:$0xff] }
 0xb60   :  { %8756 = vmatprep.subr.mxu0 %v9799_v8 }
 0xb98   :  { %v1815_v29 = vpop.f32.mrb[20].mxu1 }
 0xb99   :  { %v8713_v30 = vpop.f32.mrb[21].mxu1  ;;  %8721 = vmatprep.mubr.msk.f32.mxu0 %vm326_vm2, %v1815_v29 }
 0xc31   :  { %v1891_v13 = vpop.f32.mrb[12].mxu0 }
 0xc32   :  { %v8718_v31 = vpop.f32.mrb[13].mxu0  ;;  %8722 = vmatmul.mubr.msk.f32.vlgmr.msra.gmra.mrb[6].mxu0 %vm326_vm2, %v1891_v13 }
 0xc33   :  { %8758 = vmatprep.mubr.msk.f32.mxu0 %vm9800_vm1, %v9799_v8 }
 0xd05   :  { %v8723_v33 = vpop.f32.mrb[6].mxu0 }
 0xd06   :  { %v1985_v34 = vadd.f32 %v8723_v33, %v8177_v32  ;;  %v1967_v35 = vpop.f32.mrb[7].mxu0 }
 0xd07   :  { %v1984_v36 = vadd.f32 %v8177_v32, %v1967_v35 }
 0xd08   :  { %v1987_v37 = vadd.f32 %v1985_v34, %v10109_v7 }
 0xd09   :  { %v1986_v38 = vadd.f32 %v1984_v36, %v10105_v5  ;;  %v2033_v5 = vld [vmem:[%s11111_s29] sm:$0xff] }
 0xd0a   :  { %v1993_v39 = vsel %vm236_vm0, %v1987_v37, 0.0  ;;  %v9179_v52 = vpack.c.bf16 %v2034_v50, %v2033_v5 }
 0xd0b   :  { %1994 = vadd.xlane.f32.xlu0 %v1993_v39  ;;  %v1990_v40 = vsel %vm236_vm0, %v1986_v38, 0.0 }
 0xd0c   :  { %1991 = vadd.xlane.f32.xlu1 %v1990_v40  ;;  %9180 = vmatprep.subr.bf16.mxu1 %v9179_v52 }
 0xd0d   :  { %9182 = vmatpush3.bf16.msra.mxu1 %v9179_v52 }
 0xd0e   :  { %9184 = vmatprep.subr.bf16.mxu1 %v9183_v54 }
 0xd11   :  { %9186 = vmatpush3.bf16.msra.mxu1 %v9183_v54 }
 0xd12   :  { %9188 = vmatprep.subr.bf16.mxu1 %v9187_v57 }
 0xd98   :  { %v1995_v41 = vpop.xlane.xlu0 %1994 }
 0xd99   :  { %v1998_v42 = vmul.f32 0.03125, %v1995_v41  ;;  %v1992_v43 = vpop.xlane.xlu1 %1991 }
 0xd9a   :  { %v1997_v44 = vmul.f32 0.03125, %v1992_v43 }
 0xd9b   :  { %v2000_v45 = vsub.f32 %v1987_v37, %v1998_v42 }
 0xd9c   :  { %v1999_v46 = vsub.f32 %v1986_v38, %v1997_v44 }
 0xd9d   :  { %v2002_v47 = vmul.f32 %v2000_v45, %v2000_v45 }
 0xd9e   :  { %v2001_v48 = vmul.f32 %v1999_v46, %v1999_v46 }
 0xd9f   :  { %v2006_v49 = vsel %vm236_vm0, %v2002_v47, 0.0 }
 0xda0   :  { %2007 = vadd.xlane.f32.xlu1 %v2006_v49  ;;  %v2003_v7 = vsel %vm236_vm0, %v2001_v48, 0.0 }
 0xda1   :  { %2004 = vadd.xlane.f32.xlu0 %v2003_v7 }
 0xe2d   :  { %v2008_v58 = vpop.xlane.xlu1 %2007 }
 0xe2e   :  { %v2010_v59 = vmul.f32 0.03125, %v2008_v58  ;;  %v2005_v60 = vpop.xlane.xlu0 %2004 }
 0xe2f   :  { %v2009_v61 = vmul.f32 0.03125, %v2005_v60 }
 0xe30   :  { %v2012_v62 = vadd.f32 1e-05, %v2010_v59 }
 0xe31   :  { %v2011_v63 = vadd.f32 1e-05, %v2009_v61 }
 0xe32   :  { %9384 = vrsqrt.f32 %v2012_v62 }
 0xe33   :  { %9386 = vrsqrt.f32 %v2011_v63 }
 0xe3c   :  { %v9385_v0 = vpop.eup %9384 }
 0xe3d   :  { %v9387_v2 = vpop.eup %9386  ;;  %v2016_v3 = vmul.f32 %v9385_v0, %v2000_v45 }
 0xe3e   :  { %v2015_v4 = vmul.f32 %v9387_v2, %v1999_v46 }
 0xe3f   :  { %v2024_v9 = vmul.f32 %v8178_v1, %v2016_v3 }
 0xe40   :  { %v2023_v10 = vmul.f32 %v8178_v1, %v2015_v4 }
 0xe41   :  { %v10318_v16 = vadd.f32 %v8179_v6, %v2024_v9 }
 0xe42   :  { %v10316_v15 = vadd.f32 %v8179_v6, %v2023_v10 }
 0xe44   :  { %8732 = vmatprep.mubr.msk.f32.mxu1 %vm236_vm0, %v10316_v15 }
 0xe45   :  { %8733 = vmatmul.mubr.msk.f32.vlgmr.msra.gmra.mrb[22].mxu1 %vm236_vm0, %v10318_v16 }
 0xe46   :  { %9190 = vmatpush3.bf16.msra.mxu1 %v9187_v57  ;;  %8743 = vmatprep.mubr.msk.f32.mxu1 %vm236_vm0, %v223_v18 }
 0xe47   :  { %9192 = vmatprep.subr.bf16.mxu1 %v9191_v17 }
 0xe4a   :  { %9194 = vmatpush3.bf16.msra.mxu1 %v9191_v17 }
 0xe4b   :  { %8746 = vmatprep.subr.mxu1 %v9799_v8 }
 0xe4d   :  { %8744 = vmatmul.mubr.msk.f32.vlgmr.msra.gmra.mrb[24].mxu1 %vm236_vm0, %v224_v19 }
 0xe4e   :  { %8748 = vmatprep.mubr.msk.f32.mxu1 %vm9800_vm1, %v9799_v8 }
 0xf18   :  { %v8734_v20 = vpop.f32.mrb[22].mxu1 }
 0xf19   :  { %v2116_v21 = vpop.f32.mrb[23].mxu1  ;;  %v10352_v28 = vadd.f32 %v8734_v20, %v8180_v25 }
 0xf1a   :  { %v10343_v27 = vadd.f32 %v8180_v25, %v2116_v21 }
 0xf20   :  { %v8745_v23 = vpop.f32.mrb[24].mxu1 }
 0xf21   :  { %v10332_v24 = vadd.f32 %v8745_v23, %v8183_v22  ;;  %v2208_v12 = vpop.f32.mrb[25].mxu1 }
 0xf22   :  { %v10337_v26 = vadd.f32 %v8183_v22, %v2208_v12 }
 0xf23   :  { %2630 = vrot.lane.b32.xlu1 %v10332_v24, %s9803_s30 }
 0xf24   :  { %8747 = vmatpush3.xpose.msk.msra.mxu1 %vm326_vm2, %v10337_v26 }
 0xf25   :  { %8751 = vmatprep.subr.mxu1 %v9799_v8 }
 0xf27   :  { %8749 = vmatmul.mubr.msk.f32.vlgmr.msra.gmra.mrb[26].mxu1 %vm326_vm2, %v10343_v27 }
 0xf28   :  { %8752 = vmatpush3.xpose.msk.msra.mxu1 %vm326_vm2, %v10332_v24  ;;  %8753 = vmatprep.mubr.msk.f32.mxu1 %vm9800_vm1, %v9799_v8 }
 0xf29   :  { %8761 = vmatprep.subr.mxu1 %v9799_v8 }
 0xf2b   :  { %8754 = vmatmul.mubr.msk.f32.vlgmr.msra.gmra.mrb[28].mxu1 %vm326_vm2, %v10352_v28 }
 0xf2c   :  { %8763 = vmatprep.mubr.msk.f32.mxu1 %vm9800_vm1, %v9799_v8 }
 0xf95   :  { %v2631_v48 = vpop.permute.xlu1 %2630 }
 0xffa   :  { %v2294_v29 = vpop.f32.mrb[26].mxu1 }
 0xffb   :  { %v8750_v30 = vpop.f32.mrb[27].mxu1  ;;  %v2374_v34 = vmul.f32 0.35355338, %v2294_v29 }
 0xffd   :  { %v2376_v35 = vsel %vm326_vm2, %v2374_v34, -inf }
 0xffe   :  { %v2370_v13 = vpop.f32.mrb[28].mxu1 }
 0xfff   :  { %v2375_v31 = vmul.f32 0.35355338, %v2370_v13  ;;  %v8755_v32 = vpop.f32.mrb[29].mxu1 }
0x1001   :  { %v2379_v33 = vsel %vm326_vm2, %v2375_v31, -inf }
0x1002   :  { %2380 = vmax.xlane.f32.xlu0 %v2379_v33 }
0x1018   :  { %2474 = vrot.lane.b32.xlu0 %v10332_v24, %s9801_s19 }
0x1037   :  { %2377 = vmax.xlane.f32.xlu0 %v2376_v35 }
0x104d   :  { %2398 = vrot.lane.b32.xlu0 %v10337_v26, %s9801_s19 }
0x1051   :  { %2550 = vrot.lane.b32.xlu0 %v10343_v27, %s9803_s30 }
0x108f   :  { %v2381_v36 = vpop.xlane.xlu0 %2380 }
0x1090   :  { %v2383_v37 = vsub.f32 %v2375_v31, %v2381_v36 }
0x1092   :  { %v2386_v38 = vmul.f32 1.442695, %v2383_v37 }
0x1093   :  { %v2475_v39 = vpop.permute.xlu0 %2474 }
0x1094   :  { %9388 = vpow2.f32 %v2386_v38  ;;  %8762 = vmatpush3.msra.mxu1 %v2475_v39 }
0x1095   :  { %8771 = vmatprep.subr.mxu1 %v9799_v8 }
0x109e   :  { %v9389_v40 = vpop.eup %9388 }
0x109f   :  { %v2391_v41 = vsel %vm326_vm2, %v9389_v40, 0.0 }
0x10a0   :  { %2392 = vadd.xlane.f32.xlu1 %v2391_v41 }
0x10b1   :  { %2628 = vrot.lane.b32.xlu1 %v10352_v28, %s9803_s30 }
0x10c4   :  { %v2378_v42 = vpop.xlane.xlu0 %2377 }
0x10c5   :  { %v2382_v43 = vsub.f32 %v2374_v34, %v2378_v42 }
0x10c7   :  { %v2384_v44 = vmul.f32 1.442695, %v2382_v43  ;;  %v2218_v43 = vld [vmem:[%s11070_s10 + $0x8] sm:$0xff] }
0x10c8   :  { %v2399_v45 = vpop.permute.xlu0 %2398 }
0x10c9   :  { %9390 = vpow2.f32 %v2384_v44  ;;  %8757 = vmatpush3.msra.mxu0 %v2399_v45  ;;  %v2217_v44 = vld [vmem:[%s11070_s10] sm:$0xff] }
0x10ca   :  { %8766 = vmatprep.subr.mxu0 %v9799_v8 }
0x10cc   :  { %v2551_v55 = vpop.permute.xlu0 %2550 }
0x10d3   :  { %v9391_v46 = vpop.eup %9390 }
0x10d4   :  { %v2388_v47 = vsel %vm326_vm2, %v9391_v46, 0.0 }
0x10d5   :  { %2389 = vadd.xlane.f32.xlu1 %v2388_v47 }
0x10e6   :  { %2552 = vrot.lane.b32.xlu1 %v10337_v26, %s9803_s30 }
0x112d   :  { %v2393_v49 = vpop.xlane.xlu1 %2392 }
0x112e   :  { %9392 = vrcp.f32 %v2393_v49 }
0x1131   :  { %v2629_v50 = vpop.permute.xlu1 %2628 }
0x1138   :  { %v9393_v7 = vpop.eup %9392 }
0x1139   :  { %v2397_v5 = vmul.f32 %v9393_v7, %v9389_v40 }
0x113b   :  { %8764 = vmatmul.mubr.msk.f32.vlgmr.msra.gmra.mrb[30].mxu1 %vm326_vm2, %v2397_v5 }
0x113c   :  { %8772 = vmatpush3.xpose.msk.msra.mxu1 %vm326_vm2, %v2631_v48  ;;  %8773 = vmatprep.mubr.msk.f32.mxu1 %vm9800_vm1, %v9799_v8 }
0x113d   :  { %8781 = vmatprep.subr.mxu1 %v9799_v8 }
0x113f   :  { %8774 = vmatmul.mubr.msk.f32.vlgmr.msra.gmra.mrb[32].mxu1 %vm326_vm2, %v2629_v50 }
0x1140   :  { %8783 = vmatprep.mubr.msk.f32.mxu1 %vm9800_vm1, %v9799_v8 }
0x1162   :  { %v2390_v51 = vpop.xlane.xlu1 %2389 }
0x1163   :  { %9394 = vrcp.f32 %v2390_v51 }
0x1166   :  { %v2553_v54 = vpop.permute.xlu1 %2552 }
0x116d   :  { %v9395_v52 = vpop.eup %9394 }
0x116e   :  { %v2396_v53 = vmul.f32 %v9395_v52, %v9391_v46 }
0x1170   :  { %8759 = vmatmul.mubr.msk.f32.vlgmr.msra.gmra.mrb[14].mxu0 %vm326_vm2, %v2396_v53 }
0x1171   :  { %8767 = vmatpush3.xpose.msk.msra.mxu0 %vm326_vm2, %v2553_v54  ;;  %8768 = vmatprep.mubr.msk.f32.mxu0 %vm9800_vm1, %v9799_v8 }
0x1172   :  { %8776 = vmatprep.subr.mxu0 %v9799_v8 }
0x1174   :  { %8769 = vmatmul.mubr.msk.f32.vlgmr.msra.gmra.mrb[16].mxu0 %vm326_vm2, %v2551_v55  ;;  %v2219_v55 = vld [vmem:[%s11070_s10 + $0x10] sm:$0xff] }
0x1175   :  { %8778 = vmatprep.mubr.msk.f32.mxu0 %vm9800_vm1, %v9799_v8 }
0x120e   :  { %v10391_v56 = vpop.f32.mrb[30].mxu1 }
0x120f   :  { %v8765_v57 = vpop.f32.mrb[31].mxu1 }
0x1212   :  { %v2702_v58 = vpop.f32.mrb[32].mxu1 }
0x1213   :  { %v2707_v59 = vmul.f32 0.35355338, %v2702_v58  ;;  %v8775_v60 = vpop.f32.mrb[33].mxu1 }
0x1215   :  { %v2711_v61 = vsel %vm326_vm2, %v2707_v59, -inf }
0x1216   :  { %2712 = vmax.xlane.f32.xlu1 %v2711_v61 }
0x1227   :  { %3046 = vrot.lane.b32.xlu1 %v10337_v26, %s9807_s14 }
0x122b   :  { %3044 = vrot.lane.b32.xlu1 %v10343_v27, %s9807_s14 }
0x122f   :  { %3122 = vrot.lane.b32.xlu1 %v10352_v28, %s9807_s14 }
0x1243   :  { %v10400_v62 = vpop.f32.mrb[14].mxu0 }
0x1244   :  { %v8760_v63 = vpop.f32.mrb[15].mxu0 }
0x1247   :  { %v2624_v0 = vpop.f32.mrb[16].mxu0 }
0x1248   :  { %v8770_v1 = vpop.f32.mrb[17].mxu0  ;;  %v2706_v10 = vmul.f32 0.35355338, %v2624_v0 }
0x124a   :  { %v2708_v11 = vsel %vm326_vm2, %v2706_v10, -inf }
0x12a3   :  { %v2713_v2 = vpop.xlane.xlu1 %2712 }
0x12a4   :  { %v2715_v3 = vsub.f32 %v2707_v59, %v2713_v2 }
0x12a6   :  { %v2718_v4 = vmul.f32 1.442695, %v2715_v3 }
0x12a7   :  { %v3047_v18 = vpop.permute.xlu1 %3046 }
0x12a8   :  { %9396 = vpow2.f32 %v2718_v4 }
0x12ab   :  { %v3045_v21 = vpop.permute.xlu1 %3044 }
0x12af   :  { %v3123_v23 = vpop.permute.xlu1 %3122 }
0x12b2   :  { %v9397_v6 = vpop.eup %9396 }
0x12b3   :  { %v2723_v9 = vsel %vm326_vm2, %v9397_v6, 0.0 }
0x12b4   :  { %2724 = vadd.xlane.f32.xlu0 %v2723_v9 }
0x12ca   :  { %2806 = vrot.lane.b32.xlu0 %v10332_v24, %s9804_s1 }
0x12ce   :  { %3124 = vrot.lane.b32.xlu0 %v10332_v24, %s9807_s14 }
0x12ed   :  { %2709 = vmax.xlane.f32.xlu0 %v2708_v11 }
0x1303   :  { %2730 = vrot.lane.b32.xlu0 %v10337_v26, %s9804_s1 }
0x1307   :  { %3224 = vrot.lane.b32.xlu0 %v10337_v26, %s9805_s20 }
0x130b   :  { %3461 = vrot.lane.b32.xlu0 %v10337_v26, %s9810_s24 }
0x130f   :  { %3539 = vrot.lane.b32.xlu0 %v10332_v24, %s9810_s24 }
0x1313   :  { %3459 = vrot.lane.b32.xlu0 %v10343_v27, %s9810_s24 }
0x1317   :  { %3537 = vrot.lane.b32.xlu0 %v10352_v28, %s9810_s24 }
0x1341   :  { %v2725_v14 = vpop.xlane.xlu0 %2724 }
0x1342   :  { %9398 = vrcp.f32 %v2725_v14 }
0x1345   :  { %v2807_v17 = vpop.permute.xlu0 %2806 }
0x1346   :  { %8782 = vmatpush3.msra.mxu1 %v2807_v17 }
0x1347   :  { %8796 = vmatprep.subr.mxu1 %v9799_v8 }
0x1349   :  { %v3125_v22 = vpop.permute.xlu0 %3124 }
0x134c   :  { %v9399_v19 = vpop.eup %9398 }
0x134d   :  { %v2729_v20 = vmul.f32 %v9399_v19, %v9397_v6 }
0x134f   :  { %8784 = vmatmul.mubr.msk.f32.vlgmr.msra.gmra.mrb[34].mxu1 %vm326_vm2, %v2729_v20 }
0x1350   :  { %8797 = vmatpush3.xpose.msk.msra.mxu1 %vm326_vm2, %v3047_v18  ;;  %8798 = vmatprep.mubr.msk.f32.mxu1 %vm9800_vm1, %v9799_v8 }
0x1351   :  { %8801 = vmatprep.subr.mxu1 %v9799_v8 }
0x1353   :  { %8799 = vmatmul.mubr.msk.f32.vlgmr.msra.gmra.mrb[36].mxu1 %vm326_vm2, %v3045_v21 }
0x1354   :  { %8802 = vmatpush3.xpose.msk.msra.mxu1 %vm326_vm2, %v3125_v22  ;;  %8803 = vmatprep.mubr.msk.f32.mxu1 %vm9800_vm1, %v9799_v8 }
0x1355   :  { %8811 = vmatprep.subr.mxu1 %v9799_v8 }
0x1357   :  { %8804 = vmatmul.mubr.msk.f32.vlgmr.msra.gmra.mrb[38].mxu1 %vm326_vm2, %v3123_v23 }
0x1358   :  { %8813 = vmatprep.mubr.msk.f32.mxu1 %vm9800_vm1, %v9799_v8 }
0x137a   :  { %v2710_v12 = vpop.xlane.xlu0 %2709 }
0x137b   :  { %v2714_v25 = vsub.f32 %v2706_v10, %v2710_v12 }
0x137d   :  { %v2716_v27 = vmul.f32 1.442695, %v2714_v25 }
0x137e   :  { %v2731_v28 = vpop.permute.xlu0 %2730 }
0x137f   :  { %9400 = vpow2.f32 %v2716_v27  ;;  %8777 = vmatpush3.msra.mxu0 %v2731_v28 }
0x1380   :  { %8786 = vmatprep.subr.mxu0 %v2218_v43 }
0x1382   :  { %v3225_v57 = vpop.permute.xlu0 %3224 }
0x1386   :  { %v3462_v61 = vpop.permute.xlu0 %3461 }
0x1389   :  { %v9401_v29 = vpop.eup %9400 }
0x138a   :  { %v2720_v30 = vsel %vm326_vm2, %v9401_v29, 0.0 }
0x138b   :  { %2721 = vadd.xlane.f32.xlu1 %v2720_v30 }
0x1418   :  { %v2722_v13 = vpop.xlane.xlu1 %2721 }
0x1419   :  { %9402 = vrcp.f32 %v2722_v13 }
0x1422   :  { %v2878_v31 = vpop.f32.mrb[34].mxu1 }
0x1423   :  { %v9403_v32 = vpop.eup %9402  ;;  %v8785_v33 = vpop.f32.mrb[35].mxu1 }
0x1424   :  { %v2728_v34 = vmul.f32 %v9403_v32, %v9401_v29 }
0x1426   :  { %8779 = vmatmul.mubr.msk.f32.vlgmr.msra.gmra.mrb[18].mxu0 %vm326_vm2, %v2728_v34  ;;  %v3118_v35 = vpop.f32.mrb[36].mxu1 }
0x1427   :  { %v3200_v36 = vmul.f32 0.35355338, %v3118_v35  ;;  %v8800_v37 = vpop.f32.mrb[37].mxu1  ;;  %8787 = vmatpush3.msra.mxu0 %v2218_v43 }
0x1428   :  { %8791 = vmatprep.subr.mxu0 %v2217_v44  ;;  %v2220_v37 = vld [vmem:[%s11070_s10 + $0x18] sm:$0xff] }
0x1429   :  { %v3202_v38 = vsel %vm326_vm2, %v3200_v36, -inf }
0x142a   :  { %3203 = vmax.xlane.f32.xlu1 %v3202_v38  ;;  %v3196_v39 = vpop.f32.mrb[38].mxu1 }
0x142b   :  { %v3201_v40 = vmul.f32 0.35355338, %v3196_v39  ;;  %v8805_v41 = vpop.f32.mrb[39].mxu1 }
0x142d   :  { %v3205_v42 = vsel %vm326_vm2, %v3201_v40, -inf }
0x142e   :  { %3206 = vmax.xlane.f32.xlu1 %v3205_v42 }
0x14b7   :  { %v3204_v45 = vpop.xlane.xlu1 %3203 }
0x14b8   :  { %v3208_v46 = vsub.f32 %v3200_v36, %v3204_v45 }
0x14ba   :  { %v3210_v47 = vmul.f32 1.442695, %v3208_v46 }
0x14bb   :  { %v3207_v48 = vpop.xlane.xlu1 %3206 }
0x14bc   :  { %9404 = vpow2.f32 %v3210_v47  ;;  %v3209_v49 = vsub.f32 %v3201_v40, %v3207_v48 }
0x14be   :  { %v3212_v7 = vmul.f32 1.442695, %v3209_v49 }
0x14c0   :  { %9406 = vpow2.f32 %v3212_v7 }
0x14c6   :  { %v9405_v5 = vpop.eup %9404 }
0x14c7   :  { %v3214_v50 = vsel %vm326_vm2, %v9405_v5, 0.0 }
0x14c8   :  { %3215 = vadd.xlane.f32.xlu1 %v3214_v50 }
0x14ca   :  { %v9407_v51 = vpop.eup %9406 }
0x14cb   :  { %v3217_v52 = vsel %vm326_vm2, %v9407_v51, 0.0 }
0x14cc   :  { %3218 = vadd.xlane.f32.xlu1 %v3217_v52 }
0x14dd   :  { %3300 = vrot.lane.b32.xlu1 %v10332_v24, %s9805_s20 }
0x14f9   :  { %v2802_v53 = vpop.f32.mrb[18].mxu0 }
0x14fa   :  { %v8780_v54 = vpop.f32.mrb[19].mxu0  ;;  %8788 = vmatprep.mubr.msk.f32.mxu0 %vm326_vm2, %v2802_v53 }
0x14fb   :  { %8789 = vmatmul.mubr.msk.f32.vlgmr.msra.gmra.mrb[20].mxu0 %vm326_vm2, %v2878_v31 }
0x14fc   :  { %8793 = vmatprep.mubr.msk.f32.mxu0 %vm326_vm2, %v10400_v62  ;;  %8792 = vmatpush3.msra.mxu0 %v2217_v44  ;;  %v8218_v44 = vld [vmem:[%s11071_s11] ss:$0 sm:$0xff] }
0x14fd   :  { %8806 = vmatprep.subr.mxu0 %v9799_v8 }
0x1503   :  { %8794 = vmatmul.mubr.msk.f32.vlgmr.msra.gmra.mrb[20].mxu0 %vm326_vm2, %v10391_v56  ;;  %v3540_v56 = vpop.permute.xlu0 %3539 }
0x1504   :  { %8807 = vmatpush3.msra.mxu0 %v3225_v57  ;;  %8808 = vmatprep.mubr.msk.f32.mxu0 %vm9800_vm1, %v9799_v8 }
0x1505   :  { %8816 = vmatprep.subr.mxu0 %v2219_v55 }
0x1507   :  { %v3460_v2 = vpop.permute.xlu0 %3459 }
0x150b   :  { %v3538_v10 = vpop.permute.xlu0 %3537 }
0x1555   :  { %v3216_v58 = vpop.xlane.xlu1 %3215 }
0x1556   :  { %9408 = vrcp.f32 %v3216_v58 }
0x1559   :  { %v3219_v59 = vpop.xlane.xlu1 %3218 }
0x155a   :  { %9410 = vrcp.f32 %v3219_v59 }
0x155d   :  { %v3301_v60 = vpop.permute.xlu1 %3300 }
0x155e   :  { %8812 = vmatpush3.msra.mxu1 %v3301_v60  ;;  %v3928_v60 = vld [vmem:[#allocation16] sm:$0xff] }
0x155f   :  { %8821 = vmatprep.subr.mxu1 %v9799_v8 }
0x1560   :  { %v9409_v62 = vpop.eup %9408 }
0x1561   :  { %v3222_v63 = vmul.f32 %v9409_v62, %v9405_v5 }
0x1563   :  { %8809 = vmatmul.mubr.msk.f32.vlgmr.msra.gmra.mrb[22].mxu0 %vm326_vm2, %v3222_v63  ;;  %v3930_v63 = vld [vmem:[#allocation16 + $0x10] sm:$0xff] }
0x1564   :  { %v9411_v0 = vpop.eup %9410  ;;  %8817 = vmatpush3.msra.mxu0 %v2219_v55 }
0x1565   :  { %v3223_v1 = vmul.f32 %v9411_v0, %v9407_v51  ;;  %8826 = vmatprep.subr.mxu0 %v9799_v8  ;;  %v3931_v0 = vld [vmem:[#allocation16 + $0x18] sm:$0xff] }
0x1567   :  { %8814 = vmatmul.mubr.msk.f32.vlgmr.msra.gmra.mrb[40].mxu1 %vm326_vm2, %v3223_v1  ;;  %v4022_v1 = vld [vmem:[%s11112_s27] sm:$0xff] }
0x1568   :  { %8822 = vmatpush3.xpose.msk.msra.mxu1 %vm326_vm2, %v3462_v61  ;;  %8823 = vmatprep.mubr.msk.f32.mxu1 %vm9800_vm1, %v9799_v8  ;;  %v3929_v61 = vld [vmem:[#allocation16 + $0x8] sm:$0xff] }
0x1569   :  { %8831 = vmatprep.subr.mxu1 %v9799_v8  ;;  %v9195_v62 = vpack.c.bf16 %v3929_v61, %v3928_v60 }
0x156b   :  { %8824 = vmatmul.mubr.msk.f32.vlgmr.msra.gmra.mrb[42].mxu1 %vm326_vm2, %v3460_v2  ;;  %v4023_v2 = vld [vmem:[%s11112_s27 + $0x8] sm:$0xff] }
0x156c   :  { %8833 = vmatprep.mubr.msk.f32.mxu1 %vm9800_vm1, %v9799_v8 }
0x1636   :  { %v3296_v3 = vpop.f32.mrb[22].mxu0 }
0x1637   :  { %v8810_v4 = vpop.f32.mrb[23].mxu0  ;;  %8818 = vmatprep.mubr.msk.f32.mxu0 %vm326_vm2, %v3296_v3  ;;  %v4024_v3 = vld [vmem:[%s11112_s27 + $0x10] sm:$0xff] }
0x1638   :  { %v9203_v4 = vpack.c.bf16 %v4023_v2, %v4022_v1 }
0x163a   :  { %v3372_v6 = vpop.f32.mrb[40].mxu1 }
0x163b   :  { %v8815_v9 = vpop.f32.mrb[41].mxu1  ;;  %8819 = vmatmul.mubr.msk.f32.vlgmr.msra.gmra.mrb[20].mxu0 %vm326_vm2, %v3372_v6  ;;  %v4025_v6 = vld [vmem:[%s11112_s27 + $0x18] sm:$0xff] }
0x163c   :  { %8827 = vmatpush3.xpose.msk.msra.mxu0 %vm326_vm2, %v3540_v56  ;;  %8828 = vmatprep.mubr.msk.f32.mxu0 %vm9800_vm1, %v9799_v8  ;;  %v9199_v56 = vpack.c.bf16 %v3931_v0, %v3930_v63  ;;  %v9207_v9 = vpack.c.bf16 %v4025_v6, %v4024_v3  ;;  %v8228_v6 = vld [vmem:[%s11107_s0 + $0x28] sm:$0xff] }
0x163d   :  { %8836 = vmatprep.subr.mxu0 %v9799_v8 }
0x163e   :  { %v3533_v11 = vpop.f32.mrb[42].mxu1 }
0x163f   :  { %v3615_v14 = vmul.f32 0.35355338, %v3533_v11  ;;  %v8825_v17 = vpop.f32.mrb[43].mxu1  ;;  %8829 = vmatmul.mubr.msk.f32.vlgmr.msra.gmra.mrb[24].mxu0 %vm326_vm2, %v3538_v10  ;;  %v4026_v10 = vld [vmem:[%s11112_s27 + $0x20] sm:$0xff]  ;;  %v4027_v11 = vld [vmem:[%s11112_s27 + $0x28] sm:$0xff] }
0x1640   :  { %8838 = vmatprep.mubr.msk.f32.mxu0 %vm9800_vm1, %v9799_v8  ;;  %v4028_v17 = vld [vmem:[%s11112_s27 + $0x30] sm:$0xff] }
0x1641   :  { %v3617_v18 = vsel %vm326_vm2, %v3615_v14, -inf }
0x1642   :  { %3618 = vmax.xlane.f32.xlu1 %v3617_v18  ;;  %v4029_v18 = vld [vmem:[%s11112_s27 + $0x38] sm:$0xff] }
0x16cf   :  { %v3619_v19 = vpop.xlane.xlu1 %3618 }
0x16d0   :  { %v3623_v20 = vsub.f32 %v3615_v14, %v3619_v19  ;;  %v9211_v14 = vpack.c.bf16 %v4027_v11, %v4026_v10  ;;  %v9215_v19 = vpack.c.bf16 %v4029_v18, %v4028_v17  ;;  %v8229_v10 = vld [vmem:[%s11107_s0 + $0x30] sm:$0xff]  ;;  %v8230_v11 = vld [vmem:[%s11107_s0 + $0x38] sm:$0xff] }
0x16d2   :  { %v3625_v21 = vmul.f32 1.442695, %v3623_v20  ;;  %v4030_v20 = vld [vmem:[%s11112_s27 + $0x40] sm:$0xff] }
0x16d4   :  { %9412 = vpow2.f32 %v3625_v21  ;;  %v4031_v21 = vld [vmem:[%s11112_s27 + $0x48] sm:$0xff] }
0x16de   :  { %v9413_v27 = vpop.eup %9412 }
0x16df   :  { %v3629_v28 = vsel %vm326_vm2, %v9413_v27, 0.0 }
0x1712   :  { %v3611_v22 = vpop.f32.mrb[24].mxu0 }
0x1713   :  { %v3616_v23 = vmul.f32 0.35355338, %v3611_v22  ;;  %v8830_v12 = vpop.f32.mrb[25].mxu0  ;;  %v9219_v22 = vpack.c.bf16 %v4031_v21, %v4030_v20 }
0x1714   :  { %v4033_v12 = vld [vmem:[%s11112_s27 + $0x58] sm:$0xff] }
0x1715   :  { %v3620_v25 = vsel %vm326_vm2, %v3616_v23, -inf }
0x1716   :  { %3621 = vmax.xlane.f32.xlu0 %v3620_v25 }
0x171a   :  { %3630 = vadd.xlane.f32.xlu0 %v3629_v28  ;;  %v4035_v28 = vld [vmem:[%s11112_s27 + $0x68] sm:$0xff] }
0x1730   :  { %3639 = vrot.lane.b32.xlu0 %v10337_v26, %s9809_s17 }
0x17a3   :  { %v3622_v29 = vpop.xlane.xlu0 %3621 }
0x17a4   :  { %v3624_v30 = vsub.f32 %v3616_v23, %v3622_v29  ;;  %v4032_v23 = vld [vmem:[%s11112_s27 + $0x50] sm:$0xff] }
0x17a5   :  { %v9223_v25 = vpack.c.bf16 %v4033_v12, %v4032_v23  ;;  %v8225_v12 = vld [vmem:[#allocation13] ss:$0 sm:$0xff] }
0x17a6   :  { %v3627_v13 = vmul.f32 1.442695, %v3624_v30 }
0x17a7   :  { %v3631_v31 = vpop.xlane.xlu0 %3630 }
0x17a8   :  { %9414 = vpow2.f32 %v3627_v13 }
0x17a9   :  { %9416 = vrcp.f32 %v3631_v31 }
0x17ab   :  { %v3640_v32 = vpop.permute.xlu0 %3639 }
0x17ac   :  { %8832 = vmatpush3.msra.mxu1 %v3640_v32 }
0x17ad   :  { %9196 = vmatprep.subr.bf16.mxu1 %v9195_v62 }
0x17b2   :  { %v9415_v33 = vpop.eup %9414 }
0x17b3   :  { %v9417_v34 = vpop.eup %9416  ;;  %v3632_v35 = vsel %vm326_vm2, %v9415_v33, 0.0 }
0x17b4   :  { %v3637_v36 = vmul.f32 %v9417_v34, %v9413_v27  ;;  %3633 = vadd.xlane.f32.xlu1 %v3632_v35  ;;  %v4034_v27 = vld [vmem:[%s11112_s27 + $0x60] sm:$0xff] }
0x17b5   :  { %v9227_v29 = vpack.c.bf16 %v4035_v28, %v4034_v27 }
0x17b6   :  { %8834 = vmatmul.mubr.msk.f32.vlgmr.msra.gmra.mrb[44].mxu1 %vm326_vm2, %v3637_v36  ;;  %v8219_v36 = vld [vmem:[#allocation10] ss:$0 sm:$0xff] }
0x17b7   :  { %9198 = vmatpush3.bf16.msra.mxu1 %v9195_v62 }
0x17b8   :  { %9200 = vmatprep.subr.bf16.mxu1 %v9199_v56 }
0x17bb   :  { %9202 = vmatpush3.bf16.msra.mxu1 %v9199_v56 }
0x17c5   :  { %3715 = vrot.lane.b32.xlu1 %v10332_v24, %s9809_s17 }
0x1841   :  { %v3634_v26 = vpop.xlane.xlu1 %3633 }
0x1842   :  { %9418 = vrcp.f32 %v3634_v26 }
0x1845   :  { %v3716_v38 = vpop.permute.xlu1 %3715 }
0x1846   :  { %8837 = vmatpush3.msra.mxu0 %v3716_v38 }
0x1847   :  { %8841 = vmatprep.subr.mxu0 %v2220_v37 }
0x184c   :  { %v9419_v39 = vpop.eup %9418 }
0x184d   :  { %v3638_v40 = vmul.f32 %v9419_v39, %v9415_v33  ;;  %v8220_v39 = vld [vmem:[#allocation11] ss:$0 sm:$0xff] }
0x184f   :  { %8839 = vmatmul.mubr.msk.f32.vlgmr.msra.gmra.mrb[26].mxu0 %vm326_vm2, %v3638_v40 }
0x1850   :  { %8842 = vmatpush3.msra.mxu0 %v2220_v37 }
0x1851   :  { %9204 = vmatprep.subr.bf16.mxu0 %v9203_v4 }
0x1889   :  { %v3711_v41 = vpop.f32.mrb[44].mxu1 }
0x188a   :  { %v8835_v42 = vpop.f32.mrb[45].mxu1  ;;  %8843 = vmatprep.mubr.msk.f32.mxu0 %vm326_vm2, %v3711_v41 }
0x1922   :  { %v3787_v43 = vpop.f32.mrb[26].mxu0 }
0x1923   :  { %v8840_v24 = vpop.f32.mrb[27].mxu0  ;;  %8844 = vmatmul.mubr.msk.f32.vlgmr.msra.gmra.mrb[20].mxu0 %vm326_vm2, %v3787_v43 }
0x1924   :  { %9206 = vmatpush3.bf16.msra.mxu0 %v9203_v4  ;;  %v4036_v24 = vld [vmem:[%s11112_s27 + $0x70] sm:$0xff]  ;;  %v8227_v4 = vld [vmem:[%s11107_s0 + $0x20] sm:$0xff] }
0x1925   :  { %9208 = vmatprep.subr.bf16.mxu0 %v9207_v9 }
0x1928   :  { %9210 = vmatpush3.bf16.msra.mxu0 %v9207_v9  ;;  %v9235_v9 = vpack.c.bf16 %v8228_v6, %v8227_v4 }
0x1929   :  { %9212 = vmatprep.subr.bf16.mxu0 %v9211_v14 }
0x192a   :  { %9236 = vmatprep.subr.bf16.mxu1 %v9235_v9 }
0x192c   :  { %9214 = vmatpush3.bf16.msra.mxu0 %v9211_v14  ;;  %v9239_v14 = vpack.c.bf16 %v8230_v11, %v8229_v10 }
0x192d   :  { %9216 = vmatprep.subr.bf16.mxu0 %v9215_v19 }
0x1930   :  { %9218 = vmatpush3.bf16.msra.mxu0 %v9215_v19 }
0x1931   :  { %9220 = vmatprep.subr.bf16.mxu0 %v9219_v22 }
0x1934   :  { %9222 = vmatpush3.bf16.msra.mxu0 %v9219_v22 }
0x1935   :  { %9224 = vmatprep.subr.bf16.mxu0 %v9223_v25 }
0x1938   :  { %9226 = vmatpush3.bf16.msra.mxu0 %v9223_v25 }
0x1939   :  { %9228 = vmatprep.subr.bf16.mxu0 %v9227_v29 }
0x193c   :  { %9230 = vmatpush3.bf16.msra.mxu0 %v9227_v29  ;;  %v8226_v29 = vld [vmem:[#allocation14] ss:$0 sm:$0xff] }
0x19f6   :  { %v8845_v45 = vpop.f32.mrb[20].mxu0 }
0x19f7   :  { %v3881_v46 = vadd.f32 %v8845_v45, %v8218_v44  ;;  %v3863_v47 = vpop.f32.mrb[21].mxu0 }
0x19f8   :  { %v3880_v48 = vadd.f32 %v8218_v44, %v3863_v47  ;;  %v4037_v44 = vld [vmem:[%s11112_s27 + $0x78] sm:$0xff] }
0x19f9   :  { %v3883_v49 = vadd.f32 %v3881_v46, %v10318_v16  ;;  %v9231_v45 = vpack.c.bf16 %v4037_v44, %v4036_v24  ;;  %v8221_v46 = vld [vmem:[#allocation17] ss:$0 sm:$0xff] }
0x19fa   :  { %v3882_v7 = vadd.f32 %v3880_v48, %v10316_v15 }
0x19fb   :  { %v3889_v5 = vsel %vm236_vm0, %v3883_v49, 0.0  ;;  %9232 = vmatprep.subr.bf16.mxu0 %v9231_v45 }
0x19fc   :  { %3890 = vadd.xlane.f32.xlu0 %v3889_v5  ;;  %v3886_v50 = vsel %vm236_vm0, %v3882_v7, 0.0  ;;  %9234 = vmatpush3.bf16.msra.mxu0 %v9231_v45 }
0x19fd   :  { %3887 = vadd.xlane.f32.xlu1 %v3886_v50  ;;  %8933 = vmatprep.subr.mxu0 %v9799_v8 }
0x1a89   :  { %v3891_v51 = vpop.xlane.xlu0 %3890 }
0x1a8a   :  { %v3893_v52 = vmul.f32 0.03125, %v3891_v51  ;;  %v3888_v53 = vpop.xlane.xlu1 %3887  ;;  %v8224_v51 = vld [vmem:[#allocation19] ss:$0 sm:$0xff] }
0x1a8b   :  { %v3892_v54 = vmul.f32 0.03125, %v3888_v53 }
0x1a8c   :  { %v10502_v55 = vsub.f32 %v3883_v49, %v3893_v52 }
0x1a8d   :  { %v10504_v57 = vsub.f32 %v3882_v7, %v3892_v54 }
0x1a8e   :  { %v3897_v58 = vmul.f32 %v10502_v55, %v10502_v55 }
0x1a8f   :  { %v3896_v15 = vmul.f32 %v10504_v57, %v10504_v57 }
0x1a90   :  { %v3901_v16 = vsel %vm236_vm0, %v3897_v58, 0.0 }
0x1a91   :  { %3902 = vadd.xlane.f32.xlu1 %v3901_v16  ;;  %v3898_v59 = vsel %vm236_vm0, %v3896_v15, 0.0 }
0x1a92   :  { %3899 = vadd.xlane.f32.xlu0 %v3898_v59 }
0x1b1e   :  { %v3903_v30 = vpop.xlane.xlu1 %3902 }
0x1b1f   :  { %v3905_v13 = vmul.f32 0.03125, %v3903_v30  ;;  %v3900_v31 = vpop.xlane.xlu0 %3899 }
0x1b20   :  { %v3904_v32 = vmul.f32 0.03125, %v3900_v31 }
0x1b21   :  { %v3907_v33 = vadd.f32 1e-05, %v3905_v13 }
0x1b22   :  { %v3906_v34 = vadd.f32 1e-05, %v3904_v32 }
0x1b23   :  { %9420 = vrsqrt.f32 %v3907_v33  ;;  %v8232_v33 = vld [vmem:[%s11108_s16 + $0x1] ss:$0 sm:$0xff] }
0x1b24   :  { %9422 = vrsqrt.f32 %v3906_v34 }
0x1b2d   :  { %v9421_v35 = vpop.eup %9420 }
0x1b2e   :  { %v9423_v26 = vpop.eup %9422  ;;  %v3911_v37 = vmul.f32 %v9421_v35, %v10502_v55 }
0x1b2f   :  { %v3910_v38 = vmul.f32 %v9423_v26, %v10504_v57 }
0x1b30   :  { %v3919_v40 = vmul.f32 %v8219_v36, %v3911_v37 }
0x1b31   :  { %v3918_v41 = vmul.f32 %v8219_v36, %v3910_v38 }
0x1b32   :  { %v3927_v43 = vadd.f32 %v8220_v39, %v3919_v40 }
0x1b33   :  { %v3926_v42 = vadd.f32 %v8220_v39, %v3918_v41 }
0x1b35   :  { %8854 = vmatprep.mubr.msk.f32.mxu1 %vm236_vm0, %v3926_v42 }
0x1b36   :  { %8855 = vmatmul.mubr.msk.f32.vlgmr.msra.gmra.mrb[46].mxu1 %vm236_vm0, %v3927_v43 }
0x1b37   :  { %9238 = vmatpush3.bf16.msra.mxu1 %v9235_v9 }
0x1b38   :  { %9240 = vmatprep.subr.bf16.mxu1 %v9239_v14 }
0x1b3b   :  { %9242 = vmatpush3.bf16.msra.mxu1 %v9239_v14 }
0x1b3c   :  { %8903 = vmatprep.subr.mxu1 %v9799_v8 }
0x1c09   :  { %v8856_v47 = vpop.f32.mrb[46].mxu1 }
0x1c0a   :  { %v4017_v48 = vadd.f32 %v8856_v47, %v8221_v46  ;;  %v4011_v49 = vpop.f32.mrb[47].mxu1 }
0x1c0b   :  { %v4012_v7 = vadd.f32 %v8221_v46, %v4011_v49 }
0x1c0c   :  { %v4021_v50 = vmax.f32 %v4017_v48, 0.0 }
0x1c0d   :  { %v4020_v5 = vmax.f32 %v4012_v7, 0.0 }
0x1c0f   :  { %8889 = vmatprep.mubr.f32.mxu0 %v4020_v5 }
0x1c10   :  { %8890 = vmatmul.mubr.f32.vlgmr.msra.gmra.mrb[28].mxu0 %v4021_v50 }
0x1c11   :  { %8935 = vmatprep.mubr.msk.f32.mxu0 %vm9800_vm1, %v9799_v8 }
0x1ce3   :  { %v8891_v52 = vpop.f32.mrb[28].mxu0 }
0x1ce4   :  { %v4117_v53 = vadd.f32 %v8891_v52, %v8224_v51  ;;  %v4111_v54 = vpop.f32.mrb[29].mxu0 }
0x1ce5   :  { %v4112_v55 = vadd.f32 %v8224_v51, %v4111_v54 }
0x1ce6   :  { %v4121_v57 = vadd.f32 %v4117_v53, %v3927_v43 }
0x1ce7   :  { %v4120_v58 = vadd.f32 %v4112_v55, %v3926_v42 }
0x1ce8   :  { %v4127_v15 = vsel %vm236_vm0, %v4121_v57, 0.0 }
0x1ce9   :  { %4128 = vadd.xlane.f32.xlu1 %v4127_v15  ;;  %v4124_v16 = vsel %vm236_vm0, %v4120_v58, 0.0 }
0x1cea   :  { %4125 = vadd.xlane.f32.xlu0 %v4124_v16 }
0x1d76   :  { %v4129_v59 = vpop.xlane.xlu1 %4128 }
0x1d77   :  { %v4131_v60 = vmul.f32 0.03125, %v4129_v59  ;;  %v4126_v61 = vpop.xlane.xlu0 %4125 }
0x1d78   :  { %v4130_v62 = vmul.f32 0.03125, %v4126_v61 }
0x1d79   :  { %v4133_v63 = vsub.f32 %v4121_v57, %v4131_v60 }
0x1d7a   :  { %v4132_v0 = vsub.f32 %v4120_v58, %v4130_v62 }
0x1d7b   :  { %v4135_v56 = vmul.f32 %v4133_v63, %v4133_v63 }
0x1d7c   :  { %v4134_v1 = vmul.f32 %v4132_v0, %v4132_v0 }
0x1d7d   :  { %v4139_v2 = vsel %vm236_vm0, %v4135_v56, 0.0 }
0x1d7e   :  { %4140 = vadd.xlane.f32.xlu1 %v4139_v2  ;;  %v4136_v3 = vsel %vm236_vm0, %v4134_v1, 0.0 }
0x1d7f   :  { %4137 = vadd.xlane.f32.xlu0 %v4136_v3 }
0x1e0b   :  { %v4141_v17 = vpop.xlane.xlu1 %4140 }
0x1e0c   :  { %v4143_v18 = vmul.f32 0.03125, %v4141_v17  ;;  %v4138_v19 = vpop.xlane.xlu0 %4137 }
0x1e0d   :  { %v4142_v20 = vmul.f32 0.03125, %v4138_v19 }
0x1e0e   :  { %v4145_v21 = vadd.f32 1e-05, %v4143_v18 }
0x1e0f   :  { %v4144_v22 = vadd.f32 1e-05, %v4142_v20 }
0x1e10   :  { %9424 = vrsqrt.f32 %v4145_v21 }
0x1e11   :  { %9426 = vrsqrt.f32 %v4144_v22 }
0x1e1a   :  { %v9425_v23 = vpop.eup %9424 }
0x1e1b   :  { %v9427_v25 = vpop.eup %9426  ;;  %v4149_v27 = vmul.f32 %v9425_v23, %v4133_v63 }
0x1e1c   :  { %v4148_v28 = vmul.f32 %v9427_v25, %v4132_v0 }
0x1e1d   :  { %v4157_v30 = vmul.f32 %v8225_v12, %v4149_v27 }
0x1e1e   :  { %v4156_v13 = vmul.f32 %v8225_v12, %v4148_v28 }
0x1e1f   :  { %v10586_v32 = vadd.f32 %v8226_v29, %v4157_v30 }
0x1e20   :  { %v10584_v31 = vadd.f32 %v8226_v29, %v4156_v13 }
0x1e22   :  { %8900 = vmatprep.mubr.msk.f32.mxu1 %vm236_vm0, %v10584_v31 }
0x1e23   :  { %8901 = vmatmul.mubr.msk.f32.vlgmr.msra.gmra.mrb[48].mxu1 %vm236_vm0, %v10586_v32 }
0x1e24   :  { %8905 = vmatprep.mubr.msk.f32.mxu1 %vm9800_vm1, %v9799_v8 }
0x1ef6   :  { %v8902_v34 = vpop.f32.mrb[48].mxu1 }
0x1ef7   :  { %v10597_v35 = vadd.f32 %v8902_v34, %v8232_v33  ;;  %v4251_v36 = vpop.f32.mrb[49].mxu1 }
0x1ef8   :  { %v10599_v26 = vadd.f32 %v8232_v33, %v4251_v36 }
0x1ef9   :  { %4345 = vrot.lane.b32.xlu1 %v10597_v35, %s9801_s19 }
0x1efa   :  { %4268 = vrot.lane.b32.xlu0 %v10599_v26, %s9801_s19 }
0x1f6b   :  { %v4346_v38 = vpop.permute.xlu1 %4345 }
0x1f6c   :  { %v4269_v37 = vpop.permute.xlu0 %4268 }
0x1f6d   :  { %8904 = vmatpush3.xpose.msk.msra.mxu1 %vm326_vm2, %v4269_v37 }
0x1f6e   :  { %8908 = vmatprep.subr.mxu1 %v9799_v8 }
0x1f70   :  { %8906 = vmatmul.mubr.msk.f32.vlgmr.msra.gmra.mrb[50].mxu1 %vm326_vm2, %v10599_v26 }
0x1f71   :  { %8909 = vmatpush3.xpose.msk.msra.mxu1 %vm326_vm2, %v4346_v38  ;;  %8910 = vmatprep.mubr.msk.f32.mxu1 %vm9800_vm1, %v9799_v8 }
0x1f72   :  { %8913 = vmatprep.subr.mxu1 %v9799_v8 }
0x1f74   :  { %8911 = vmatmul.mubr.msk.f32.vlgmr.msra.gmra.mrb[52].mxu1 %vm326_vm2, %v10597_v35 }
0x1f75   :  { %8915 = vmatprep.mubr.msk.f32.mxu1 %vm9800_vm1, %v9799_v8 }
0x2043   :  { %v4340_v39 = vpop.f32.mrb[50].mxu1 }
0x2044   :  { %v4421_v40 = vmul.f32 0.35355338, %v4340_v39  ;;  %v8907_v41 = vpop.f32.mrb[51].mxu1 }
0x2046   :  { %v4423_v42 = vsel %vm326_vm2, %v4421_v40, -inf }
0x2047   :  { %4424 = vmax.xlane.f32.xlu1 %v4423_v42  ;;  %v4417_v43 = vpop.f32.mrb[52].mxu1 }
0x2048   :  { %v4422_v24 = vmul.f32 0.35355338, %v4417_v43  ;;  %v8912_v44 = vpop.f32.mrb[53].mxu1 }
0x204a   :  { %v4426_v45 = vsel %vm326_vm2, %v4422_v24, -inf }
0x204b   :  { %4427 = vmax.xlane.f32.xlu0 %v4426_v45 }
0x2058   :  { %4521 = vrot.lane.b32.xlu1 %v10597_v35, %s9802_s28 }
0x205c   :  { %4599 = vrot.lane.b32.xlu1 %v10599_v26, %s9804_s1 }
0x20d4   :  { %v4425_v46 = vpop.xlane.xlu1 %4424 }
0x20d5   :  { %v4429_v47 = vsub.f32 %v4421_v40, %v4425_v46 }
0x20d7   :  { %v4431_v48 = vmul.f32 1.442695, %v4429_v47 }
0x20d8   :  { %v4428_v49 = vpop.xlane.xlu0 %4427  ;;  %v4522_v54 = vpop.permute.xlu1 %4521 }
0x20d9   :  { %9428 = vpow2.f32 %v4431_v48  ;;  %v4430_v7 = vsub.f32 %v4422_v24, %v4428_v49 }
0x20db   :  { %v4433_v5 = vmul.f32 1.442695, %v4430_v7 }
0x20dc   :  { %v4600_v55 = vpop.permute.xlu1 %4599 }
0x20dd   :  { %9430 = vpow2.f32 %v4433_v5 }
0x20e3   :  { %v9429_v50 = vpop.eup %9428 }
0x20e4   :  { %v4435_v51 = vsel %vm326_vm2, %v9429_v50, 0.0 }
0x20e5   :  { %4436 = vadd.xlane.f32.xlu0 %v4435_v51  ;;  %v8236_v51 = vld [vmem:[%s11109_s13 + $0x28] sm:$0xff] }
0x20e7   :  { %v9431_v52 = vpop.eup %9430 }
0x20e8   :  { %v4438_v53 = vsel %vm326_vm2, %v9431_v52, 0.0 }
0x20e9   :  { %4439 = vadd.xlane.f32.xlu1 %v4438_v53 }
0x20fa   :  { %4677 = vrot.lane.b32.xlu1 %v10597_v35, %s9804_s1 }
0x20fb   :  { %4445 = vrot.lane.b32.xlu0 %v10599_v26, %s9802_s28 }
0x20ff   :  { %4597 = vrot.lane.b32.xlu0 %v10599_v26, %s9803_s30 }
0x2103   :  { %4675 = vrot.lane.b32.xlu0 %v10597_v35, %s9803_s30 }
0x2172   :  { %v4437_v57 = vpop.xlane.xlu0 %4436 }
0x2173   :  { %9432 = vrcp.f32 %v4437_v57 }
0x2176   :  { %v4440_v58 = vpop.xlane.xlu1 %4439  ;;  %v4446_v15 = vpop.permute.xlu0 %4445 }
0x2177   :  { %9434 = vrcp.f32 %v4440_v58  ;;  %8914 = vmatpush3.msra.mxu1 %v4446_v15 }
0x2178   :  { %8918 = vmatprep.subr.mxu1 %v9799_v8 }
0x217a   :  { %v4598_v62 = vpop.permute.xlu0 %4597  ;;  %v4678_v63 = vpop.permute.xlu1 %4677 }
0x217d   :  { %v9433_v16 = vpop.eup %9432 }
0x217e   :  { %v4443_v59 = vmul.f32 %v9433_v16, %v9429_v50  ;;  %v4676_v0 = vpop.permute.xlu0 %4675 }
0x2180   :  { %8916 = vmatmul.mubr.msk.f32.vlgmr.msra.gmra.mrb[54].mxu1 %vm326_vm2, %v4443_v59 }
0x2181   :  { %v9435_v60 = vpop.eup %9434  ;;  %8919 = vmatpush3.msra.mxu1 %v4522_v54  ;;  %8920 = vmatprep.mubr.msk.f32.mxu1 %vm9800_vm1, %v9799_v8 }
0x2182   :  { %v4444_v61 = vmul.f32 %v9435_v60, %v9431_v52  ;;  %8923 = vmatprep.subr.mxu1 %v9799_v8  ;;  %v8235_v52 = vld [vmem:[%s11109_s13 + $0x20] sm:$0xff] }
0x2184   :  { %8921 = vmatmul.mubr.msk.f32.vlgmr.msra.gmra.mrb[56].mxu1 %vm326_vm2, %v4444_v61 }
0x2185   :  { %8925 = vmatprep.mubr.msk.f32.mxu1 %vm9800_vm1, %v9799_v8 }
0x2188   :  { %8924 = vmatpush3.xpose.msk.msra.mxu1 %vm326_vm2, %v4600_v55 }
0x2189   :  { %8928 = vmatprep.subr.mxu1 %v9799_v8 }
0x218b   :  { %8926 = vmatmul.mubr.msk.f32.vlgmr.msra.gmra.mrb[58].mxu1 %vm326_vm2, %v4598_v62 }
0x218c   :  { %8929 = vmatpush3.xpose.msk.msra.mxu1 %vm326_vm2, %v4678_v63  ;;  %8930 = vmatprep.mubr.msk.f32.mxu1 %vm9800_vm1, %v9799_v8 }
0x218d   :  { %8938 = vmatprep.subr.mxu1 %v9799_v8 }
0x218f   :  { %8931 = vmatmul.mubr.msk.f32.vlgmr.msra.gmra.mrb[60].mxu1 %vm326_vm2, %v4676_v0  ;;  %v8237_v0 = vld [vmem:[%s11109_s13 + $0x30] sm:$0xff] }
0x2190   :  { %8940 = vmatprep.mubr.msk.f32.mxu1 %vm9800_vm1, %v9799_v8 }
0x2253   :  { %v10651_v56 = vpop.f32.mrb[54].mxu1 }
0x2254   :  { %v8917_v1 = vpop.f32.mrb[55].mxu1 }
0x2257   :  { %v10653_v2 = vpop.f32.mrb[56].mxu1 }
0x2258   :  { %v8922_v3 = vpop.f32.mrb[57].mxu1 }
0x225e   :  { %v4671_v4 = vpop.f32.mrb[58].mxu1 }
0x225f   :  { %v8927_v6 = vpop.f32.mrb[59].mxu1  ;;  %v4753_v22 = vmul.f32 0.35355338, %v4671_v4 }
0x2261   :  { %v4755_v23 = vsel %vm326_vm2, %v4753_v22, -inf }
0x2262   :  { %v4749_v9 = vpop.f32.mrb[60].mxu1 }
0x2263   :  { %v4754_v10 = vmul.f32 0.35355338, %v4749_v9  ;;  %v8932_v11 = vpop.f32.mrb[61].mxu1 }
0x2265   :  { %v4758_v14 = vsel %vm326_vm2, %v4754_v10, -inf }
0x2266   :  { %4759 = vmax.xlane.f32.xlu1 %v4758_v14 }
0x2277   :  { %5093 = vrot.lane.b32.xlu1 %v10599_v26, %s9805_s20 }
0x227b   :  { %5091 = vrot.lane.b32.xlu1 %v10599_v26, %s9807_s14 }
0x227f   :  { %5169 = vrot.lane.b32.xlu1 %v10597_v35, %s9807_s14 }
0x22f3   :  { %v4760_v17 = vpop.xlane.xlu1 %4759 }
0x22f4   :  { %v4762_v18 = vsub.f32 %v4754_v10, %v4760_v17 }
0x22f6   :  { %v4765_v19 = vmul.f32 1.442695, %v4762_v18 }
0x22f7   :  { %v5094_v27 = vpop.permute.xlu1 %5093 }
0x22f8   :  { %9436 = vpow2.f32 %v4765_v19 }
0x22fb   :  { %v5092_v30 = vpop.permute.xlu1 %5091 }
0x22ff   :  { %v5170_v33 = vpop.permute.xlu1 %5169 }
0x2302   :  { %v9437_v20 = vpop.eup %9436 }
0x2303   :  { %v4770_v21 = vsel %vm326_vm2, %v9437_v20, 0.0 }
0x2304   :  { %4771 = vadd.xlane.f32.xlu0 %v4770_v21 }
0x231a   :  { %4853 = vrot.lane.b32.xlu0 %v10597_v35, %s9806_s5 }
0x231e   :  { %5171 = vrot.lane.b32.xlu0 %v10597_v35, %s9805_s20 }
0x233d   :  { %4756 = vmax.xlane.f32.xlu0 %v4755_v23 }
0x2353   :  { %4777 = vrot.lane.b32.xlu0 %v10599_v26, %s9806_s5 }
0x2357   :  { %5271 = vrot.lane.b32.xlu0 %v10599_v26, %s9808_s23 }
0x235b   :  { %5508 = vrot.lane.b32.xlu0 %v10599_v26, %s9809_s17 }
0x235f   :  { %5586 = vrot.lane.b32.xlu0 %v10597_v35, %s9809_s17 }
0x2363   :  { %5506 = vrot.lane.b32.xlu0 %v10599_v26, %s9810_s24 }
0x2367   :  { %5584 = vrot.lane.b32.xlu0 %v10597_v35, %s9810_s24 }
0x2391   :  { %v4772_v12 = vpop.xlane.xlu0 %4771 }
0x2392   :  { %9438 = vrcp.f32 %v4772_v12 }
0x2395   :  { %v4854_v25 = vpop.permute.xlu0 %4853 }
0x2396   :  { %8939 = vmatpush3.msra.mxu1 %v4854_v25 }
0x2397   :  { %8953 = vmatprep.subr.mxu1 %v9799_v8 }
0x2399   :  { %v5172_v13 = vpop.permute.xlu0 %5171 }
0x239c   :  { %v9439_v28 = vpop.eup %9438 }
0x239d   :  { %v4776_v29 = vmul.f32 %v9439_v28, %v9437_v20 }
0x239f   :  { %8941 = vmatmul.mubr.msk.f32.vlgmr.msra.gmra.mrb[62].mxu1 %vm326_vm2, %v4776_v29 }
0x23a0   :  { %8954 = vmatpush3.xpose.msk.msra.mxu1 %vm326_vm2, %v5094_v27  ;;  %8955 = vmatprep.mubr.msk.f32.mxu1 %vm9800_vm1, %v9799_v8 }
0x23a1   :  { %8958 = vmatprep.subr.mxu1 %v9799_v8 }
0x23a3   :  { %8956 = vmatmul.mubr.msk.f32.vlgmr.msra.gmra.mrb[64].mxu1 %vm326_vm2, %v5092_v30 }
0x23a4   :  { %8959 = vmatpush3.xpose.msk.msra.mxu1 %vm326_vm2, %v5172_v13  ;;  %8960 = vmatprep.mubr.msk.f32.mxu1 %vm9800_vm1, %v9799_v8 }
0x23a5   :  { %8968 = vmatprep.subr.mxu1 %v9799_v8 }
0x23a7   :  { %8961 = vmatmul.mubr.msk.f32.vlgmr.msra.gmra.mrb[66].mxu1 %vm326_vm2, %v5170_v33 }
0x23a8   :  { %8970 = vmatprep.mubr.msk.f32.mxu1 %vm9800_vm1, %v9799_v8 }
0x23ca   :  { %v4757_v34 = vpop.xlane.xlu0 %4756 }
0x23cb   :  { %v4761_v36 = vsub.f32 %v4753_v22, %v4757_v34 }
0x23cd   :  { %v4763_v37 = vmul.f32 1.442695, %v4761_v36 }
0x23ce   :  { %v4778_v38 = vpop.permute.xlu0 %4777 }
0x23cf   :  { %9440 = vpow2.f32 %v4763_v37  ;;  %8934 = vmatpush3.msra.mxu0 %v4778_v38 }
0x23d0   :  { %8943 = vmatprep.subr.mxu0 %v8236_v51 }
0x23d2   :  { %v5272_v1 = vpop.permute.xlu0 %5271 }
0x23d6   :  { %v5509_v6 = vpop.permute.xlu0 %5508 }
0x23d9   :  { %v9441_v39 = vpop.eup %9440 }
0x23da   :  { %v4767_v40 = vsel %vm326_vm2, %v9441_v39, 0.0 }
0x23db   :  { %4768 = vadd.xlane.f32.xlu1 %v4767_v40 }
0x2468   :  { %v4769_v41 = vpop.xlane.xlu1 %4768 }
0x2469   :  { %9442 = vrcp.f32 %v4769_v41 }
0x2472   :  { %v4925_v42 = vpop.f32.mrb[62].mxu1 }
0x2473   :  { %v9443_v43 = vpop.eup %9442  ;;  %v8942_v24 = vpop.f32.mrb[63].mxu1 }
0x2474   :  { %v4775_v44 = vmul.f32 %v9443_v43, %v9441_v39 }
0x2476   :  { %8936 = vmatmul.mubr.msk.f32.vlgmr.msra.gmra.mrb[30].mxu0 %vm326_vm2, %v4775_v44  ;;  %v5165_v45 = vpop.f32.mrb[64].mxu1 }
0x2477   :  { %v5247_v46 = vmul.f32 0.35355338, %v5165_v45  ;;  %v8957_v47 = vpop.f32.mrb[65].mxu1  ;;  %8944 = vmatpush3.msra.mxu0 %v8236_v51 }
0x2478   :  { %8948 = vmatprep.subr.mxu0 %v8235_v52  ;;  %v8238_v47 = vld [vmem:[%s11109_s13 + $0x38] sm:$0xff] }
0x2479   :  { %v5249_v48 = vsel %vm326_vm2, %v5247_v46, -inf }
0x247a   :  { %5250 = vmax.xlane.f32.xlu1 %v5249_v48  ;;  %v5243_v49 = vpop.f32.mrb[66].mxu1 }
0x247b   :  { %v5248_v7 = vmul.f32 0.35355338, %v5243_v49  ;;  %v8962_v5 = vpop.f32.mrb[67].mxu1 }
0x247d   :  { %v5252_v50 = vsel %vm326_vm2, %v5248_v7, -inf }
0x247e   :  { %5253 = vmax.xlane.f32.xlu1 %v5252_v50 }
0x2507   :  { %v5251_v53 = vpop.xlane.xlu1 %5250 }
0x2508   :  { %v5255_v54 = vsub.f32 %v5247_v46, %v5251_v53  ;;  %v8272_v53 = vld [vmem:[%s11110_s18 + $0x1] ss:$0 sm:$0xff] }
0x250a   :  { %v5257_v55 = vmul.f32 1.442695, %v5255_v54 }
0x250b   :  { %v5254_v57 = vpop.xlane.xlu1 %5253 }
0x250c   :  { %9444 = vpow2.f32 %v5257_v55  ;;  %v5256_v58 = vsub.f32 %v5248_v7, %v5254_v57 }
0x250e   :  { %v5259_v15 = vmul.f32 1.442695, %v5256_v58 }
0x2510   :  { %9446 = vpow2.f32 %v5259_v15 }
0x2516   :  { %v9445_v16 = vpop.eup %9444 }
0x2517   :  { %v5261_v59 = vsel %vm326_vm2, %v9445_v16, 0.0 }
0x2518   :  { %5262 = vadd.xlane.f32.xlu1 %v5261_v59 }
0x251a   :  { %v9447_v60 = vpop.eup %9446 }
0x251b   :  { %v5264_v61 = vsel %vm326_vm2, %v9447_v60, 0.0 }
0x251c   :  { %5265 = vadd.xlane.f32.xlu1 %v5264_v61 }
0x252d   :  { %5347 = vrot.lane.b32.xlu1 %v10597_v35, %s9808_s23  ;;  %s11113_s23 = smov 40  }
0x2549   :  { %v4849_v62 = vpop.f32.mrb[30].mxu0 }
0x254a   :  { %v8937_v63 = vpop.f32.mrb[31].mxu0  ;;  %8945 = vmatprep.mubr.msk.f32.mxu0 %vm326_vm2, %v4849_v62 }
0x254b   :  { %8946 = vmatmul.mubr.msk.f32.vlgmr.msra.gmra.mrb[32].mxu0 %vm326_vm2, %v4925_v42 }
0x254c   :  { %8950 = vmatprep.mubr.msk.f32.mxu0 %vm326_vm2, %v10651_v56  ;;  %8949 = vmatpush3.msra.mxu0 %v8235_v52  ;;  %v9504_v52 = vld [vmem:[#allocation5] sm:$0xff] }
0x254d   :  { %8963 = vmatprep.subr.mxu0 %v9799_v8 }
0x2553   :  { %8951 = vmatmul.mubr.msk.f32.vlgmr.msra.gmra.mrb[32].mxu0 %vm326_vm2, %v10653_v2  ;;  %v5587_v2 = vpop.permute.xlu0 %5586 }
0x2554   :  { %8964 = vmatpush3.msra.mxu0 %v5272_v1  ;;  %8965 = vmatprep.mubr.msk.f32.mxu0 %vm9800_vm1, %v9799_v8 }
0x2555   :  { %8973 = vmatprep.subr.mxu0 %v8237_v0 }
0x2557   :  { %v5507_v17 = vpop.permute.xlu0 %5506 }
0x255b   :  { %v5585_v22 = vpop.permute.xlu0 %5584 }
0x25a5   :  { %v5263_v3 = vpop.xlane.xlu1 %5262 }
0x25a6   :  { %9448 = vrcp.f32 %v5263_v3 }
0x25a9   :  { %v5266_v4 = vpop.xlane.xlu1 %5265 }
0x25aa   :  { %9450 = vrcp.f32 %v5266_v4 }
0x25ad   :  { %v5348_v56 = vpop.permute.xlu1 %5347 }
0x25ae   :  { %8969 = vmatpush3.msra.mxu1 %v5348_v56 }
0x25af   :  { %8978 = vmatprep.subr.mxu1 %v9799_v8 }
0x25b0   :  { %v9449_v9 = vpop.eup %9448 }
0x25b1   :  { %v5269_v10 = vmul.f32 %v9449_v9, %v9445_v16  ;;  %v8284_v9 = vld [vmem:[%s11068_s8 + $0x28] sm:$0xff] }
0x25b3   :  { %8966 = vmatmul.mubr.msk.f32.vlgmr.msra.gmra.mrb[34].mxu0 %vm326_vm2, %v5269_v10 }
0x25b4   :  { %v9451_v11 = vpop.eup %9450  ;;  %8974 = vmatpush3.msra.mxu0 %v8237_v0 }
0x25b5   :  { %v5270_v14 = vmul.f32 %v9451_v11, %v9447_v60  ;;  %8983 = vmatprep.subr.mxu0 %v9799_v8  ;;  %v8275_v11 = vld [vmem:[%s11111_s29 + $0x20] sm:$0xff] }
0x25b7   :  { %8971 = vmatmul.mubr.msk.f32.vlgmr.msra.gmra.mrb[68].mxu1 %vm326_vm2, %v5270_v14  ;;  %v8285_v14 = vld [vmem:[%s11068_s8 + $0x30] sm:$0xff] }
0x25b8   :  { %8979 = vmatpush3.xpose.msk.msra.mxu1 %vm326_vm2, %v5509_v6  ;;  %8980 = vmatprep.mubr.msk.f32.mxu1 %vm9800_vm1, %v9799_v8 }
0x25b9   :  { %8988 = vmatprep.subr.mxu1 %v9799_v8 }
0x25bb   :  { %8981 = vmatmul.mubr.msk.f32.vlgmr.msra.gmra.mrb[70].mxu1 %vm326_vm2, %v5507_v17 }
0x25bc   :  { %8990 = vmatprep.mubr.msk.f32.mxu1 %vm9800_vm1, %v9799_v8 }
0x2686   :  { %v5343_v18 = vpop.f32.mrb[34].mxu0 }
0x2687   :  { %v8967_v19 = vpop.f32.mrb[35].mxu0  ;;  %8975 = vmatprep.mubr.msk.f32.mxu0 %vm326_vm2, %v5343_v18  ;;  %v8286_v18 = vld [vmem:[%s11068_s8 + $0x38] sm:$0xff] }
0x2688   :  { %v9255_v19 = vpack.c.bf16 %v8286_v18, %v8285_v14 }
0x268a   :  { %v5419_v20 = vpop.f32.mrb[68].mxu1 }
0x268b   :  { %v8972_v21 = vpop.f32.mrb[69].mxu1  ;;  %8976 = vmatmul.mubr.msk.f32.vlgmr.msra.gmra.mrb[32].mxu0 %vm326_vm2, %v5419_v20  ;;  %v8277_v20 = vld [vmem:[%s11111_s29 + $0x30] sm:$0xff] }
0x268c   :  { %8984 = vmatpush3.xpose.msk.msra.mxu0 %vm326_vm2, %v5587_v2  ;;  %8985 = vmatprep.mubr.msk.f32.mxu0 %vm9800_vm1, %v9799_v8  ;;  %v8276_v2 = vld [vmem:[%s11111_s29 + $0x28] sm:$0xff]  ;;  %v8278_v21 = vld [vmem:[%s11111_s29 + $0x38] sm:$0xff] }
0x268d   :  { %8993 = vmatprep.subr.mxu0 %v9799_v8  ;;  %v9243_v17 = vpack.c.bf16 %v8276_v2, %v8275_v11 }
0x268e   :  { %v5580_v23 = vpop.f32.mrb[70].mxu1 }
0x268f   :  { %v5662_v12 = vmul.f32 0.35355338, %v5580_v23  ;;  %v8982_v25 = vpop.f32.mrb[71].mxu1  ;;  %8986 = vmatmul.mubr.msk.f32.vlgmr.msra.gmra.mrb[36].mxu0 %vm326_vm2, %v5585_v22  ;;  %v9247_v22 = vpack.c.bf16 %v8278_v21, %v8277_v20  ;;  %v9505_v23 = vld [vmem:[#allocation5 + $0x8] sm:$0xff] }
0x2690   :  { %8995 = vmatprep.mubr.msk.f32.mxu0 %vm9800_vm1, %v9799_v8 }
0x2691   :  { %v5664_v27 = vsel %vm326_vm2, %v5662_v12, -inf }
0x2692   :  { %5665 = vmax.xlane.f32.xlu1 %v5664_v27 }
0x271f   :  { %v5666_v28 = vpop.xlane.xlu1 %5665 }
0x2720   :  { %v5670_v29 = vsub.f32 %v5662_v12, %v5666_v28 }
0x2722   :  { %v5672_v30 = vmul.f32 1.442695, %v5670_v29 }
0x2724   :  { %9452 = vpow2.f32 %v5672_v30 }
0x272e   :  { %v9453_v37 = vpop.eup %9452 }
0x272f   :  { %v5676_v38 = vsel %vm326_vm2, %v9453_v37, 0.0 }
0x2762   :  { %v5658_v13 = vpop.f32.mrb[36].mxu0 }
0x2763   :  { %v5663_v33 = vmul.f32 0.35355338, %v5658_v13  ;;  %v8987_v34 = vpop.f32.mrb[37].mxu0 }
0x2765   :  { %v5667_v36 = vsel %vm326_vm2, %v5663_v33, -inf }
0x2766   :  { %5668 = vmax.xlane.f32.xlu0 %v5667_v36 }
0x276a   :  { %5677 = vadd.xlane.f32.xlu0 %v5676_v38  ;;  %v8274_v38 = vld [vmem:[#allocation8 + $0x1] ss:$0 sm:$0xff] }
0x2780   :  { %5686 = vrot.lane.b32.xlu0 %v10599_v26, %s11113_s23 }
0x27f3   :  { %v5669_v39 = vpop.xlane.xlu0 %5668 }
0x27f4   :  { %v5671_v40 = vsub.f32 %v5663_v33, %v5669_v39  ;;  %v8273_v33 = vld [vmem:[#allocation7 + $0x1] ss:$0 sm:$0xff] }
0x27f6   :  { %v5674_v41 = vmul.f32 1.442695, %v5671_v40 }
0x27f7   :  { %v5678_v42 = vpop.xlane.xlu0 %5677 }
0x27f8   :  { %9454 = vpow2.f32 %v5674_v41 }
0x27f9   :  { %9456 = vrcp.f32 %v5678_v42 }
0x27fb   :  { %v5687_v43 = vpop.permute.xlu0 %5686 }
0x27fc   :  { %8989 = vmatpush3.msra.mxu1 %v5687_v43  ;;  %v8288_v43 = vld [vmem:[%s11069_s9 + $0x1] ss:$0 sm:$0xff] }
0x27fd   :  { %9244 = vmatprep.subr.bf16.mxu1 %v9243_v17 }
0x2802   :  { %v9455_v24 = vpop.eup %9454 }
0x2803   :  { %v9457_v44 = vpop.eup %9456  ;;  %v5679_v45 = vsel %vm326_vm2, %v9455_v24, 0.0 }
0x2804   :  { %v5684_v46 = vmul.f32 %v9457_v44, %v9453_v37  ;;  %5680 = vadd.xlane.f32.xlu1 %v5679_v45 }
0x2806   :  { %8991 = vmatmul.mubr.msk.f32.vlgmr.msra.gmra.mrb[72].mxu1 %vm326_vm2, %v5684_v46 }
0x2807   :  { %9246 = vmatpush3.bf16.msra.mxu1 %v9243_v17 }
0x2808   :  { %9248 = vmatprep.subr.bf16.mxu1 %v9247_v22 }
0x280b   :  { %9250 = vmatpush3.bf16.msra.mxu1 %v9247_v22 }
0x280c   :  { %9025 = vmatprep.subr.mxu1 %v9799_v8 }
0x2815   :  { %5762 = vrot.lane.b32.xlu1 %v10597_v35, %s11113_s23 }
0x2891   :  { %v5681_v26 = vpop.xlane.xlu1 %5680 }
0x2892   :  { %9458 = vrcp.f32 %v5681_v26  ;;  %v8280_v26 = vld [vmem:[%s11067_s7 + $0x1] ss:$0 sm:$0xff] }
0x2895   :  { %v5763_v48 = vpop.permute.xlu1 %5762 }
0x2896   :  { %8994 = vmatpush3.msra.mxu0 %v5763_v48 }
0x2897   :  { %8998 = vmatprep.subr.mxu0 %v8238_v47 }
0x289c   :  { %v9459_v49 = vpop.eup %9458 }
0x289d   :  { %v5685_v7 = vmul.f32 %v9459_v49, %v9455_v24 }
0x289f   :  { %8996 = vmatmul.mubr.msk.f32.vlgmr.msra.gmra.mrb[38].mxu0 %vm326_vm2, %v5685_v7 }
0x28a0   :  { %8999 = vmatpush3.msra.mxu0 %v8238_v47 }
0x28d9   :  { %v5758_v5 = vpop.f32.mrb[72].mxu1 }
0x28da   :  { %v8992_v50 = vpop.f32.mrb[73].mxu1  ;;  %9000 = vmatprep.mubr.msk.f32.mxu0 %vm326_vm2, %v5758_v5 }
0x2972   :  { %v5834_v51 = vpop.f32.mrb[38].mxu0 }
0x2973   :  { %v8997_v35 = vpop.f32.mrb[39].mxu0  ;;  %9001 = vmatmul.mubr.msk.f32.vlgmr.msra.gmra.mrb[32].mxu0 %vm326_vm2, %v5834_v51 }
0x2974   :  { %9022 = vmatprep.mubr.msk.f32.mxu0 %vm236_vm0, %v9504_v52 }
0x2a46   :  { %v9002_v54 = vpop.f32.mrb[32].mxu0 }
0x2a47   :  { %v5928_v55 = vadd.f32 %v9002_v54, %v8272_v53  ;;  %v5910_v57 = vpop.f32.mrb[33].mxu0 }
0x2a48   :  { %v5927_v58 = vadd.f32 %v8272_v53, %v5910_v57 }
0x2a49   :  { %v5930_v15 = vadd.f32 %v5928_v55, %v10586_v32 }
0x2a4a   :  { %v5929_v16 = vadd.f32 %v5927_v58, %v10584_v31  ;;  %v8283_v31 = vld [vmem:[%s11068_s8 + $0x20] sm:$0xff] }
0x2a4b   :  { %v5938_v59 = vsel %vm236_vm0, %v5930_v15, 0.0  ;;  %v9251_v10 = vpack.c.bf16 %v8284_v9, %v8283_v31 }
0x2a4c   :  { %5939 = vadd.xlane.f32.xlu0 %v5938_v59  ;;  %v5935_v60 = vsel %vm236_vm0, %v5929_v16, 0.0 }
0x2a4d   :  { %5936 = vadd.xlane.f32.xlu1 %v5935_v60  ;;  %9252 = vmatprep.subr.bf16.mxu0 %v9251_v10 }
0x2a4e   :  { %9254 = vmatpush3.bf16.msra.mxu0 %v9251_v10 }
0x2a4f   :  { %9256 = vmatprep.subr.bf16.mxu0 %v9255_v19 }
0x2a52   :  { %9258 = vmatpush3.bf16.msra.mxu0 %v9255_v19 }
0x2a53   :  { %9035 = vmatprep.subr.mxu0 %v9799_v8 }
0x2a55   :  { %9023 = vmatmul.mubr.msk.f32.vlgmr.msra.gmra.mrb[40].mxu0 %vm236_vm0, %v9505_v23 }
0x2a56   :  { %9037 = vmatprep.mubr.msk.f32.mxu0 %vm9800_vm1, %v9799_v8 }
0x2ad9   :  { %v5940_v61 = vpop.xlane.xlu0 %5939 }
0x2ada   :  { %v5942_v62 = vmul.f32 0.03125, %v5940_v61  ;;  %v5937_v63 = vpop.xlane.xlu1 %5936 }
0x2adb   :  { %v5941_v0 = vmul.f32 0.03125, %v5937_v63 }
0x2adc   :  { %v5944_v1 = vsub.f32 %v5930_v15, %v5942_v62 }
0x2add   :  { %v5943_v3 = vsub.f32 %v5929_v16, %v5941_v0 }
0x2ade   :  { %v5946_v4 = vmul.f32 %v5944_v1, %v5944_v1 }
0x2adf   :  { %v5945_v56 = vmul.f32 %v5943_v3, %v5943_v3 }
0x2ae0   :  { %v5950_v6 = vsel %vm236_vm0, %v5946_v4, 0.0 }
0x2ae1   :  { %5951 = vadd.xlane.f32.xlu1 %v5950_v6  ;;  %v5947_v32 = vsel %vm236_vm0, %v5945_v56, 0.0 }
0x2ae2   :  { %5948 = vadd.xlane.f32.xlu0 %v5947_v32 }
0x2b28   :  { %v9024_v24 = vpop.f32.mrb[40].mxu0 }
0x2b29   :  { %v10807_v44 = vadd.f32 %v9024_v24, %v8288_v43  ;;  %v6150_v45 = vpop.f32.mrb[41].mxu0 }
0x2b2a   :  { %v10809_v46 = vadd.f32 %v8288_v43, %v6150_v45 }
0x2b2b   :  { %6574 = vrot.lane.b32.xlu1 %v10807_v44, %s9803_s30 }
0x2b6e   :  { %v5952_v12 = vpop.xlane.xlu1 %5951 }
0x2b6f   :  { %v5954_v25 = vmul.f32 0.03125, %v5952_v12  ;;  %v5949_v27 = vpop.xlane.xlu0 %5948 }
0x2b70   :  { %v5953_v28 = vmul.f32 0.03125, %v5949_v27 }
0x2b71   :  { %v5956_v29 = vadd.f32 1e-05, %v5954_v25 }
0x2b72   :  { %v5955_v30 = vadd.f32 1e-05, %v5953_v28 }
0x2b73   :  { %9460 = vrsqrt.f32 %v5956_v29 }
0x2b74   :  { %9462 = vrsqrt.f32 %v5955_v30 }
0x2b7d   :  { %v9461_v13 = vpop.eup %9460 }
0x2b7e   :  { %v9463_v34 = vpop.eup %9462  ;;  %v5960_v36 = vmul.f32 %v9461_v13, %v5944_v1 }
0x2b7f   :  { %v5959_v37 = vmul.f32 %v9463_v34, %v5943_v3 }
0x2b80   :  { %v5968_v39 = vmul.f32 %v8273_v33, %v5960_v36 }
0x2b81   :  { %v5967_v40 = vmul.f32 %v8273_v33, %v5959_v37 }
0x2b82   :  { %v10796_v42 = vadd.f32 %v8274_v38, %v5968_v39 }
0x2b83   :  { %v10794_v41 = vadd.f32 %v8274_v38, %v5967_v40 }
0x2b85   :  { %9011 = vmatprep.mubr.msk.f32.mxu1 %vm236_vm0, %v10794_v41 }
0x2b86   :  { %9012 = vmatmul.mubr.msk.f32.vlgmr.msra.gmra.mrb[74].mxu1 %vm236_vm0, %v10796_v42 }
0x2b87   :  { %9027 = vmatprep.mubr.msk.f32.mxu1 %vm9800_vm1, %v9799_v8  ;;  %9026 = vmatpush3.xpose.msk.msra.mxu1 %vm326_vm2, %v10809_v46 }
0x2b88   :  { %9030 = vmatprep.subr.mxu1 %v9799_v8 }
0x2b9d   :  { %v6575_v4 = vpop.permute.xlu1 %6574 }
0x2c59   :  { %v9013_v47 = vpop.f32.mrb[74].mxu1 }
0x2c5a   :  { %v6062_v48 = vpop.f32.mrb[75].mxu1  ;;  %v10827_v7 = vadd.f32 %v9013_v47, %v8280_v26 }
0x2c5b   :  { %v10819_v49 = vadd.f32 %v8280_v26, %v6062_v48 }
0x2c5d   :  { %9028 = vmatmul.mubr.msk.f32.vlgmr.msra.gmra.mrb[76].mxu1 %vm326_vm2, %v10819_v49 }
0x2c5e   :  { %9031 = vmatpush3.xpose.msk.msra.mxu1 %vm326_vm2, %v10807_v44  ;;  %9032 = vmatprep.mubr.msk.f32.mxu1 %vm9800_vm1, %v9799_v8 }
0x2c5f   :  { %9040 = vmatprep.subr.mxu1 %v9799_v8 }
0x2c61   :  { %9033 = vmatmul.mubr.msk.f32.vlgmr.msra.gmra.mrb[78].mxu1 %vm326_vm2, %v10827_v7 }
0x2c62   :  { %9042 = vmatprep.mubr.msk.f32.mxu1 %vm9800_vm1, %v9799_v8 }
0x2d30   :  { %v6238_v5 = vpop.f32.mrb[76].mxu1 }
0x2d31   :  { %v9029_v50 = vpop.f32.mrb[77].mxu1  ;;  %v6318_v54 = vmul.f32 0.35355338, %v6238_v5 }
0x2d33   :  { %v6320_v55 = vsel %vm326_vm2, %v6318_v54, -inf }
0x2d34   :  { %v6314_v51 = vpop.f32.mrb[78].mxu1 }
0x2d35   :  { %v6319_v35 = vmul.f32 0.35355338, %v6314_v51  ;;  %v9034_v52 = vpop.f32.mrb[79].mxu1 }
0x2d37   :  { %v6323_v53 = vsel %vm326_vm2, %v6319_v35, -inf }
0x2d38   :  { %6324 = vmax.xlane.f32.xlu0 %v6323_v53 }
0x2d4e   :  { %6418 = vrot.lane.b32.xlu0 %v10807_v44, %s9801_s19 }
0x2d6d   :  { %6321 = vmax.xlane.f32.xlu0 %v6320_v55 }
0x2d83   :  { %6342 = vrot.lane.b32.xlu0 %v10809_v46, %s9801_s19 }
0x2d87   :  { %6494 = vrot.lane.b32.xlu0 %v10819_v49, %s9803_s30 }
0x2dc5   :  { %v6325_v57 = vpop.xlane.xlu0 %6324 }
0x2dc6   :  { %v6327_v58 = vsub.f32 %v6319_v35, %v6325_v57 }
0x2dc8   :  { %v6330_v15 = vmul.f32 1.442695, %v6327_v58 }
0x2dc9   :  { %v6419_v16 = vpop.permute.xlu0 %6418 }
0x2dca   :  { %9464 = vpow2.f32 %v6330_v15  ;;  %9041 = vmatpush3.msra.mxu1 %v6419_v16 }
0x2dcb   :  { %9050 = vmatprep.subr.mxu1 %v9799_v8 }
0x2dd4   :  { %v9465_v59 = vpop.eup %9464 }
0x2dd5   :  { %v6335_v60 = vsel %vm326_vm2, %v9465_v59, 0.0 }
0x2dd6   :  { %6336 = vadd.xlane.f32.xlu1 %v6335_v60 }
0x2de7   :  { %6572 = vrot.lane.b32.xlu1 %v10827_v7, %s9803_s30 }
0x2dfa   :  { %v6322_v61 = vpop.xlane.xlu0 %6321 }
0x2dfb   :  { %v6326_v62 = vsub.f32 %v6318_v54, %v6322_v61 }
0x2dfd   :  { %v6328_v63 = vmul.f32 1.442695, %v6326_v62  ;;  %v8292_v62 = vld [vmem:[%s11070_s10 + $0x28] sm:$0xff] }
0x2dfe   :  { %v6343_v0 = vpop.permute.xlu0 %6342 }
0x2dff   :  { %9466 = vpow2.f32 %v6328_v63  ;;  %9036 = vmatpush3.msra.mxu0 %v6343_v0  ;;  %v8291_v63 = vld [vmem:[%s11070_s10 + $0x20] sm:$0xff] }
0x2e00   :  { %9045 = vmatprep.subr.mxu0 %v9799_v8 }
0x2e02   :  { %v6495_v14 = vpop.permute.xlu0 %6494 }
0x2e09   :  { %v9467_v1 = vpop.eup %9466 }
0x2e0a   :  { %v6332_v3 = vsel %vm326_vm2, %v9467_v1, 0.0 }
0x2e0b   :  { %6333 = vadd.xlane.f32.xlu1 %v6332_v3 }
0x2e1c   :  { %6496 = vrot.lane.b32.xlu1 %v10809_v46, %s9803_s30 }
0x2e63   :  { %v6337_v56 = vpop.xlane.xlu1 %6336 }
0x2e64   :  { %9468 = vrcp.f32 %v6337_v56 }
0x2e67   :  { %v6573_v31 = vpop.permute.xlu1 %6572 }
0x2e6e   :  { %v9469_v6 = vpop.eup %9468 }
0x2e6f   :  { %v6341_v32 = vmul.f32 %v9469_v6, %v9465_v59 }
0x2e71   :  { %9043 = vmatmul.mubr.msk.f32.vlgmr.msra.gmra.mrb[80].mxu1 %vm326_vm2, %v6341_v32 }
0x2e72   :  { %9051 = vmatpush3.xpose.msk.msra.mxu1 %vm326_vm2, %v6575_v4  ;;  %9052 = vmatprep.mubr.msk.f32.mxu1 %vm9800_vm1, %v9799_v8 }
0x2e73   :  { %9060 = vmatprep.subr.mxu1 %v9799_v8 }
0x2e75   :  { %9053 = vmatmul.mubr.msk.f32.vlgmr.msra.gmra.mrb[82].mxu1 %vm326_vm2, %v6573_v31 }
0x2e76   :  { %9062 = vmatprep.mubr.msk.f32.mxu1 %vm9800_vm1, %v9799_v8 }
0x2e98   :  { %v6334_v9 = vpop.xlane.xlu1 %6333 }
0x2e99   :  { %9470 = vrcp.f32 %v6334_v9 }
0x2e9c   :  { %v6497_v2 = vpop.permute.xlu1 %6496 }
0x2ea3   :  { %v9471_v10 = vpop.eup %9470 }
0x2ea4   :  { %v6340_v11 = vmul.f32 %v9471_v10, %v9467_v1 }
0x2ea6   :  { %9038 = vmatmul.mubr.msk.f32.vlgmr.msra.gmra.mrb[42].mxu0 %vm326_vm2, %v6340_v11 }
0x2ea7   :  { %9046 = vmatpush3.xpose.msk.msra.mxu0 %vm326_vm2, %v6497_v2  ;;  %9047 = vmatprep.mubr.msk.f32.mxu0 %vm9800_vm1, %v9799_v8 }
0x2ea8   :  { %9055 = vmatprep.subr.mxu0 %v9799_v8 }
0x2eaa   :  { %9048 = vmatmul.mubr.msk.f32.vlgmr.msra.gmra.mrb[44].mxu0 %vm326_vm2, %v6495_v14  ;;  %v8293_v14 = vld [vmem:[%s11070_s10 + $0x30] sm:$0xff] }
0x2eab   :  { %9057 = vmatprep.mubr.msk.f32.mxu0 %vm9800_vm1, %v9799_v8 }
0x2f44   :  { %v10866_v17 = vpop.f32.mrb[80].mxu1 }
0x2f45   :  { %v9044_v18 = vpop.f32.mrb[81].mxu1 }
0x2f48   :  { %v6646_v19 = vpop.f32.mrb[82].mxu1 }
0x2f49   :  { %v6651_v20 = vmul.f32 0.35355338, %v6646_v19  ;;  %v9054_v21 = vpop.f32.mrb[83].mxu1 }
0x2f4b   :  { %v6655_v22 = vsel %vm326_vm2, %v6651_v20, -inf }
0x2f4c   :  { %6656 = vmax.xlane.f32.xlu1 %v6655_v22 }
0x2f5d   :  { %6990 = vrot.lane.b32.xlu1 %v10809_v46, %s9807_s14 }
0x2f61   :  { %6988 = vrot.lane.b32.xlu1 %v10819_v49, %s9807_s14 }
0x2f65   :  { %7066 = vrot.lane.b32.xlu1 %v10827_v7, %s9807_s14 }
0x2f79   :  { %v10875_v23 = vpop.f32.mrb[42].mxu0 }
0x2f7a   :  { %v9039_v12 = vpop.f32.mrb[43].mxu0 }
0x2f7d   :  { %v6568_v25 = vpop.f32.mrb[44].mxu0 }
0x2f7e   :  { %v9049_v27 = vpop.f32.mrb[45].mxu0  ;;  %v6650_v34 = vmul.f32 0.35355338, %v6568_v25 }
0x2f80   :  { %v6652_v36 = vsel %vm326_vm2, %v6650_v34, -inf }
0x2fd9   :  { %v6657_v28 = vpop.xlane.xlu1 %6656 }
0x2fda   :  { %v6659_v29 = vsub.f32 %v6651_v20, %v6657_v28 }
0x2fdc   :  { %v6662_v30 = vmul.f32 1.442695, %v6659_v29 }
0x2fdd   :  { %v6991_v39 = vpop.permute.xlu1 %6990 }
0x2fde   :  { %9472 = vpow2.f32 %v6662_v30 }
0x2fe1   :  { %v6989_v24 = vpop.permute.xlu1 %6988 }
0x2fe5   :  { %v7067_v26 = vpop.permute.xlu1 %7066 }
0x2fe8   :  { %v9473_v13 = vpop.eup %9472 }
0x2fe9   :  { %v6667_v33 = vsel %vm326_vm2, %v9473_v13, 0.0 }
0x2fea   :  { %6668 = vadd.xlane.f32.xlu0 %v6667_v33 }
0x3000   :  { %6750 = vrot.lane.b32.xlu0 %v10807_v44, %s9804_s1 }
0x3004   :  { %7068 = vrot.lane.b32.xlu0 %v10807_v44, %s9807_s14 }
0x3023   :  { %6653 = vmax.xlane.f32.xlu0 %v6652_v36 }
0x3039   :  { %6674 = vrot.lane.b32.xlu0 %v10809_v46, %s9804_s1 }
0x303d   :  { %7168 = vrot.lane.b32.xlu0 %v10809_v46, %s9805_s20 }
0x3041   :  { %7405 = vrot.lane.b32.xlu0 %v10809_v46, %s9810_s24 }
0x3045   :  { %7483 = vrot.lane.b32.xlu0 %v10807_v44, %s9810_s24 }
0x3049   :  { %7403 = vrot.lane.b32.xlu0 %v10819_v49, %s9810_s24 }
0x304d   :  { %7481 = vrot.lane.b32.xlu0 %v10827_v7, %s9810_s24 }
0x3077   :  { %v6669_v37 = vpop.xlane.xlu0 %6668 }
0x3078   :  { %9474 = vrcp.f32 %v6669_v37 }
0x307b   :  { %v6751_v38 = vpop.permute.xlu0 %6750 }
0x307c   :  { %9061 = vmatpush3.msra.mxu1 %v6751_v38 }
0x307d   :  { %9075 = vmatprep.subr.mxu1 %v9799_v8 }
0x307f   :  { %v7069_v45 = vpop.permute.xlu0 %7068 }
0x3082   :  { %v9475_v40 = vpop.eup %9474 }
0x3083   :  { %v6673_v43 = vmul.f32 %v9475_v40, %v9473_v13 }
0x3085   :  { %9063 = vmatmul.mubr.msk.f32.vlgmr.msra.gmra.mrb[84].mxu1 %vm326_vm2, %v6673_v43 }
0x3086   :  { %9076 = vmatpush3.xpose.msk.msra.mxu1 %vm326_vm2, %v6991_v39  ;;  %9077 = vmatprep.mubr.msk.f32.mxu1 %vm9800_vm1, %v9799_v8 }
0x3087   :  { %9080 = vmatprep.subr.mxu1 %v9799_v8 }
0x3089   :  { %9078 = vmatmul.mubr.msk.f32.vlgmr.msra.gmra.mrb[86].mxu1 %vm326_vm2, %v6989_v24 }
0x308a   :  { %9081 = vmatpush3.xpose.msk.msra.mxu1 %vm326_vm2, %v7069_v45  ;;  %9082 = vmatprep.mubr.msk.f32.mxu1 %vm9800_vm1, %v9799_v8 }
0x308b   :  { %9090 = vmatprep.subr.mxu1 %v9799_v8 }
0x308d   :  { %9083 = vmatmul.mubr.msk.f32.vlgmr.msra.gmra.mrb[88].mxu1 %vm326_vm2, %v7067_v26 }
0x308e   :  { %9092 = vmatprep.mubr.msk.f32.mxu1 %vm9800_vm1, %v9799_v8 }
0x30b0   :  { %v6654_v47 = vpop.xlane.xlu0 %6653 }
0x30b1   :  { %v6658_v48 = vsub.f32 %v6650_v34, %v6654_v47 }
0x30b3   :  { %v6660_v49 = vmul.f32 1.442695, %v6658_v48 }
0x30b4   :  { %v6675_v7 = vpop.permute.xlu0 %6674 }
0x30b5   :  { %9476 = vpow2.f32 %v6660_v49  ;;  %9056 = vmatpush3.msra.mxu0 %v6675_v7 }
0x30b6   :  { %9065 = vmatprep.subr.mxu0 %v8292_v62 }
0x30b8   :  { %v7169_v18 = vpop.permute.xlu0 %7168 }
0x30bc   :  { %v7406_v22 = vpop.permute.xlu0 %7405 }
0x30bf   :  { %v9477_v5 = vpop.eup %9476 }
0x30c0   :  { %v6664_v50 = vsel %vm326_vm2, %v9477_v5, 0.0 }
0x30c1   :  { %6665 = vadd.xlane.f32.xlu1 %v6664_v50 }
0x314e   :  { %v6666_v51 = vpop.xlane.xlu1 %6665 }
0x314f   :  { %9478 = vrcp.f32 %v6666_v51 }
0x3158   :  { %v6822_v35 = vpop.f32.mrb[84].mxu1 }
0x3159   :  { %v9479_v52 = vpop.eup %9478  ;;  %v9064_v53 = vpop.f32.mrb[85].mxu1 }
0x315a   :  { %v6672_v54 = vmul.f32 %v9479_v52, %v9477_v5 }
0x315c   :  { %9058 = vmatmul.mubr.msk.f32.vlgmr.msra.gmra.mrb[46].mxu0 %vm326_vm2, %v6672_v54  ;;  %v7062_v55 = vpop.f32.mrb[86].mxu1 }
0x315d   :  { %v7144_v57 = vmul.f32 0.35355338, %v7062_v55  ;;  %v9079_v58 = vpop.f32.mrb[87].mxu1  ;;  %9066 = vmatpush3.msra.mxu0 %v8292_v62  ;;  %v8328_v62 = vld [vmem:[%s11071_s11 + $0x1] ss:$0 sm:$0xff] }
0x315e   :  { %9070 = vmatprep.subr.mxu0 %v8291_v63 }
0x315f   :  { %v7146_v15 = vsel %vm326_vm2, %v7144_v57, -inf }
0x3160   :  { %7147 = vmax.xlane.f32.xlu1 %v7146_v15  ;;  %v7140_v16 = vpop.f32.mrb[88].mxu1 }
0x3161   :  { %v7145_v59 = vmul.f32 0.35355338, %v7140_v16  ;;  %v9084_v60 = vpop.f32.mrb[89].mxu1 }
0x3163   :  { %v7149_v61 = vsel %vm326_vm2, %v7145_v59, -inf }
0x3164   :  { %7150 = vmax.xlane.f32.xlu1 %v7149_v61 }
0x31ed   :  { %v7148_v0 = vpop.xlane.xlu1 %7147 }
0x31ee   :  { %v7152_v1 = vsub.f32 %v7144_v57, %v7148_v0  ;;  %v8294_v57 = vld [vmem:[%s11070_s10 + $0x38] sm:$0xff] }
0x31f0   :  { %v7154_v3 = vmul.f32 1.442695, %v7152_v1 }
0x31f1   :  { %v7151_v4 = vpop.xlane.xlu1 %7150 }
0x31f2   :  { %9480 = vpow2.f32 %v7154_v3  ;;  %v7153_v56 = vsub.f32 %v7145_v59, %v7151_v4 }
0x31f4   :  { %v7156_v6 = vmul.f32 1.442695, %v7153_v56 }
0x31f6   :  { %9482 = vpow2.f32 %v7156_v6 }
0x31fc   :  { %v9481_v32 = vpop.eup %9480 }
0x31fd   :  { %v7158_v31 = vsel %vm326_vm2, %v9481_v32, 0.0 }
0x31fe   :  { %7159 = vadd.xlane.f32.xlu1 %v7158_v31 }
0x3200   :  { %v9483_v9 = vpop.eup %9482 }
0x3201   :  { %v7161_v10 = vsel %vm326_vm2, %v9483_v9, 0.0 }
0x3202   :  { %7162 = vadd.xlane.f32.xlu1 %v7161_v10 }
0x3213   :  { %7244 = vrot.lane.b32.xlu1 %v10807_v44, %s9805_s20 }
0x322f   :  { %v6746_v11 = vpop.f32.mrb[46].mxu0 }
0x3230   :  { %v9059_v2 = vpop.f32.mrb[47].mxu0  ;;  %9067 = vmatprep.mubr.msk.f32.mxu0 %vm326_vm2, %v6746_v11 }
0x3231   :  { %9068 = vmatmul.mubr.msk.f32.vlgmr.msra.gmra.mrb[48].mxu0 %vm326_vm2, %v6822_v35 }
0x3232   :  { %9072 = vmatprep.mubr.msk.f32.mxu0 %vm326_vm2, %v10875_v23  ;;  %9071 = vmatpush3.msra.mxu0 %v8291_v63 }
0x3233   :  { %9085 = vmatprep.subr.mxu0 %v9799_v8 }
0x3239   :  { %9073 = vmatmul.mubr.msk.f32.vlgmr.msra.gmra.mrb[48].mxu0 %vm326_vm2, %v10866_v17  ;;  %v7484_v17 = vpop.permute.xlu0 %7483 }
0x323a   :  { %9086 = vmatpush3.msra.mxu0 %v7169_v18  ;;  %9087 = vmatprep.mubr.msk.f32.mxu0 %vm9800_vm1, %v9799_v8 }
0x323b   :  { %9095 = vmatprep.subr.mxu0 %v8293_v14 }
0x323d   :  { %v7404_v28 = vpop.permute.xlu0 %7403 }
0x3241   :  { %v7482_v34 = vpop.permute.xlu0 %7481 }
0x328b   :  { %v7160_v19 = vpop.xlane.xlu1 %7159 }
0x328c   :  { %9484 = vrcp.f32 %v7160_v19 }
0x328f   :  { %v7163_v20 = vpop.xlane.xlu1 %7162 }
0x3290   :  { %9486 = vrcp.f32 %v7163_v20  ;;  %v7875_v20 = vld [vmem:[#allocation16 + $0x20] sm:$0xff] }
0x3293   :  { %v7245_v21 = vpop.permute.xlu1 %7244 }
0x3294   :  { %9091 = vmatpush3.msra.mxu1 %v7245_v21  ;;  %v7876_v21 = vld [vmem:[#allocation16 + $0x28] sm:$0xff] }
0x3295   :  { %9100 = vmatprep.subr.mxu1 %v9799_v8 }
0x3296   :  { %v9485_v23 = vpop.eup %9484 }
0x3297   :  { %v7166_v12 = vmul.f32 %v9485_v23, %v9481_v32  ;;  %v7877_v23 = vld [vmem:[#allocation16 + $0x30] sm:$0xff] }
0x3299   :  { %9088 = vmatmul.mubr.msk.f32.vlgmr.msra.gmra.mrb[50].mxu0 %vm326_vm2, %v7166_v12  ;;  %v7878_v12 = vld [vmem:[#allocation16 + $0x38] sm:$0xff] }
0x329a   :  { %v9487_v25 = vpop.eup %9486  ;;  %9096 = vmatpush3.msra.mxu0 %v8293_v14 }
0x329b   :  { %v7167_v27 = vmul.f32 %v9487_v25, %v9483_v9  ;;  %9105 = vmatprep.subr.mxu0 %v9799_v8  ;;  %v9263_v25 = vpack.c.bf16 %v7878_v12, %v7877_v23 }
0x329d   :  { %9093 = vmatmul.mubr.msk.f32.vlgmr.msra.gmra.mrb[90].mxu1 %vm326_vm2, %v7167_v27  ;;  %v8335_v27 = vld [vmem:[%s11112_s27 + $0x88] sm:$0xff] }
0x329e   :  { %9101 = vmatpush3.xpose.msk.msra.mxu1 %vm326_vm2, %v7406_v22  ;;  %9102 = vmatprep.mubr.msk.f32.mxu1 %vm9800_vm1, %v9799_v8  ;;  %v9259_v22 = vpack.c.bf16 %v7876_v21, %v7875_v20 }
0x329f   :  { %9110 = vmatprep.subr.mxu1 %v9799_v8 }
0x32a1   :  { %9103 = vmatmul.mubr.msk.f32.vlgmr.msra.gmra.mrb[92].mxu1 %vm326_vm2, %v7404_v28  ;;  %v8336_v28 = vld [vmem:[%s11112_s27 + $0x90] sm:$0xff] }
0x32a2   :  { %9112 = vmatprep.mubr.msk.f32.mxu1 %vm9800_vm1, %v9799_v8 }
0x336c   :  { %v7240_v29 = vpop.f32.mrb[50].mxu0 }
0x336d   :  { %v9089_v30 = vpop.f32.mrb[51].mxu0  ;;  %9097 = vmatprep.mubr.msk.f32.mxu0 %vm326_vm2, %v7240_v29 }
0x336e   :  { %v8337_v30 = vld [vmem:[%s11112_s27 + $0x98] sm:$0xff] }
0x3370   :  { %v7316_v13 = vpop.f32.mrb[90].mxu1 }
0x3371   :  { %v9094_v33 = vpop.f32.mrb[91].mxu1  ;;  %9098 = vmatmul.mubr.msk.f32.vlgmr.msra.gmra.mrb[48].mxu0 %vm326_vm2, %v7316_v13  ;;  %v9271_v13 = vpack.c.bf16 %v8337_v30, %v8336_v28 }
0x3372   :  { %9106 = vmatpush3.xpose.msk.msra.mxu0 %vm326_vm2, %v7484_v17  ;;  %9107 = vmatprep.mubr.msk.f32.mxu0 %vm9800_vm1, %v9799_v8  ;;  %v8334_v17 = vld [vmem:[%s11112_s27 + $0x80] sm:$0xff] }
0x3373   :  { %9115 = vmatprep.subr.mxu0 %v9799_v8  ;;  %v9267_v29 = vpack.c.bf16 %v8335_v27, %v8334_v17  ;;  %v8338_v33 = vld [vmem:[%s11112_s27 + $0xa0] sm:$0xff] }
0x3374   :  { %v7477_v36 = vpop.f32.mrb[92].mxu1 }
0x3375   :  { %v7559_v37 = vmul.f32 0.35355338, %v7477_v36  ;;  %v9104_v38 = vpop.f32.mrb[93].mxu1  ;;  %9108 = vmatmul.mubr.msk.f32.vlgmr.msra.gmra.mrb[52].mxu0 %vm326_vm2, %v7482_v34  ;;  %v8339_v34 = vld [vmem:[%s11112_s27 + $0xa8] sm:$0xff] }
0x3376   :  { %9117 = vmatprep.mubr.msk.f32.mxu0 %vm9800_vm1, %v9799_v8  ;;  %v9275_v36 = vpack.c.bf16 %v8339_v34, %v8338_v33  ;;  %v8341_v38 = vld [vmem:[%s11112_s27 + $0xb8] sm:$0xff] }
0x3377   :  { %v7561_v39 = vsel %vm326_vm2, %v7559_v37, -inf }
0x3378   :  { %7562 = vmax.xlane.f32.xlu1 %v7561_v39 }
0x3405   :  { %v7563_v40 = vpop.xlane.xlu1 %7562 }
0x3406   :  { %v7567_v43 = vsub.f32 %v7559_v37, %v7563_v40  ;;  %v8340_v37 = vld [vmem:[%s11112_s27 + $0xb0] sm:$0xff]  ;;  %v8342_v40 = vld [vmem:[%s11112_s27 + $0xc0] sm:$0xff] }
0x3407   :  { %v9279_v39 = vpack.c.bf16 %v8341_v38, %v8340_v37  ;;  %v8351_v37 = vld [vmem:[#allocation13 + $0x1] ss:$0 sm:$0xff] }
0x3408   :  { %v7569_v24 = vmul.f32 1.442695, %v7567_v43  ;;  %v8343_v43 = vld [vmem:[%s11112_s27 + $0xc8] sm:$0xff] }
0x340a   :  { %9488 = vpow2.f32 %v7569_v24  ;;  %v9283_v24 = vpack.c.bf16 %v8343_v43, %v8342_v40  ;;  %v8352_v43 = vld [vmem:[#allocation14 + $0x1] ss:$0 sm:$0xff] }
0x3414   :  { %v9489_v49 = vpop.eup %9488 }
0x3415   :  { %v7573_v7 = vsel %vm326_vm2, %v9489_v49, 0.0 }
0x3448   :  { %v7555_v45 = vpop.f32.mrb[52].mxu0 }
0x3449   :  { %v7560_v26 = vmul.f32 0.35355338, %v7555_v45  ;;  %v9109_v47 = vpop.f32.mrb[53].mxu0  ;;  %v8344_v45 = vld [vmem:[%s11112_s27 + $0xd0] sm:$0xff] }
0x344b   :  { %v7564_v48 = vsel %vm326_vm2, %v7560_v26, -inf }
0x344c   :  { %7565 = vmax.xlane.f32.xlu0 %v7564_v48  ;;  %v8346_v48 = vld [vmem:[%s11112_s27 + $0xe0] sm:$0xff] }
0x3450   :  { %7574 = vadd.xlane.f32.xlu0 %v7573_v7 }
0x3466   :  { %7583 = vrot.lane.b32.xlu0 %v10809_v46, %s9809_s17 }
0x34d9   :  { %v7566_v8 = vpop.xlane.xlu0 %7565 }
0x34da   :  { %v7568_v5 = vsub.f32 %v7560_v26, %v7566_v8  ;;  %v8345_v26 = vld [vmem:[%s11112_s27 + $0xd8] sm:$0xff] }
0x34db   :  { %v9287_v47 = vpack.c.bf16 %v8345_v26, %v8344_v45 }
0x34dc   :  { %v7571_v50 = vmul.f32 1.442695, %v7568_v5 }
0x34dd   :  { %v7575_v51 = vpop.xlane.xlu0 %7574 }
0x34de   :  { %9490 = vpow2.f32 %v7571_v50 }
0x34df   :  { %9492 = vrcp.f32 %v7575_v51 }
0x34e1   :  { %v7584_v35 = vpop.permute.xlu0 %7583 }
0x34e2   :  { %9111 = vmatpush3.msra.mxu1 %v7584_v35 }
0x34e3   :  { %9260 = vmatprep.subr.bf16.mxu1 %v9259_v22 }
0x34e8   :  { %v9491_v52 = vpop.eup %9490 }
0x34e9   :  { %v9493_v53 = vpop.eup %9492  ;;  %v7576_v54 = vsel %vm326_vm2, %v9491_v52, 0.0 }
0x34ea   :  { %v7581_v55 = vmul.f32 %v9493_v53, %v9489_v49  ;;  %7577 = vadd.xlane.f32.xlu1 %v7576_v54  ;;  %v8347_v49 = vld [vmem:[%s11112_s27 + $0xe8] sm:$0xff]  ;;  %v8329_v54 = vld [vmem:[#allocation10 + $0x1] ss:$0 sm:$0xff] }
0x34eb   :  { %v9291_v7 = vpack.c.bf16 %v8347_v49, %v8346_v48 }
0x34ec   :  { %9113 = vmatmul.mubr.msk.f32.vlgmr.msra.gmra.mrb[94].mxu1 %vm326_vm2, %v7581_v55 }
0x34ed   :  { %9262 = vmatpush3.bf16.msra.mxu1 %v9259_v22 }
0x34ee   :  { %9264 = vmatprep.subr.bf16.mxu1 %v9263_v25 }
0x34f1   :  { %9266 = vmatpush3.bf16.msra.mxu1 %v9263_v25 }
0x34fb   :  { %7659 = vrot.lane.b32.xlu1 %v10807_v44, %s9809_s17 }
0x3577   :  { %v7578_v46 = vpop.xlane.xlu1 %7577 }
0x3578   :  { %9494 = vrcp.f32 %v7578_v46 }
0x357b   :  { %v7660_v58 = vpop.permute.xlu1 %7659 }
0x357c   :  { %9116 = vmatpush3.msra.mxu0 %v7660_v58  ;;  %v8330_v58 = vld [vmem:[#allocation11 + $0x1] ss:$0 sm:$0xff] }
0x357d   :  { %9120 = vmatprep.subr.mxu0 %v8294_v57 }
0x3582   :  { %v9495_v15 = vpop.eup %9494 }
0x3583   :  { %v7582_v16 = vmul.f32 %v9495_v15, %v9491_v52 }
0x3585   :  { %9118 = vmatmul.mubr.msk.f32.vlgmr.msra.gmra.mrb[54].mxu0 %vm326_vm2, %v7582_v16 }
0x3586   :  { %9121 = vmatpush3.msra.mxu0 %v8294_v57 }
0x3587   :  { %9268 = vmatprep.subr.bf16.mxu0 %v9267_v29 }
0x35bf   :  { %v7655_v59 = vpop.f32.mrb[94].mxu1 }
0x35c0   :  { %v9114_v60 = vpop.f32.mrb[95].mxu1  ;;  %9122 = vmatprep.mubr.msk.f32.mxu0 %vm326_vm2, %v7655_v59 }
0x3658   :  { %v7731_v61 = vpop.f32.mrb[54].mxu0 }
0x3659   :  { %v9119_v44 = vpop.f32.mrb[55].mxu0  ;;  %9123 = vmatmul.mubr.msk.f32.vlgmr.msra.gmra.mrb[48].mxu0 %vm326_vm2, %v7731_v61  ;;  %v8348_v61 = vld [vmem:[%s11112_s27 + $0xf0] sm:$0xff] }
0x365a   :  { %9270 = vmatpush3.bf16.msra.mxu0 %v9267_v29  ;;  %v8349_v44 = vld [vmem:[%s11112_s27 + $0xf8] sm:$0xff]  ;;  %s9812_s27 = smov [#allocation20]  }
0x365b   :  { %9272 = vmatprep.subr.bf16.mxu0 %v9271_v13  ;;  %s8125_s2 = sshll.u32 %s9812_s27, 4  ;;  %s8126_s2 = int_to_ptr.vmem [resolvable:$true] %s8125_s2 }
0x365c   :  { %s9748_s15 = scalar_lea.vmem %s8126_s2, 256  ;;  %p9753_p5 = scmp.lt.s32.totalorder %s8126_s2, %s8126_s2 }
0x365d   :  { %p9749_p4 = scmp.ne.s32.totalorder %s8126_s2, %s9748_s15  ;;  %p9754_p6 = scmp.lt.s32.totalorder %s9748_s15, %s9748_s15 }
0x365e   :  { %9274 = vmatpush3.bf16.msra.mxu0 %v9271_v13 }
0x365f   :  { %9276 = vmatprep.subr.bf16.mxu0 %v9275_v36  ;;  %p9755_p7 = por %p9754_p6, %p9753_p5 }
0x3661   :  { %p9756_p8 = pnand %p9755_p7, %p9749_p4 }
0x3662   :  { %9278 = vmatpush3.bf16.msra.mxu0 %v9275_v36 }
0x3663   :  { %9280 = vmatprep.subr.bf16.mxu0 %v9279_v39 }
0x3666   :  { %9282 = vmatpush3.bf16.msra.mxu0 %v9279_v39 }
0x3667   :  { %9284 = vmatprep.subr.bf16.mxu0 %v9283_v24 }
0x366a   :  { %9286 = vmatpush3.bf16.msra.mxu0 %v9283_v24 }
0x366b   :  { %9288 = vmatprep.subr.bf16.mxu0 %v9287_v47 }
0x366e   :  { %9290 = vmatpush3.bf16.msra.mxu0 %v9287_v47 }
0x366f   :  { %9292 = vmatprep.subr.bf16.mxu0 %v9291_v7 }
0x3672   :  { %9294 = vmatpush3.bf16.msra.mxu0 %v9291_v7 }
0x372c   :  { %v9124_v63 = vpop.f32.mrb[48].mxu0 }
0x372d   :  { %v7825_v0 = vadd.f32 %v9124_v63, %v8328_v62  ;;  %v7807_v1 = vpop.f32.mrb[49].mxu0  ;;  %v8331_v63 = vld [vmem:[#allocation17 + $0x1] ss:$0 sm:$0xff] }
0x372e   :  { %v7824_v3 = vadd.f32 %v8328_v62, %v7807_v1  ;;  %v9295_v62 = vpack.c.bf16 %v8349_v44, %v8348_v61 }
0x372f   :  { %v7827_v4 = vadd.f32 %v7825_v0, %v10796_v42 }
0x3730   :  { %v7826_v56 = vadd.f32 %v7824_v3, %v10794_v41  ;;  %9296 = vmatprep.subr.bf16.mxu0 %v9295_v62 }
0x3731   :  { %v7835_v6 = vsel %vm236_vm0, %v7827_v4, 0.0  ;;  %9298 = vmatpush3.bf16.msra.mxu0 %v9295_v62 }
0x3732   :  { %7836 = vadd.xlane.f32.xlu0 %v7835_v6  ;;  %v7832_v32 = vsel %vm236_vm0, %v7826_v56, 0.0 }
0x3733   :  { %7833 = vadd.xlane.f32.xlu1 %v7832_v32  ;;  %v8350_v32 = vld [vmem:[#allocation19 + $0x1] ss:$0 sm:$0xff] }
0x37bf   :  { %v7837_v31 = vpop.xlane.xlu0 %7836 }
0x37c0   :  { %v7839_v9 = vmul.f32 0.03125, %v7837_v31  ;;  %v7834_v10 = vpop.xlane.xlu1 %7833 }
0x37c1   :  { %v7838_v11 = vmul.f32 0.03125, %v7834_v10 }
0x37c2   :  { %v10977_v2 = vsub.f32 %v7827_v4, %v7839_v9 }
0x37c3   :  { %v10979_v14 = vsub.f32 %v7826_v56, %v7838_v11 }
0x37c4   :  { %v7843_v18 = vmul.f32 %v10977_v2, %v10977_v2 }
0x37c5   :  { %v7842_v41 = vmul.f32 %v10979_v14, %v10979_v14 }
0x37c6   :  { %v7847_v42 = vsel %vm236_vm0, %v7843_v18, 0.0 }
0x37c7   :  { %7848 = vadd.xlane.f32.xlu1 %v7847_v42  ;;  %v7844_v19 = vsel %vm236_vm0, %v7842_v41, 0.0 }
0x37c8   :  { %7845 = vadd.xlane.f32.xlu0 %v7844_v19 }
0x3854   :  { %v7849_v8 = vpop.xlane.xlu1 %7848 }
0x3855   :  { %v7851_v5 = vmul.f32 0.03125, %v7849_v8  ;;  %v7846_v50 = vpop.xlane.xlu0 %7845 }
0x3856   :  { %v7850_v51 = vmul.f32 0.03125, %v7846_v50 }
0x3857   :  { %v7853_v35 = vadd.f32 1e-05, %v7851_v5 }
0x3858   :  { %v7852_v52 = vadd.f32 1e-05, %v7850_v51 }
0x3859   :  { %9496 = vrsqrt.f32 %v7853_v35 }
0x385a   :  { %9498 = vrsqrt.f32 %v7852_v52 }
0x3863   :  { %v9497_v53 = vpop.eup %9496 }
0x3864   :  { %v9499_v55 = vpop.eup %9498  ;;  %v7857_v46 = vmul.f32 %v9497_v53, %v10977_v2 }
0x3865   :  { %v7856_v57 = vmul.f32 %v9499_v55, %v10979_v14 }
0x3866   :  { %v7865_v15 = vmul.f32 %v8329_v54, %v7857_v46 }
0x3867   :  { %v7864_v16 = vmul.f32 %v8329_v54, %v7856_v57 }
0x3868   :  { %v7873_v60 = vadd.f32 %v8330_v58, %v7865_v15 }
0x3869   :  { %v7872_v59 = vadd.f32 %v8330_v58, %v7864_v16 }
0x386b   :  { %9133 = vmatprep.mubr.msk.f32.mxu1 %vm236_vm0, %v7872_v59 }
0x386c   :  { %9134 = vmatmul.mubr.msk.f32.vlgmr.msra.gmra.mrb[96].mxu1 %vm236_vm0, %v7873_v60 }
0x393f   :  { %v9135_v0 = vpop.f32.mrb[96].mxu1 }
0x3940   :  { %v7965_v1 = vadd.f32 %v9135_v0, %v8331_v63  ;;  %v7959_v3 = vpop.f32.mrb[97].mxu1 }
0x3941   :  { %v7960_v4 = vadd.f32 %v8331_v63, %v7959_v3 }
0x3942   :  { %v7969_v6 = vmax.f32 %v7965_v1, 0.0 }
0x3943   :  { %v7968_v56 = vmax.f32 %v7960_v4, 0.0 }
0x3945   :  { %9168 = vmatprep.mubr.f32.mxu0 %v7968_v56 }
0x3946   :  { %9169 = vmatmul.mubr.f32.vlgmr.msra.gmra.mrb[56].mxu0 %v7969_v6 }
0x3a19   :  { %v9170_v31 = vpop.f32.mrb[56].mxu0 }
0x3a1a   :  { %v8067_v9 = vadd.f32 %v9170_v31, %v8350_v32  ;;  %v8061_v10 = vpop.f32.mrb[57].mxu0 }
0x3a1b   :  { %v8062_v11 = vadd.f32 %v8350_v32, %v8061_v10 }
0x3a1c   :  { %v8071_v2 = vadd.f32 %v8067_v9, %v7873_v60 }
0x3a1d   :  { %v8070_v14 = vadd.f32 %v8062_v11, %v7872_v59 }
0x3a1e   :  { %v8079_v18 = vsel %vm236_vm0, %v8071_v2, 0.0 }
0x3a1f   :  { %8080 = vadd.xlane.f32.xlu1 %v8079_v18  ;;  %v8076_v41 = vsel %vm236_vm0, %v8070_v14, 0.0 }
0x3a20   :  { %8077 = vadd.xlane.f32.xlu0 %v8076_v41 }
0x3aac   :  { %v8081_v42 = vpop.xlane.xlu1 %8080 }
0x3aad   :  { %v8083_v19 = vmul.f32 0.03125, %v8081_v42  ;;  %v8078_v20 = vpop.xlane.xlu0 %8077 }
0x3aae   :  { %v8082_v21 = vmul.f32 0.03125, %v8078_v20 }
0x3aaf   :  { %v8085_v22 = vsub.f32 %v8071_v2, %v8083_v19 }
0x3ab0   :  { %v8084_v23 = vsub.f32 %v8070_v14, %v8082_v21 }
0x3ab1   :  { %v8087_v12 = vmul.f32 %v8085_v22, %v8085_v22 }
0x3ab2   :  { %v8086_v25 = vmul.f32 %v8084_v23, %v8084_v23 }
0x3ab3   :  { %v8091_v17 = vsel %vm236_vm0, %v8087_v12, 0.0 }
0x3ab4   :  { %8092 = vadd.xlane.f32.xlu1 %v8091_v17  ;;  %v8088_v27 = vsel %vm236_vm0, %v8086_v25, 0.0 }
0x3ab5   :  { %8089 = vadd.xlane.f32.xlu0 %v8088_v27 }
0x3b41   :  { %v8093_v28 = vpop.xlane.xlu1 %8092 }
0x3b42   :  { %v8095_v29 = vmul.f32 0.03125, %v8093_v28  ;;  %v8090_v30 = vpop.xlane.xlu0 %8089 }
0x3b43   :  { %v8094_v13 = vmul.f32 0.03125, %v8090_v30 }
0x3b44   :  { %v8097_v33 = vadd.f32 1e-05, %v8095_v29 }
0x3b45   :  { %v8096_v34 = vadd.f32 1e-05, %v8094_v13 }
0x3b46   :  { %9500 = vrsqrt.f32 %v8097_v33 }
0x3b47   :  { %9502 = vrsqrt.f32 %v8096_v34 }
0x3b50   :  { %v9501_v36 = vpop.eup %9500 }
0x3b51   :  { %v9503_v38 = vpop.eup %9502  ;;  %v8101_v39 = vmul.f32 %v9501_v36, %v8085_v22 }
0x3b52   :  { %v8100_v40 = vmul.f32 %v9503_v38, %v8084_v23 }
0x3b53   :  { %v8109_v24 = vmul.f32 %v8351_v37, %v8101_v39 }
0x3b54   :  { %v8108_v45 = vmul.f32 %v8351_v37, %v8100_v40 }
0x3b55   :  { %v8117_v26 = vadd.f32 %v8352_v43, %v8109_v24 }
0x3b56   :  { %v8116_v47 = vadd.f32 %v8352_v43, %v8108_v45 }
0x3b57   :  { %8119 = vst.msk [vmem:[#allocation20 + $0x8] sm:$0xff] %vm236_vm0, %v8117_v26 }
0x3b58   :  { %8118 = vst.msk [vmem:[#allocation20] sm:$0xff] %vm236_vm0, %v8116_v47 }
0x3b59   :  { %9759 = shalt.err (!%p9756_p8)
}
0x3b5a   :  { %s11114_s16 = sld [smem:[#allocation36_spill]] }
0x3b60   :  { %s9760_s28 = scalar_lea.hbm %s11114_s16, 256 }
0x3b61   :  { %p9761_p9 = scmp.ne.s32.totalorder %s11114_s16, %s9760_s28  ;;  %p9764_p10 = scmp.lt.u32.totalorder %s9760_s28, %s11114_s16 }
0x3b63   :  { %p9766_p11 = pnand %p9764_p10, %p9761_p9 }
0x3b65   :  { %9769 = shalt.err (!%p9766_p11)
}
0x3b66   :  { %s11115_s23 = smov 8   ;;  %s11116_s21 = smov 128  }
0x3b67   :  { %8131 = dma.vmem_to_hbm [thread:$0]  %s8126_s2, 256, %s11114_s16, [#allocation4], %s11116_s21, %s11116_s21, %s11115_s23  }
0x3b68   :  { %9782 = dma.done.wait [#allocation4], 256  }
0x3b69   :  { %9783 = vsyncadd [#allocation4], 4294967040 }
0x3b6a   :  { %8135 = vsyncpa [#allocation3], 1 }
0x3b6b   :  { %8136 = vsyncpa [#allocation6], 1 }
0x3b6c   :  { %8137 = vsyncpa [#allocation9], 1 }
0x3b6d   :  { %8138 = vsyncpa [#allocation12], 1 }
0x3b6e   :  { %8139 = vsyncpa [#allocation15], 1 }
0x3b6f   :  { %8140 = vsyncpa [#allocation18], 1 }
0x3b70   :  { %8141 = vsyncpa [#allocation4], 1 }

</bundles_post_ra>
